<compile_context>
chip_gen: v7x
topology: tpu7x:2x2x1
jax: 0.10.0
libtpu: 0.0.40
codegen_flags: <defaults>
</compile_context>

<pallas_src>
import functools
import numpy as np
import jax
import jax.numpy as jnp
from jax.experimental import pallas as pl
from jax.experimental.pallas import tpu as pltpu


def _upblock_kernel(x_ref, skip_ref, gb_ref,
                    wup_ref, bupf_ref,
                    wb1a_ref, wb1b_ref, wb1c_ref, b1f_ref,
                    wb2a_ref, wb2b_ref, wb2c_ref, b2f_ref,
                    out_ref,
                    p_cat, p_h,
                    *, Bt, H, W2, Co, Cskip):
    NU = W2 * Co                 # packed width of one "up" image row
    NS = W2 * Cskip              # packed width of one "skip" image row
    NC = NU + NS                 # packed width of one concatenated image row
    S = H + 2                    # per-image row stride in the padded scratches
    T = Bt * S                   # total scratch rows for this step
    f32, bf16 = jnp.float32, jnp.bfloat16

    # Zero ONLY the 1-row top/bottom halo of every image, EVERY step (interiors
    # are fully overwritten).  Never gate this behind program_id == 0: under
    # dimension_semantics=("parallel",) the second TensorCore never sees step 0.
    zc = jnp.zeros((1, 2 * NC), p_cat.dtype)
    zh = jnp.zeros((1, 2 * NU), p_h.dtype)
    for t in range(Bt):
        base = t * S
        p_cat[base:base + 1, :] = zc
        p_cat[base + H + 1:base + H + 2, :] = zc
        p_h[base:base + 1, :] = zh
        p_h[base + H + 1:base + H + 2, :] = zh

    # ---- ConvTranspose2d(k=2, s=2): ONE bf16 matmul over all Bt images
    # (M = Bt*H).  The fused weight emits the row-folded [even | odd] layout. ----
    up = jnp.dot(x_ref[...], wup_ref[...],
                 preferred_element_type=f32) + bupf_ref[...]      # (Bt*H, 2*NU) f32

    # ---- torch.cat([up, skip], dim=1): lane-aligned block stores into one
    # padded scratch; conv1's banded weight rows are ordered to match. ----
    sk = skip_ref[...].astype(f32)                                # (Bt*H, 2*NS)
    for t in range(Bt):
        base = t * S
        r0 = t * H
        dst = slice(base + 1, base + 1 + H)
        p_cat[dst, 0:NU] = up[r0:r0 + H, 0:NU]                    # up,   even rows
        p_cat[dst, NU:NC] = sk[r0:r0 + H, 0:NS]                   # skip, even rows
        p_cat[dst, NC:NC + NU] = up[r0:r0 + H, NU:2 * NU]         # up,   odd rows
        p_cat[dst, NC + NU:2 * NC] = sk[r0:r0 + H, NS:2 * NS]     # skip, odd rows

    # ---- conv1 (3x3, pad=1) + ReLU: kx bands + even/odd folding baked into the
    # weights -> 3 matmuls over ALL images at once.  Result rows that straddle
    # image halos are garbage and are simply never stored. ----
    rB = p_cat[1:T - 1, :].astype(bf16)            # folded row i   (both halves)
    rA = p_cat[0:T - 2, NC:2 * NC].astype(bf16)    # folded row i-1, odd  half
    rC = p_cat[2:T, 0:NC].astype(bf16)             # folded row i+1, even half
    acc = jnp.dot(rB, wb1b_ref[...], preferred_element_type=f32)  # (T-2, 2*NU)
    h1e = jnp.maximum(
        acc[:, 0:NU] + jnp.dot(rA, wb1a_ref[...], preferred_element_type=f32)
        + b1f_ref[...], 0.0)
    h1o = jnp.maximum(
        acc[:, NU:2 * NU] + jnp.dot(rC, wb1c_ref[...], preferred_element_type=f32)
        + b1f_ref[...], 0.0)
    for t in range(Bt):
        base = t * S
        dst = slice(base + 1, base + 1 + H)
        p_h[dst, 0:NU] = h1e[base:base + H]        # valid rows only; halos stay 0
        p_h[dst, NU:2 * NU] = h1o[base:base + H]

    # ---- conv2 (3x3, pad=1) + ReLU: same folded-banded structure. ----
    rB2 = p_h[1:T - 1, :].astype(bf16)
    rA2 = p_h[0:T - 2, NU:2 * NU].astype(bf16)
    rC2 = p_h[2:T, 0:NU].astype(bf16)
    acc2 = jnp.dot(rB2, wb2b_ref[...], preferred_element_type=f32)
    h2e = jnp.maximum(
        acc2[:, 0:NU] + jnp.dot(rA2, wb2a_ref[...], preferred_element_type=f32)
        + b2f_ref[...], 0.0)
    h2o = jnp.maximum(
        acc2[:, NU:2 * NU] + jnp.dot(rC2, wb2c_ref[...], preferred_element_type=f32)
        + b2f_ref[...], 0.0)

    # ---- FiLM (gamma/beta precomputed in the XLA wrapper; per-image broadcast) ----
    for t in range(Bt):
        base = t * S
        g = gb_ref[t, 0:1, :]                      # (1, NU) gamma, tiled per pixel
        b = gb_ref[t, 1:2, :]                      # (1, NU) beta
        out_ref[t * H:(t + 1) * H, 0:NU] = h2e[base:base + H] * g + b
        out_ref[t * H:(t + 1) * H, NU:2 * NU] = h2o[base:base + H] * g + b


def prepare_upblock_params(wup, bup, w1, b1, w2, b2, wg, bg, wb, bb, W):
    """Build packed / banded / row-folded weights (numpy glue, done once).

    wup: (2, 2, Cin, Co)  ConvTranspose2d taps (ky, kx, ci, co)
    w1 : (3, 3, Cin, Co)  conv1 taps (HWIO); input channels = [up(Co), skip(Cskip)]
    w2 : (3, 3, Co, Co)   conv2 taps
    """
    wup = np.asarray(wup, np.float32)
    w1 = np.asarray(w1, np.float32)
    w2 = np.asarray(w2, np.float32)
    Cin, Co = wup.shape[2], wup.shape[3]
    Cskip = w1.shape[2] - Co
    assert Cin == Co + Cskip, "conv1 in_channels must equal Co + Cskip"
    W2 = 2 * W
    NU = W2 * Co

    # Fused ConvTranspose2d weight: x row i -> folded output row [even | odd].
    wupf = np.zeros((W * Cin, 2 * NU), np.float32)
    for xx in range(W):
        for ky in range(2):
            for kx in range(2):
                c0 = ky * NU + (2 * xx + kx) * Co
                wupf[xx * Cin:(xx + 1) * Cin, c0:c0 + Co] = wup[ky, kx]

    # kx-banded matrix for one ky tap; K layout = [group0 pixels | group1 pixels ...]
    def band(wk, splits):
        Co_ = wk.shape[-1]
        Kw = W2 * sum(hi - lo for lo, hi in splits)
        M = np.zeros((Kw, W2 * Co_), np.float32)
        base = 0
        for lo, hi in splits:
            g = hi - lo
            for xo in range(W2):
                for kx in range(3):
                    xi = xo + kx - 1
                    if 0 <= xi < W2:
                        M[base + xi * g: base + (xi + 1) * g,
                          xo * Co_:(xo + 1) * Co_] = wk[kx, lo:hi, :]
            base += W2 * g
        return M

    b1_ky = [band(w1[ky], [(0, Co), (Co, Cin)]) for ky in range(3)]   # (NC, NU)
    b2_ky = [band(w2[ky], [(0, Co)]) for ky in range(3)]              # (NU, NU)

    # Center-tap folded weight: [[band(ky=1), band(ky=0)], [band(ky=2), band(ky=1)]]
    def folded_center(bt):
        top = np.concatenate([bt[1], bt[0]], axis=1)
        bot = np.concatenate([bt[2], bt[1]], axis=1)
        return np.concatenate([top, bot], axis=0)

    def frow(v, reps):   # bias tiled over `reps` pixels of a packed row
        return np.tile(np.asarray(v, np.float32), reps)[None, :]

    return dict(
        Co=Co, Cskip=Cskip,
        wup=jnp.asarray(wupf, jnp.bfloat16),
        bupf=jnp.asarray(frow(bup, 2 * W2)),            # folded-row width (2*NU)
        wb1A=jnp.asarray(b1_ky[0], jnp.bfloat16),
        wb1B=jnp.asarray(folded_center(b1_ky), jnp.bfloat16),
        wb1C=jnp.asarray(b1_ky[2], jnp.bfloat16),
        b1f=jnp.asarray(frow(b1, W2)),                  # half-row width (NU)
        wb2A=jnp.asarray(b2_ky[0], jnp.bfloat16),
        wb2B=jnp.asarray(folded_center(b2_ky), jnp.bfloat16),
        wb2C=jnp.asarray(b2_ky[2], jnp.bfloat16),
        b2f=jnp.asarray(frow(b2, W2)),
        wg=jnp.asarray(wg, jnp.float32), bg=jnp.asarray(bg, jnp.float32),
        wb=jnp.asarray(wb, jnp.float32), bb=jnp.asarray(bb, jnp.float32),
    )


def _pick_batch_tile(batch, height, target_m=256):
    """Largest divisor of `batch` whose folded matmul M = d*height is <= target_m."""
    best = 1
    for d in range(1, batch + 1):
        if batch % d == 0 and d * height <= target_m:
            best = d
    return best


def upblock_forward(x_nchw, skip_nchw, cond, kp, batch_tile=None,
                    single_buffer_weights=True):
    B, Cin, H, W = x_nchw.shape
    Co, Cskip = kp["Co"], kp["Cskip"]
    assert Cin == Co + Cskip
    H2, W2 = 2 * H, 2 * W
    NU, NS = W2 * Co, W2 * Cskip
    NC = NU + NS

    Bt = _pick_batch_tile(B, H) if batch_tile is None else batch_tile
    assert B % Bt == 0, "batch must be divisible by batch_tile"
    steps = B // Bt

    # NCHW -> NHWC -> packed, row-folded 2-D slabs (all reshapes are free).
    x = jnp.transpose(x_nchw, (0, 2, 3, 1)).reshape(B * H, W * Cin).astype(jnp.bfloat16)
    skip = jnp.transpose(skip_nchw, (0, 2, 3, 1)).reshape(B * H, 2 * NS).astype(jnp.bfloat16)

    # FiLM gamma/beta hoisted to XLA (one tiny matmul), tiled over one packed
    # row and fused into a SINGLE per-step input (one DMA instead of two).
    gamma = cond @ kp["wg"] + kp["bg"]                           # (B, Co)
    beta = cond @ kp["wb"] + kp["bb"]
    gb = jnp.stack([jnp.tile(gamma, (1, W2)),
                    jnp.tile(beta, (1, W2))], axis=1)            # (B, 2, NU) f32

    kernel = functools.partial(_upblock_kernel, Bt=Bt, H=H, W2=W2, Co=Co, Cskip=Cskip)

    weights = (kp["wup"], kp["bupf"],
               kp["wb1A"], kp["wb1B"], kp["wb1C"], kp["b1f"],
               kp["wb2A"], kp["wb2B"], kp["wb2C"], kp["b2f"])

    def build(single_buf):
        def wspec(arr):
            nd = arr.ndim
            idx = lambda b, _nd=nd: (0,) * _nd
            if single_buf:
                # Grid-invariant weights: single-buffer to halve their VMEM.
                return pl.BlockSpec(arr.shape, idx, pipeline_mode=pl.Buffered(1))
            return pl.BlockSpec(arr.shape, idx)

        grid_spec = pltpu.PrefetchScalarGridSpec(
            num_scalar_prefetch=0,
            grid=(steps,),
            in_specs=[
                pl.BlockSpec((Bt * H, W * Cin), lambda b: (b, 0)),   # x (bf16)
                pl.BlockSpec((Bt * H, 2 * NS), lambda b: (b, 0)),    # skip (bf16)
                pl.BlockSpec((Bt, 2, NU), lambda b: (b, 0, 0)),      # gamma/beta
            ] + [wspec(w) for w in weights],
            out_specs=pl.BlockSpec((Bt * H, 2 * NU), lambda b: (b, 0)),
            scratch_shapes=[
                pltpu.VMEM((Bt * (H + 2), 2 * NC), jnp.float32),  # padded cat([up,skip])
                pltpu.VMEM((Bt * (H + 2), 2 * NU), jnp.float32),  # padded conv1 output
            ],
        )

        # Advisory cost estimate so XLA schedules neighbouring ops sensibly.
        M = Bt * H
        Mc = Bt * (H + 2) - 2
        flops_step = (2 * M * (W * Cin) * (2 * NU)                       # up
                      + 2 * Mc * (2 * NC) * (2 * NU) + 4 * Mc * NC * NU  # conv1
                      + 2 * Mc * (2 * NU) * (2 * NU) + 4 * Mc * NU * NU) # conv2
        bytes_step = (2 * M * (W * Cin) + 2 * M * (2 * NS)
                      + 4 * Bt * 2 * NU + 4 * M * (2 * NU))
        w_bytes = sum(int(np.prod(w.shape)) * w.dtype.itemsize for w in weights)
        cost = pl.CostEstimate(flops=int(steps * flops_step), transcendentals=0,
                               bytes_accessed=int(steps * bytes_step + w_bytes))

        return pl.pallas_call(
            kernel,
            out_shape=jax.ShapeDtypeStruct((B * H, 2 * NU), jnp.float32),
            grid_spec=grid_spec,
            compiler_params=pltpu.CompilerParams(dimension_semantics=("parallel",)),
            cost_estimate=cost,
        )

    args = (x, skip, gb) + weights
    if single_buffer_weights:
        try:
            out = build(True)(*args)
        except Exception:
            # Fallback if this JAX build rejects pl.Buffered(1) on pallas_call inputs.
            out = build(False)(*args)
    else:
        out = build(False)(*args)

    out = out.reshape(B, H2, W2, Co)             # unfold rows (free) -> NHWC
    return jnp.transpose(out, (0, 3, 1, 2))      # back to NCHW (PyTorch convention)


if __name__ == "__main__":
    # UpBlock(in_channels=16, out_channels=8, conditioning_dim=16)
    B, Cin, Co, Cd, H, W = 4, 16, 8, 16, 8, 8
    Cskip = Cin - Co                 # concat([up(Co), skip(Cskip)]) has Cin channels
    H2, W2 = 2 * H, 2 * W

    key = jax.random.PRNGKey(0)
    ks = jax.random.split(key, 16)
    s = 0.1
    wup = s * jax.random.normal(ks[0], (2, 2, Cin, Co), jnp.float32)   # (ky, kx, ci, co)
    bup = s * jax.random.normal(ks[1], (Co,), jnp.float32)
    w1 = s * jax.random.normal(ks[2], (3, 3, Cin, Co), jnp.float32)
    b1 = s * jax.random.normal(ks[3], (Co,), jnp.float32)
    w2 = s * jax.random.normal(ks[4], (3, 3, Co, Co), jnp.float32)
    b2 = s * jax.random.normal(ks[5], (Co,), jnp.float32)
    wg = s * jax.random.normal(ks[6], (Cd, Co), jnp.float32)
    bg = s * jax.random.normal(ks[7], (Co,), jnp.float32)
    wb = s * jax.random.normal(ks[8], (Cd, Co), jnp.float32)
    bb = s * jax.random.normal(ks[9], (Co,), jnp.float32)

    x = jax.random.normal(ks[10], (B, Cin, H, W), jnp.float32)          # NCHW
    skip = jax.random.normal(ks[11], (B, Cskip, H2, W2), jnp.float32)   # NCHW
    cond = jax.random.normal(ks[12], (B, Cd), jnp.float32)

    kp = prepare_upblock_params(wup, bup, w1, b1, w2, b2, wg, bg, wb, bb, W)

    # Bt=2 -> grid=(2,): folds 2 batch elements per step and still gives both
    # v7x TensorCores a step; on v5e/v6e each step just gets a fatter M.
    out = jax.block_until_ready(upblock_forward(x, skip, cond, kp, batch_tile=2))

    # ---- pure-numpy reference (same math as PyTorch UpBlock.forward) ----
    wup_n, w1_n, w2_n = np.asarray(wup), np.asarray(w1), np.asarray(w2)
    xn = np.transpose(np.asarray(x), (0, 2, 3, 1))
    sn = np.transpose(np.asarray(skip), (0, 2, 3, 1))
    cn = np.asarray(cond)
    up = np.einsum("bhwc,deco->bhdweo", xn, wup_n).reshape(B, H2, W2, Co) + np.asarray(bup)
    cat = np.concatenate([up, sn], axis=-1)

    def conv3(inp, wc, bc):
        padded = np.pad(inp, ((0, 0), (1, 1), (1, 1), (0, 0)))
        o = np.zeros(inp.shape[:3] + (wc.shape[-1],), np.float32)
        for ky in range(3):
            for kx in range(3):
                o += np.einsum("bhwc,co->bhwo",
                               padded[:, ky:ky + inp.shape[1], kx:kx + inp.shape[2], :],
                               wc[ky, kx])
        return o + bc

    h1 = np.maximum(conv3(cat, w1_n, np.asarray(b1)), 0.0)
    h2 = np.maximum(conv3(h1, w2_n, np.asarray(b2)), 0.0)
    gamma = cn @ np.asarray(wg) + np.asarray(bg)
    beta = cn @ np.asarray(wb) + np.asarray(bb)
    ref = h2 * gamma[:, None, None, :] + beta[:, None, None, :]
    ref_nchw = np.transpose(ref, (0, 3, 1, 2))

    err = float(np.max(np.abs(np.asarray(out) - ref_nchw)))
    # bf16 matmul operands with f32 accumulation -> relaxed tolerance vs f32 ref
    # (intentional precision contract).
    assert np.allclose(np.asarray(out), ref_nchw, atol=3e-2, rtol=3e-2), err
    print("KERNEL_OK")
</pallas_src>

<mosaic_0001>
module attributes {stable_mosaic.version = 11 : i64} {
  func.func @_upblock_kernel(%arg0: i32, %arg1: memref<16x128xbf16, #tpu.memory_space<vmem>>, %arg2: memref<16x256xbf16, #tpu.memory_space<vmem>>, %arg3: memref<2x2x128xf32, #tpu.memory_space<vmem>>, %arg4: memref<128x256xbf16, #tpu.memory_space<vmem>>, %arg5: memref<1x256xf32, #tpu.memory_space<vmem>>, %arg6: memref<256x128xbf16, #tpu.memory_space<vmem>>, %arg7: memref<512x256xbf16, #tpu.memory_space<vmem>>, %arg8: memref<256x128xbf16, #tpu.memory_space<vmem>>, %arg9: memref<1x128xf32, #tpu.memory_space<vmem>>, %arg10: memref<128x128xbf16, #tpu.memory_space<vmem>>, %arg11: memref<256x256xbf16, #tpu.memory_space<vmem>>, %arg12: memref<128x128xbf16, #tpu.memory_space<vmem>>, %arg13: memref<1x128xf32, #tpu.memory_space<vmem>>, %arg14: memref<16x256xf32, #tpu.memory_space<vmem>>, %arg15: memref<20x512xf32, #tpu.memory_space<vmem>>, %arg16: memref<20x256xf32, #tpu.memory_space<vmem>>) attributes {dimension_semantics = [#tpu.dimension_semantics<parallel>], iteration_bounds = array<i64: 2>, scalar_prefetch = 0 : i64, scratch_operands = 2 : i64, tpu.core_type = #tpu.core_type<tc>, window_params = [{transform_indices = @transform_0, window_bounds = array<i64: 16, 128>}, {transform_indices = @transform_1, window_bounds = array<i64: 16, 256>}, {transform_indices = @transform_2, window_bounds = array<i64: 2, 2, 128>}, {pipeline_mode = #tpu.pipeline_mode<synchronous>, transform_indices = @transform_3, window_bounds = array<i64: 128, 256>}, {pipeline_mode = #tpu.pipeline_mode<synchronous>, transform_indices = @transform_4, window_bounds = array<i64: 1, 256>}, {pipeline_mode = #tpu.pipeline_mode<synchronous>, transform_indices = @transform_5, window_bounds = array<i64: 256, 128>}, {pipeline_mode = #tpu.pipeline_mode<synchronous>, transform_indices = @transform_6, window_bounds = array<i64: 512, 256>}, {pipeline_mode = #tpu.pipeline_mode<synchronous>, transform_indices = @transform_7, window_bounds = array<i64: 256, 128>}, {pipeline_mode = #tpu.pipeline_mode<synchronous>, transform_indices = @transform_8, window_bounds = array<i64: 1, 128>}, {pipeline_mode = #tpu.pipeline_mode<synchronous>, transform_indices = @transform_9, window_bounds = array<i64: 128, 128>}, {pipeline_mode = #tpu.pipeline_mode<synchronous>, transform_indices = @transform_10, window_bounds = array<i64: 256, 256>}, {pipeline_mode = #tpu.pipeline_mode<synchronous>, transform_indices = @transform_11, window_bounds = array<i64: 128, 128>}, {pipeline_mode = #tpu.pipeline_mode<synchronous>, transform_indices = @transform_12, window_bounds = array<i64: 1, 128>}, {transform_indices = @transform_13, window_bounds = array<i64: 16, 256>}]} {
    %cst = arith.constant 0.000000e+00 : f32
    %0 = vector.broadcast %cst : f32 to vector<1x512xf32>
    %cst_0 = arith.constant 0.000000e+00 : f32
    %1 = vector.broadcast %cst_0 : f32 to vector<1x256xf32>
    %c0 = arith.constant 0 : index
    %c0_1 = arith.constant 0 : index
    %2 = vector.load %arg15[%c0, %c0_1] : memref<20x512xf32, #tpu.memory_space<vmem>>, vector<1x512xf32>
    tpu.vector_store %arg15[%c0, %c0_1], %0 {strides = array<i32>} : memref<20x512xf32, #tpu.memory_space<vmem>>, vector<1x512xf32>,
    %c9 = arith.constant 9 : index
    %c0_2 = arith.constant 0 : index
    %3 = vector.load %arg15[%c9, %c0_2] : memref<20x512xf32, #tpu.memory_space<vmem>>, vector<1x512xf32>
    tpu.vector_store %arg15[%c9, %c0_2], %0 {strides = array<i32>} : memref<20x512xf32, #tpu.memory_space<vmem>>, vector<1x512xf32>,
    %c0_3 = arith.constant 0 : index
    %c0_4 = arith.constant 0 : index
    %4 = vector.load %arg16[%c0_3, %c0_4] : memref<20x256xf32, #tpu.memory_space<vmem>>, vector<1x256xf32>
    tpu.vector_store %arg16[%c0_3, %c0_4], %1 {strides = array<i32>} : memref<20x256xf32, #tpu.memory_space<vmem>>, vector<1x256xf32>,
    %c9_5 = arith.constant 9 : index
    %c0_6 = arith.constant 0 : index
    %5 = vector.load %arg16[%c9_5, %c0_6] : memref<20x256xf32, #tpu.memory_space<vmem>>, vector<1x256xf32>
    tpu.vector_store %arg16[%c9_5, %c0_6], %1 {strides = array<i32>} : memref<20x256xf32, #tpu.memory_space<vmem>>, vector<1x256xf32>,
    %c10 = arith.constant 10 : index
    %c0_7 = arith.constant 0 : index
    %6 = vector.load %arg15[%c10, %c0_7] : memref<20x512xf32, #tpu.memory_space<vmem>>, vector<1x512xf32>
    tpu.vector_store %arg15[%c10, %c0_7], %0 {strides = array<i32>} : memref<20x512xf32, #tpu.memory_space<vmem>>, vector<1x512xf32>,
    %c19 = arith.constant 19 : index
    %c0_8 = arith.constant 0 : index
    %7 = vector.load %arg15[%c19, %c0_8] : memref<20x512xf32, #tpu.memory_space<vmem>>, vector<1x512xf32>
    tpu.vector_store %arg15[%c19, %c0_8], %0 {strides = array<i32>} : memref<20x512xf32, #tpu.memory_space<vmem>>, vector<1x512xf32>,
    %c10_9 = arith.constant 10 : index
    %c0_10 = arith.constant 0 : index
    %8 = vector.load %arg16[%c10_9, %c0_10] : memref<20x256xf32, #tpu.memory_space<vmem>>, vector<1x256xf32>
    tpu.vector_store %arg16[%c10_9, %c0_10], %1 {strides = array<i32>} : memref<20x256xf32, #tpu.memory_space<vmem>>, vector<1x256xf32>,
    %c19_11 = arith.constant 19 : index
    %c0_12 = arith.constant 0 : index
    %9 = vector.load %arg16[%c19_11, %c0_12] : memref<20x256xf32, #tpu.memory_space<vmem>>, vector<1x256xf32>
    tpu.vector_store %arg16[%c19_11, %c0_12], %1 {strides = array<i32>} : memref<20x256xf32, #tpu.memory_space<vmem>>, vector<1x256xf32>,
    %c0_13 = arith.constant 0 : index
    %c0_14 = arith.constant 0 : index
    %10 = vector.load %arg1[%c0_13, %c0_14] : memref<16x128xbf16, #tpu.memory_space<vmem>>, vector<16x128xbf16>
    %c0_15 = arith.constant 0 : index
    %c0_16 = arith.constant 0 : index
    %11 = vector.load %arg4[%c0_15, %c0_16] : memref<128x256xbf16, #tpu.memory_space<vmem>>, vector<128x256xbf16>
    %cst_17 = arith.constant dense<0.000000e+00> : vector<16x256xf32>
    %12 = tpu.matmul %10, %11, %cst_17 {dimension_numbers = #tpu.dot_dimension_numbers<[1], [0], [0], [1], [0, 0, 1, 1], [], []>} : vector<16x128xbf16>, vector<128x256xbf16>, vector<16x256xf32> -> vector<16x256xf32>
    %c0_18 = arith.constant 0 : index
    %c0_19 = arith.constant 0 : index
    %13 = vector.load %arg5[%c0_18, %c0_19] : memref<1x256xf32, #tpu.memory_space<vmem>>, vector<1x256xf32>
    %14 = vector.broadcast %13 : vector<1x256xf32> to vector<16x256xf32>
    %15 = arith.addf %12, %14 : vector<16x256xf32>
    %c0_20 = arith.constant 0 : index
    %c0_21 = arith.constant 0 : index
    %16 = vector.load %arg2[%c0_20, %c0_21] : memref<16x256xbf16, #tpu.memory_space<vmem>>, vector<16x256xbf16>
    %17 = arith.extf %16 : vector<16x256xbf16> to vector<16x256xf32>
    %18 = vector.extract_strided_slice %15 {offsets = [0, 0], sizes = [8, 128], strides = [1, 1]} : vector<16x256xf32> to vector<8x128xf32>
    %c1 = arith.constant 1 : index
    %c0_22 = arith.constant 0 : index
    %19 = vector.load %arg15[%c1, %c0_22] : memref<20x512xf32, #tpu.memory_space<vmem>>, vector<8x128xf32>
    tpu.vector_store %arg15[%c1, %c0_22], %18 {strides = array<i32>} : memref<20x512xf32, #tpu.memory_space<vmem>>, vector<8x128xf32>,
    %20 = vector.extract_strided_slice %17 {offsets = [0, 0], sizes = [8, 128], strides = [1, 1]} : vector<16x256xf32> to vector<8x128xf32>
    %c1_23 = arith.constant 1 : index
    %c128 = arith.constant 128 : index
    %21 = vector.load %arg15[%c1_23, %c128] : memref<20x512xf32, #tpu.memory_space<vmem>>, vector<8x128xf32>
    tpu.vector_store %arg15[%c1_23, %c128], %20 {strides = array<i32>} : memref<20x512xf32, #tpu.memory_space<vmem>>, vector<8x128xf32>,
    %22 = vector.extract_strided_slice %15 {offsets = [0, 128], sizes = [8, 128], strides = [1, 1]} : vector<16x256xf32> to vector<8x128xf32>
    %c1_24 = arith.constant 1 : index
    %c256 = arith.constant 256 : index
    %23 = vector.load %arg15[%c1_24, %c256] : memref<20x512xf32, #tpu.memory_space<vmem>>, vector<8x128xf32>
    tpu.vector_store %arg15[%c1_24, %c256], %22 {strides = array<i32>} : memref<20x512xf32, #tpu.memory_space<vmem>>, vector<8x128xf32>,
    %24 = vector.extract_strided_slice %17 {offsets = [0, 128], sizes = [8, 128], strides = [1, 1]} : vector<16x256xf32> to vector<8x128xf32>
    %c1_25 = arith.constant 1 : index
    %c384 = arith.constant 384 : index
    %25 = vector.load %arg15[%c1_25, %c384] : memref<20x512xf32, #tpu.memory_space<vmem>>, vector<8x128xf32>
    tpu.vector_store %arg15[%c1_25, %c384], %24 {strides = array<i32>} : memref<20x512xf32, #tpu.memory_space<vmem>>, vector<8x128xf32>,
    %26 = vector.extract_strided_slice %15 {offsets = [8, 0], sizes = [8, 128], strides = [1, 1]} : vector<16x256xf32> to vector<8x128xf32>
    %c11 = arith.constant 11 : index
    %c0_26 = arith.constant 0 : index
    %27 = vector.load %arg15[%c11, %c0_26] : memref<20x512xf32, #tpu.memory_space<vmem>>, vector<8x128xf32>
    tpu.vector_store %arg15[%c11, %c0_26], %26 {strides = array<i32>} : memref<20x512xf32, #tpu.memory_space<vmem>>, vector<8x128xf32>,
    %28 = vector.extract_strided_slice %17 {offsets = [8, 0], sizes = [8, 128], strides = [1, 1]} : vector<16x256xf32> to vector<8x128xf32>
    %c11_27 = arith.constant 11 : index
    %c128_28 = arith.constant 128 : index
    %29 = vector.load %arg15[%c11_27, %c128_28] : memref<20x512xf32, #tpu.memory_space<vmem>>, vector<8x128xf32>
    tpu.vector_store %arg15[%c11_27, %c128_28], %28 {strides = array<i32>} : memref<20x512xf32, #tpu.memory_space<vmem>>, vector<8x128xf32>,
    %30 = vector.extract_strided_slice %15 {offsets = [8, 128], sizes = [8, 128], strides = [1, 1]} : vector<16x256xf32> to vector<8x128xf32>
    %c11_29 = arith.constant 11 : index
    %c256_30 = arith.constant 256 : index
    %31 = vector.load %arg15[%c11_29, %c256_30] : memref<20x512xf32, #tpu.memory_space<vmem>>, vector<8x128xf32>
    tpu.vector_store %arg15[%c11_29, %c256_30], %30 {strides = array<i32>} : memref<20x512xf32, #tpu.memory_space<vmem>>, vector<8x128xf32>,
    %32 = vector.extract_strided_slice %17 {offsets = [8, 128], sizes = [8, 128], strides = [1, 1]} : vector<16x256xf32> to vector<8x128xf32>
    %c11_31 = arith.constant 11 : index
    %c384_32 = arith.constant 384 : index
    %33 = vector.load %arg15[%c11_31, %c384_32] : memref<20x512xf32, #tpu.memory_space<vmem>>, vector<8x128xf32>
    tpu.vector_store %arg15[%c11_31, %c384_32], %32 {strides = array<i32>} : memref<20x512xf32, #tpu.memory_space<vmem>>, vector<8x128xf32>,
    %c1_33 = arith.constant 1 : index
    %c0_34 = arith.constant 0 : index
    %34 = vector.load %arg15[%c1_33, %c0_34] : memref<20x512xf32, #tpu.memory_space<vmem>>, vector<18x512xf32>
    %35 = arith.truncf %34 : vector<18x512xf32> to vector<18x512xbf16>
    %c0_35 = arith.constant 0 : index
    %c256_36 = arith.constant 256 : index
    %36 = vector.load %arg15[%c0_35, %c256_36] : memref<20x512xf32, #tpu.memory_space<vmem>>, vector<18x256xf32>
    %37 = arith.truncf %36 : vector<18x256xf32> to vector<18x256xbf16>
    %c2 = arith.constant 2 : index
    %c0_37 = arith.constant 0 : index
    %38 = vector.load %arg15[%c2, %c0_37] : memref<20x512xf32, #tpu.memory_space<vmem>>, vector<18x256xf32>
    %39 = arith.truncf %38 : vector<18x256xf32> to vector<18x256xbf16>
    %c0_38 = arith.constant 0 : index
    %c0_39 = arith.constant 0 : index
    %40 = vector.load %arg7[%c0_38, %c0_39] : memref<512x256xbf16, #tpu.memory_space<vmem>>, vector<512x256xbf16>
    %cst_40 = arith.constant dense<0.000000e+00> : vector<18x256xf32>
    %41 = tpu.matmul %35, %40, %cst_40 {dimension_numbers = #tpu.dot_dimension_numbers<[1], [0], [0], [1], [0, 0, 1, 1], [], []>} : vector<18x512xbf16>, vector<512x256xbf16>, vector<18x256xf32> -> vector<18x256xf32>
    %42 = vector.extract_strided_slice %41 {offsets = [0, 0], sizes = [18, 128], strides = [1, 1]} : vector<18x256xf32> to vector<18x128xf32>
    %c0_41 = arith.constant 0 : index
    %c0_42 = arith.constant 0 : index
    %43 = vector.load %arg6[%c0_41, %c0_42] : memref<256x128xbf16, #tpu.memory_space<vmem>>, vector<256x128xbf16>
    %cst_43 = arith.constant dense<0.000000e+00> : vector<18x128xf32>
    %44 = tpu.matmul %37, %43, %cst_43 {dimension_numbers = #tpu.dot_dimension_numbers<[1], [0], [0], [1], [0, 0, 1, 1], [], []>} : vector<18x256xbf16>, vector<256x128xbf16>, vector<18x128xf32> -> vector<18x128xf32>
    %45 = arith.addf %42, %44 : vector<18x128xf32>
    %c0_44 = arith.constant 0 : index
    %c0_45 = arith.constant 0 : index
    %46 = vector.load %arg9[%c0_44, %c0_45] : memref<1x128xf32, #tpu.memory_space<vmem>>, vector<1x128xf32>
    %47 = vector.broadcast %46 : vector<1x128xf32> to vector<18x128xf32>
    %48 = arith.addf %45, %47 : vector<18x128xf32>
    %cst_46 = arith.constant 0.000000e+00 : f32
    %49 = vector.broadcast %cst_46 : f32 to vector<18x128xf32>
    %50 = arith.maximumf %48, %49 : vector<18x128xf32>
    %51 = vector.extract_strided_slice %41 {offsets = [0, 128], sizes = [18, 128], strides = [1, 1]} : vector<18x256xf32> to vector<18x128xf32>
    %c0_47 = arith.constant 0 : index
    %c0_48 = arith.constant 0 : index
    %52 = vector.load %arg8[%c0_47, %c0_48] : memref<256x128xbf16, #tpu.memory_space<vmem>>, vector<256x128xbf16>
    %cst_49 = arith.constant dense<0.000000e+00> : vector<18x128xf32>
    %53 = tpu.matmul %39, %52, %cst_49 {dimension_numbers = #tpu.dot_dimension_numbers<[1], [0], [0], [1], [0, 0, 1, 1], [], []>} : vector<18x256xbf16>, vector<256x128xbf16>, vector<18x128xf32> -> vector<18x128xf32>
    %54 = arith.addf %51, %53 : vector<18x128xf32>
    %c0_50 = arith.constant 0 : index
    %c0_51 = arith.constant 0 : index
    %55 = vector.load %arg9[%c0_50, %c0_51] : memref<1x128xf32, #tpu.memory_space<vmem>>, vector<1x128xf32>
    %56 = vector.broadcast %55 : vector<1x128xf32> to vector<18x128xf32>
    %57 = arith.addf %54, %56 : vector<18x128xf32>
    %cst_52 = arith.constant 0.000000e+00 : f32
    %58 = vector.broadcast %cst_52 : f32 to vector<18x128xf32>
    %59 = arith.maximumf %57, %58 : vector<18x128xf32>
    %60 = vector.extract_strided_slice %50 {offsets = [0, 0], sizes = [8, 128], strides = [1, 1]} : vector<18x128xf32> to vector<8x128xf32>
    %c1_53 = arith.constant 1 : index
    %c0_54 = arith.constant 0 : index
    %61 = vector.load %arg16[%c1_53, %c0_54] : memref<20x256xf32, #tpu.memory_space<vmem>>, vector<8x128xf32>
    tpu.vector_store %arg16[%c1_53, %c0_54], %60 {strides = array<i32>} : memref<20x256xf32, #tpu.memory_space<vmem>>, vector<8x128xf32>,
    %62 = vector.extract_strided_slice %59 {offsets = [0, 0], sizes = [8, 128], strides = [1, 1]} : vector<18x128xf32> to vector<8x128xf32>
    %c1_55 = arith.constant 1 : index
    %c128_56 = arith.constant 128 : index
    %63 = vector.load %arg16[%c1_55, %c128_56] : memref<20x256xf32, #tpu.memory_space<vmem>>, vector<8x128xf32>
    tpu.vector_store %arg16[%c1_55, %c128_56], %62 {strides = array<i32>} : memref<20x256xf32, #tpu.memory_space<vmem>>, vector<8x128xf32>,
    %64 = vector.extract_strided_slice %50 {offsets = [10, 0], sizes = [8, 128], strides = [1, 1]} : vector<18x128xf32> to vector<8x128xf32>
    %c11_57 = arith.constant 11 : index
    %c0_58 = arith.constant 0 : index
    %65 = vector.load %arg16[%c11_57, %c0_58] : memref<20x256xf32, #tpu.memory_space<vmem>>, vector<8x128xf32>
    tpu.vector_store %arg16[%c11_57, %c0_58], %64 {strides = array<i32>} : memref<20x256xf32, #tpu.memory_space<vmem>>, vector<8x128xf32>,
    %66 = vector.extract_strided_slice %59 {offsets = [10, 0], sizes = [8, 128], strides = [1, 1]} : vector<18x128xf32> to vector<8x128xf32>
    %c11_59 = arith.constant 11 : index
    %c128_60 = arith.constant 128 : index
    %67 = vector.load %arg16[%c11_59, %c128_60] : memref<20x256xf32, #tpu.memory_space<vmem>>, vector<8x128xf32>
    tpu.vector_store %arg16[%c11_59, %c128_60], %66 {strides = array<i32>} : memref<20x256xf32, #tpu.memory_space<vmem>>, vector<8x128xf32>,
    %c1_61 = arith.constant 1 : index
    %c0_62 = arith.constant 0 : index
    %68 = vector.load %arg16[%c1_61, %c0_62] : memref<20x256xf32, #tpu.memory_space<vmem>>, vector<18x256xf32>
    %69 = arith.truncf %68 : vector<18x256xf32> to vector<18x256xbf16>
    %c0_63 = arith.constant 0 : index
    %c128_64 = arith.constant 128 : index
    %70 = vector.load %arg16[%c0_63, %c128_64] : memref<20x256xf32, #tpu.memory_space<vmem>>, vector<18x128xf32>
    %71 = arith.truncf %70 : vector<18x128xf32> to vector<18x128xbf16>
    %c2_65 = arith.constant 2 : index
    %c0_66 = arith.constant 0 : index
    %72 = vector.load %arg16[%c2_65, %c0_66] : memref<20x256xf32, #tpu.memory_space<vmem>>, vector<18x128xf32>
    %73 = arith.truncf %72 : vector<18x128xf32> to vector<18x128xbf16>
    %c0_67 = arith.constant 0 : index
    %c0_68 = arith.constant 0 : index
    %74 = vector.load %arg11[%c0_67, %c0_68] : memref<256x256xbf16, #tpu.memory_space<vmem>>, vector<256x256xbf16>
    %cst_69 = arith.constant dense<0.000000e+00> : vector<18x256xf32>
    %75 = tpu.matmul %69, %74, %cst_69 {dimension_numbers = #tpu.dot_dimension_numbers<[1], [0], [0], [1], [0, 0, 1, 1], [], []>} : vector<18x256xbf16>, vector<256x256xbf16>, vector<18x256xf32> -> vector<18x256xf32>
    %76 = vector.extract_strided_slice %75 {offsets = [0, 0], sizes = [18, 128], strides = [1, 1]} : vector<18x256xf32> to vector<18x128xf32>
    %c0_70 = arith.constant 0 : index
    %c0_71 = arith.constant 0 : index
    %77 = vector.load %arg10[%c0_70, %c0_71] : memref<128x128xbf16, #tpu.memory_space<vmem>>, vector<128x128xbf16>
    %cst_72 = arith.constant dense<0.000000e+00> : vector<18x128xf32>
    %78 = tpu.matmul %71, %77, %cst_72 {dimension_numbers = #tpu.dot_dimension_numbers<[1], [0], [0], [1], [0, 0, 1, 1], [], []>} : vector<18x128xbf16>, vector<128x128xbf16>, vector<18x128xf32> -> vector<18x128xf32>
    %79 = arith.addf %76, %78 : vector<18x128xf32>
    %c0_73 = arith.constant 0 : index
    %c0_74 = arith.constant 0 : index
    %80 = vector.load %arg13[%c0_73, %c0_74] : memref<1x128xf32, #tpu.memory_space<vmem>>, vector<1x128xf32>
    %81 = vector.broadcast %80 : vector<1x128xf32> to vector<18x128xf32>
    %82 = arith.addf %79, %81 : vector<18x128xf32>
    %cst_75 = arith.constant 0.000000e+00 : f32
    %83 = vector.broadcast %cst_75 : f32 to vector<18x128xf32>
    %84 = arith.maximumf %82, %83 : vector<18x128xf32>
    %85 = vector.extract_strided_slice %75 {offsets = [0, 128], sizes = [18, 128], strides = [1, 1]} : vector<18x256xf32> to vector<18x128xf32>
    %c0_76 = arith.constant 0 : index
    %c0_77 = arith.constant 0 : index
    %86 = vector.load %arg12[%c0_76, %c0_77] : memref<128x128xbf16, #tpu.memory_space<vmem>>, vector<128x128xbf16>
    %cst_78 = arith.constant dense<0.000000e+00> : vector<18x128xf32>
    %87 = tpu.matmul %73, %86, %cst_78 {dimension_numbers = #tpu.dot_dimension_numbers<[1], [0], [0], [1], [0, 0, 1, 1], [], []>} : vector<18x128xbf16>, vector<128x128xbf16>, vector<18x128xf32> -> vector<18x128xf32>
    %88 = arith.addf %85, %87 : vector<18x128xf32>
    %c0_79 = arith.constant 0 : index
    %c0_80 = arith.constant 0 : index
    %89 = vector.load %arg13[%c0_79, %c0_80] : memref<1x128xf32, #tpu.memory_space<vmem>>, vector<1x128xf32>
    %90 = vector.broadcast %89 : vector<1x128xf32> to vector<18x128xf32>
    %91 = arith.addf %88, %90 : vector<18x128xf32>
    %cst_81 = arith.constant 0.000000e+00 : f32
    %92 = vector.broadcast %cst_81 : f32 to vector<18x128xf32>
    %93 = arith.maximumf %91, %92 : vector<18x128xf32>
    %c0_82 = arith.constant 0 : index
    %c0_83 = arith.constant 0 : index
    %c0_84 = arith.constant 0 : index
    %94 = vector.load %arg3[%c0_82, %c0_83, %c0_84] : memref<2x2x128xf32, #tpu.memory_space<vmem>>, vector<1x1x128xf32>
    %95 = vector.shape_cast %94 : vector<1x1x128xf32> to vector<1x128xf32>
    %c0_85 = arith.constant 0 : index
    %c1_86 = arith.constant 1 : index
    %c0_87 = arith.constant 0 : index
    %96 = vector.load %arg3[%c0_85, %c1_86, %c0_87] : memref<2x2x128xf32, #tpu.memory_space<vmem>>, vector<1x1x128xf32>
    %97 = vector.shape_cast %96 : vector<1x1x128xf32> to vector<1x128xf32>
    %98 = vector.extract_strided_slice %84 {offsets = [0, 0], sizes = [8, 128], strides = [1, 1]} : vector<18x128xf32> to vector<8x128xf32>
    %99 = vector.broadcast %95 : vector<1x128xf32> to vector<8x128xf32>
    %100 = arith.mulf %98, %99 : vector<8x128xf32>
    %101 = vector.broadcast %97 : vector<1x128xf32> to vector<8x128xf32>
    %102 = arith.addf %100, %101 : vector<8x128xf32>
    %c0_88 = arith.constant 0 : index
    %c0_89 = arith.constant 0 : index
    %103 = vector.load %arg14[%c0_88, %c0_89] : memref<16x256xf32, #tpu.memory_space<vmem>>, vector<8x128xf32>
    tpu.vector_store %arg14[%c0_88, %c0_89], %102 {strides = array<i32>} : memref<16x256xf32, #tpu.memory_space<vmem>>, vector<8x128xf32>,
    %104 = vector.extract_strided_slice %93 {offsets = [0, 0], sizes = [8, 128], strides = [1, 1]} : vector<18x128xf32> to vector<8x128xf32>
    %105 = vector.broadcast %95 : vector<1x128xf32> to vector<8x128xf32>
    %106 = arith.mulf %104, %105 : vector<8x128xf32>
    %107 = vector.broadcast %97 : vector<1x128xf32> to vector<8x128xf32>
    %108 = arith.addf %106, %107 : vector<8x128xf32>
    %c0_90 = arith.constant 0 : index
    %c128_91 = arith.constant 128 : index
    %109 = vector.load %arg14[%c0_90, %c128_91] : memref<16x256xf32, #tpu.memory_space<vmem>>, vector<8x128xf32>
    tpu.vector_store %arg14[%c0_90, %c128_91], %108 {strides = array<i32>} : memref<16x256xf32, #tpu.memory_space<vmem>>, vector<8x128xf32>,
    %c1_92 = arith.constant 1 : index
    %c0_93 = arith.constant 0 : index
    %c0_94 = arith.constant 0 : index
    %110 = vector.load %arg3[%c1_92, %c0_93, %c0_94] : memref<2x2x128xf32, #tpu.memory_space<vmem>>, vector<1x1x128xf32>
    %111 = vector.shape_cast %110 : vector<1x1x128xf32> to vector<1x128xf32>
    %c1_95 = arith.constant 1 : index
    %c1_96 = arith.constant 1 : index
    %c0_97 = arith.constant 0 : index
    %112 = vector.load %arg3[%c1_95, %c1_96, %c0_97] : memref<2x2x128xf32, #tpu.memory_space<vmem>>, vector<1x1x128xf32>
    %113 = vector.shape_cast %112 : vector<1x1x128xf32> to vector<1x128xf32>
    %114 = vector.extract_strided_slice %84 {offsets = [10, 0], sizes = [8, 128], strides = [1, 1]} : vector<18x128xf32> to vector<8x128xf32>
    %115 = vector.broadcast %111 : vector<1x128xf32> to vector<8x128xf32>
    %116 = arith.mulf %114, %115 : vector<8x128xf32>
    %117 = vector.broadcast %113 : vector<1x128xf32> to vector<8x128xf32>
    %118 = arith.addf %116, %117 : vector<8x128xf32>
    %c8 = arith.constant 8 : index
    %c0_98 = arith.constant 0 : index
    %119 = vector.load %arg14[%c8, %c0_98] : memref<16x256xf32, #tpu.memory_space<vmem>>, vector<8x128xf32>
    tpu.vector_store %arg14[%c8, %c0_98], %118 {strides = array<i32>} : memref<16x256xf32, #tpu.memory_space<vmem>>, vector<8x128xf32>,
    %120 = vector.extract_strided_slice %93 {offsets = [10, 0], sizes = [8, 128], strides = [1, 1]} : vector<18x128xf32> to vector<8x128xf32>
    %121 = vector.broadcast %111 : vector<1x128xf32> to vector<8x128xf32>
    %122 = arith.mulf %120, %121 : vector<8x128xf32>
    %123 = vector.broadcast %113 : vector<1x128xf32> to vector<8x128xf32>
    %124 = arith.addf %122, %123 : vector<8x128xf32>
    %c8_99 = arith.constant 8 : index
    %c128_100 = arith.constant 128 : index
    %125 = vector.load %arg14[%c8_99, %c128_100] : memref<16x256xf32, #tpu.memory_space<vmem>>, vector<8x128xf32>
    tpu.vector_store %arg14[%c8_99, %c128_100], %124 {strides = array<i32>} : memref<16x256xf32, #tpu.memory_space<vmem>>, vector<8x128xf32>,
    return
  }
  func.func @transform_0(%arg0: i32) -> (i32, i32) {
    %c0_i32 = arith.constant 0 : i32
    %c0_i32_0 = arith.constant 0 : i32
    return %arg0, %c0_i32 : i32, i32
  }
  func.func @transform_1(%arg0: i32) -> (i32, i32) {
    %c0_i32 = arith.constant 0 : i32
    %c0_i32_0 = arith.constant 0 : i32
    return %arg0, %c0_i32 : i32, i32
  }
  func.func @transform_2(%arg0: i32) -> (i32, i32, i32) {
    %c0_i32 = arith.constant 0 : i32
    %c0_i32_0 = arith.constant 0 : i32
    %c0_i32_1 = arith.constant 0 : i32
    return %arg0, %c0_i32, %c0_i32_0 : i32, i32, i32
  }
  func.func @transform_3(%arg0: i32) -> (i32, i32) {
    %c0_i32 = arith.constant 0 : i32
    %c0_i32_0 = arith.constant 0 : i32
    %c0_i32_1 = arith.constant 0 : i32
    return %c0_i32, %c0_i32_0 : i32, i32
  }
  func.func @transform_4(%arg0: i32) -> (i32, i32) {
    %c0_i32 = arith.constant 0 : i32
    %c0_i32_0 = arith.constant 0 : i32
    %c0_i32_1 = arith.constant 0 : i32
    return %c0_i32, %c0_i32_0 : i32, i32
  }
  func.func @transform_5(%arg0: i32) -> (i32, i32) {
    %c0_i32 = arith.constant 0 : i32
    %c0_i32_0 = arith.constant 0 : i32
    %c0_i32_1 = arith.constant 0 : i32
    return %c0_i32, %c0_i32_0 : i32, i32
  }
  func.func @transform_6(%arg0: i32) -> (i32, i32) {
    %c0_i32 = arith.constant 0 : i32
    %c0_i32_0 = arith.constant 0 : i32
    %c0_i32_1 = arith.constant 0 : i32
    return %c0_i32, %c0_i32_0 : i32, i32
  }
  func.func @transform_7(%arg0: i32) -> (i32, i32) {
    %c0_i32 = arith.constant 0 : i32
    %c0_i32_0 = arith.constant 0 : i32
    %c0_i32_1 = arith.constant 0 : i32
    return %c0_i32, %c0_i32_0 : i32, i32
  }
  func.func @transform_8(%arg0: i32) -> (i32, i32) {
    %c0_i32 = arith.constant 0 : i32
    %c0_i32_0 = arith.constant 0 : i32
    %c0_i32_1 = arith.constant 0 : i32
    return %c0_i32, %c0_i32_0 : i32, i32
  }
  func.func @transform_9(%arg0: i32) -> (i32, i32) {
    %c0_i32 = arith.constant 0 : i32
    %c0_i32_0 = arith.constant 0 : i32
    %c0_i32_1 = arith.constant 0 : i32
    return %c0_i32, %c0_i32_0 : i32, i32
  }
  func.func @transform_10(%arg0: i32) -> (i32, i32) {
    %c0_i32 = arith.constant 0 : i32
    %c0_i32_0 = arith.constant 0 : i32
    %c0_i32_1 = arith.constant 0 : i32
    return %c0_i32, %c0_i32_0 : i32, i32
  }
  func.func @transform_11(%arg0: i32) -> (i32, i32) {
    %c0_i32 = arith.constant 0 : i32
    %c0_i32_0 = arith.constant 0 : i32
    %c0_i32_1 = arith.constant 0 : i32
    return %c0_i32, %c0_i32_0 : i32, i32
  }
  func.func @transform_12(%arg0: i32) -> (i32, i32) {
    %c0_i32 = arith.constant 0 : i32
    %c0_i32_0 = arith.constant 0 : i32
    %c0_i32_1 = arith.constant 0 : i32
    return %c0_i32, %c0_i32_0 : i32, i32
  }
  func.func @transform_13(%arg0: i32) -> (i32, i32) {
    %c0_i32 = arith.constant 0 : i32
    %c0_i32_0 = arith.constant 0 : i32
    return %arg0, %c0_i32 : i32, i32
  }
}

module attributes {stable_mosaic.version = 11 : i64} {
  func.func @_upblock_kernel(%arg0: i32, %arg1: memref<16x128xbf16, #tpu.memory_space<vmem>>, %arg2: memref<16x256xbf16, #tpu.memory_space<vmem>>, %arg3: memref<2x2x128xf32, #tpu.memory_space<vmem>>, %arg4: memref<128x256xbf16, #tpu.memory_space<vmem>>, %arg5: memref<1x256xf32, #tpu.memory_space<vmem>>, %arg6: memref<256x128xbf16, #tpu.memory_space<vmem>>, %arg7: memref<512x256xbf16, #tpu.memory_space<vmem>>, %arg8: memref<256x128xbf16, #tpu.memory_space<vmem>>, %arg9: memref<1x128xf32, #tpu.memory_space<vmem>>, %arg10: memref<128x128xbf16, #tpu.memory_space<vmem>>, %arg11: memref<256x256xbf16, #tpu.memory_space<vmem>>, %arg12: memref<128x128xbf16, #tpu.memory_space<vmem>>, %arg13: memref<1x128xf32, #tpu.memory_space<vmem>>, %arg14: memref<16x256xf32, #tpu.memory_space<vmem>>, %arg15: memref<20x512xf32, #tpu.memory_space<vmem>>, %arg16: memref<20x256xf32, #tpu.memory_space<vmem>>) attributes {dimension_semantics = [#tpu.dimension_semantics<parallel>], iteration_bounds = array<i64: 2>, scalar_prefetch = 0 : i64, scratch_operands = 2 : i64, tpu.core_type = #tpu.core_type<tc>, window_params = [{transform_indices = @transform_0, window_bounds = array<i64: 16, 128>}, {transform_indices = @transform_1, window_bounds = array<i64: 16, 256>}, {transform_indices = @transform_2, window_bounds = array<i64: 2, 2, 128>}, {pipeline_mode = #tpu.pipeline_mode<synchronous>, transform_indices = @transform_3, window_bounds = array<i64: 128, 256>}, {pipeline_mode = #tpu.pipeline_mode<synchronous>, transform_indices = @transform_4, window_bounds = array<i64: 1, 256>}, {pipeline_mode = #tpu.pipeline_mode<synchronous>, transform_indices = @transform_5, window_bounds = array<i64: 256, 128>}, {pipeline_mode = #tpu.pipeline_mode<synchronous>, transform_indices = @transform_6, window_bounds = array<i64: 512, 256>}, {pipeline_mode = #tpu.pipeline_mode<synchronous>, transform_indices = @transform_7, window_bounds = array<i64: 256, 128>}, {pipeline_mode = #tpu.pipeline_mode<synchronous>, transform_indices = @transform_8, window_bounds = array<i64: 1, 128>}, {pipeline_mode = #tpu.pipeline_mode<synchronous>, transform_indices = @transform_9, window_bounds = array<i64: 128, 128>}, {pipeline_mode = #tpu.pipeline_mode<synchronous>, transform_indices = @transform_10, window_bounds = array<i64: 256, 256>}, {pipeline_mode = #tpu.pipeline_mode<synchronous>, transform_indices = @transform_11, window_bounds = array<i64: 128, 128>}, {pipeline_mode = #tpu.pipeline_mode<synchronous>, transform_indices = @transform_12, window_bounds = array<i64: 1, 128>}, {transform_indices = @transform_13, window_bounds = array<i64: 16, 256>}]} {
    %cst = arith.constant 0.000000e+00 : f32
    %0 = vector.broadcast %cst : f32 to vector<1x512xf32>
    %cst_0 = arith.constant 0.000000e+00 : f32
    %1 = vector.broadcast %cst_0 : f32 to vector<1x256xf32>
    %c0 = arith.constant 0 : index
    %c0_1 = arith.constant 0 : index
    %2 = vector.load %arg15[%c0, %c0_1] : memref<20x512xf32, #tpu.memory_space<vmem>>, vector<1x512xf32>
    tpu.vector_store %arg15[%c0, %c0_1], %0 {strides = array<i32>} : memref<20x512xf32, #tpu.memory_space<vmem>>, vector<1x512xf32>,
    %c9 = arith.constant 9 : index
    %c0_2 = arith.constant 0 : index
    %3 = vector.load %arg15[%c9, %c0_2] : memref<20x512xf32, #tpu.memory_space<vmem>>, vector<1x512xf32>
    tpu.vector_store %arg15[%c9, %c0_2], %0 {strides = array<i32>} : memref<20x512xf32, #tpu.memory_space<vmem>>, vector<1x512xf32>,
    %c0_3 = arith.constant 0 : index
    %c0_4 = arith.constant 0 : index
    %4 = vector.load %arg16[%c0_3, %c0_4] : memref<20x256xf32, #tpu.memory_space<vmem>>, vector<1x256xf32>
    tpu.vector_store %arg16[%c0_3, %c0_4], %1 {strides = array<i32>} : memref<20x256xf32, #tpu.memory_space<vmem>>, vector<1x256xf32>,
    %c9_5 = arith.constant 9 : index
    %c0_6 = arith.constant 0 : index
    %5 = vector.load %arg16[%c9_5, %c0_6] : memref<20x256xf32, #tpu.memory_space<vmem>>, vector<1x256xf32>
    tpu.vector_store %arg16[%c9_5, %c0_6], %1 {strides = array<i32>} : memref<20x256xf32, #tpu.memory_space<vmem>>, vector<1x256xf32>,
    %c10 = arith.constant 10 : index
    %c0_7 = arith.constant 0 : index
    %6 = vector.load %arg15[%c10, %c0_7] : memref<20x512xf32, #tpu.memory_space<vmem>>, vector<1x512xf32>
    tpu.vector_store %arg15[%c10, %c0_7], %0 {strides = array<i32>} : memref<20x512xf32, #tpu.memory_space<vmem>>, vector<1x512xf32>,
    %c19 = arith.constant 19 : index
    %c0_8 = arith.constant 0 : index
    %7 = vector.load %arg15[%c19, %c0_8] : memref<20x512xf32, #tpu.memory_space<vmem>>, vector<1x512xf32>
    tpu.vector_store %arg15[%c19, %c0_8], %0 {strides = array<i32>} : memref<20x512xf32, #tpu.memory_space<vmem>>, vector<1x512xf32>,
    %c10_9 = arith.constant 10 : index
    %c0_10 = arith.constant 0 : index
    %8 = vector.load %arg16[%c10_9, %c0_10] : memref<20x256xf32, #tpu.memory_space<vmem>>, vector<1x256xf32>
    tpu.vector_store %arg16[%c10_9, %c0_10], %1 {strides = array<i32>} : memref<20x256xf32, #tpu.memory_space<vmem>>, vector<1x256xf32>,
    %c19_11 = arith.constant 19 : index
    %c0_12 = arith.constant 0 : index
    %9 = vector.load %arg16[%c19_11, %c0_12] : memref<20x256xf32, #tpu.memory_space<vmem>>, vector<1x256xf32>
    tpu.vector_store %arg16[%c19_11, %c0_12], %1 {strides = array<i32>} : memref<20x256xf32, #tpu.memory_space<vmem>>, vector<1x256xf32>,
    %c0_13 = arith.constant 0 : index
    %c0_14 = arith.constant 0 : index
    %10 = vector.load %arg1[%c0_13, %c0_14] : memref<16x128xbf16, #tpu.memory_space<vmem>>, vector<16x128xbf16>
    %c0_15 = arith.constant 0 : index
    %c0_16 = arith.constant 0 : index
    %11 = vector.load %arg4[%c0_15, %c0_16] : memref<128x256xbf16, #tpu.memory_space<vmem>>, vector<128x256xbf16>
    %cst_17 = arith.constant dense<0.000000e+00> : vector<16x256xf32>
    %12 = tpu.matmul %10, %11, %cst_17 {dimension_numbers = #tpu.dot_dimension_numbers<[1], [0], [0], [1], [0, 0, 1, 1], [], []>} : vector<16x128xbf16>, vector<128x256xbf16>, vector<16x256xf32> -> vector<16x256xf32>
    %c0_18 = arith.constant 0 : index
    %c0_19 = arith.constant 0 : index
    %13 = vector.load %arg5[%c0_18, %c0_19] : memref<1x256xf32, #tpu.memory_space<vmem>>, vector<1x256xf32>
    %14 = vector.broadcast %13 : vector<1x256xf32> to vector<16x256xf32>
    %15 = arith.addf %12, %14 : vector<16x256xf32>
    %c0_20 = arith.constant 0 : index
    %c0_21 = arith.constant 0 : index
    %16 = vector.load %arg2[%c0_20, %c0_21] : memref<16x256xbf16, #tpu.memory_space<vmem>>, vector<16x256xbf16>
    %17 = arith.extf %16 : vector<16x256xbf16> to vector<16x256xf32>
    %18 = vector.extract_strided_slice %15 {offsets = [0, 0], sizes = [8, 128], strides = [1, 1]} : vector<16x256xf32> to vector<8x128xf32>
    %c1 = arith.constant 1 : index
    %c0_22 = arith.constant 0 : index
    %19 = vector.load %arg15[%c1, %c0_22] : memref<20x512xf32, #tpu.memory_space<vmem>>, vector<8x128xf32>
    tpu.vector_store %arg15[%c1, %c0_22], %18 {strides = array<i32>} : memref<20x512xf32, #tpu.memory_space<vmem>>, vector<8x128xf32>,
    %20 = vector.extract_strided_slice %17 {offsets = [0, 0], sizes = [8, 128], strides = [1, 1]} : vector<16x256xf32> to vector<8x128xf32>
    %c1_23 = arith.constant 1 : index
    %c128 = arith.constant 128 : index
    %21 = vector.load %arg15[%c1_23, %c128] : memref<20x512xf32, #tpu.memory_space<vmem>>, vector<8x128xf32>
    tpu.vector_store %arg15[%c1_23, %c128], %20 {strides = array<i32>} : memref<20x512xf32, #tpu.memory_space<vmem>>, vector<8x128xf32>,
    %22 = vector.extract_strided_slice %15 {offsets = [0, 128], sizes = [8, 128], strides = [1, 1]} : vector<16x256xf32> to vector<8x128xf32>
    %c1_24 = arith.constant 1 : index
    %c256 = arith.constant 256 : index
    %23 = vector.load %arg15[%c1_24, %c256] : memref<20x512xf32, #tpu.memory_space<vmem>>, vector<8x128xf32>
    tpu.vector_store %arg15[%c1_24, %c256], %22 {strides = array<i32>} : memref<20x512xf32, #tpu.memory_space<vmem>>, vector<8x128xf32>,
    %24 = vector.extract_strided_slice %17 {offsets = [0, 128], sizes = [8, 128], strides = [1, 1]} : vector<16x256xf32> to vector<8x128xf32>
    %c1_25 = arith.constant 1 : index
    %c384 = arith.constant 384 : index
    %25 = vector.load %arg15[%c1_25, %c384] : memref<20x512xf32, #tpu.memory_space<vmem>>, vector<8x128xf32>
    tpu.vector_store %arg15[%c1_25, %c384], %24 {strides = array<i32>} : memref<20x512xf32, #tpu.memory_space<vmem>>, vector<8x128xf32>,
    %26 = vector.extract_strided_slice %15 {offsets = [8, 0], sizes = [8, 128], strides = [1, 1]} : vector<16x256xf32> to vector<8x128xf32>
    %c11 = arith.constant 11 : index
    %c0_26 = arith.constant 0 : index
    %27 = vector.load %arg15[%c11, %c0_26] : memref<20x512xf32, #tpu.memory_space<vmem>>, vector<8x128xf32>
    tpu.vector_store %arg15[%c11, %c0_26], %26 {strides = array<i32>} : memref<20x512xf32, #tpu.memory_space<vmem>>, vector<8x128xf32>,
    %28 = vector.extract_strided_slice %17 {offsets = [8, 0], sizes = [8, 128], strides = [1, 1]} : vector<16x256xf32> to vector<8x128xf32>
    %c11_27 = arith.constant 11 : index
    %c128_28 = arith.constant 128 : index
    %29 = vector.load %arg15[%c11_27, %c128_28] : memref<20x512xf32, #tpu.memory_space<vmem>>, vector<8x128xf32>
    tpu.vector_store %arg15[%c11_27, %c128_28], %28 {strides = array<i32>} : memref<20x512xf32, #tpu.memory_space<vmem>>, vector<8x128xf32>,
    %30 = vector.extract_strided_slice %15 {offsets = [8, 128], sizes = [8, 128], strides = [1, 1]} : vector<16x256xf32> to vector<8x128xf32>
    %c11_29 = arith.constant 11 : index
    %c256_30 = arith.constant 256 : index
    %31 = vector.load %arg15[%c11_29, %c256_30] : memref<20x512xf32, #tpu.memory_space<vmem>>, vector<8x128xf32>
    tpu.vector_store %arg15[%c11_29, %c256_30], %30 {strides = array<i32>} : memref<20x512xf32, #tpu.memory_space<vmem>>, vector<8x128xf32>,
    %32 = vector.extract_strided_slice %17 {offsets = [8, 128], sizes = [8, 128], strides = [1, 1]} : vector<16x256xf32> to vector<8x128xf32>
    %c11_31 = arith.constant 11 : index
    %c384_32 = arith.constant 384 : index
    %33 = vector.load %arg15[%c11_31, %c384_32] : memref<20x512xf32, #tpu.memory_space<vmem>>, vector<8x128xf32>
    tpu.vector_store %arg15[%c11_31, %c384_32], %32 {strides = array<i32>} : memref<20x512xf32, #tpu.memory_space<vmem>>, vector<8x128xf32>,
    %c1_33 = arith.constant 1 : index
    %c0_34 = arith.constant 0 : index
    %34 = vector.load %arg15[%c1_33, %c0_34] : memref<20x512xf32, #tpu.memory_space<vmem>>, vector<18x512xf32>
    %35 = arith.truncf %34 : vector<18x512xf32> to vector<18x512xbf16>
    %c0_35 = arith.constant 0 : index
    %c256_36 = arith.constant 256 : index
    %36 = vector.load %arg15[%c0_35, %c256_36] : memref<20x512xf32, #tpu.memory_space<vmem>>, vector<18x256xf32>
    %37 = arith.truncf %36 : vector<18x256xf32> to vector<18x256xbf16>
    %c2 = arith.constant 2 : index
    %c0_37 = arith.constant 0 : index
    %38 = vector.load %arg15[%c2, %c0_37] : memref<20x512xf32, #tpu.memory_space<vmem>>, vector<18x256xf32>
    %39 = arith.truncf %38 : vector<18x256xf32> to vector<18x256xbf16>
    %c0_38 = arith.constant 0 : index
    %c0_39 = arith.constant 0 : index
    %40 = vector.load %arg7[%c0_38, %c0_39] : memref<512x256xbf16, #tpu.memory_space<vmem>>, vector<512x256xbf16>
    %cst_40 = arith.constant dense<0.000000e+00> : vector<18x256xf32>
    %41 = tpu.matmul %35, %40, %cst_40 {dimension_numbers = #tpu.dot_dimension_numbers<[1], [0], [0], [1], [0, 0, 1, 1], [], []>} : vector<18x512xbf16>, vector<512x256xbf16>, vector<18x256xf32> -> vector<18x256xf32>
    %42 = vector.extract_strided_slice %41 {offsets = [0, 0], sizes = [18, 128], strides = [1, 1]} : vector<18x256xf32> to vector<18x128xf32>
    %c0_41 = arith.constant 0 : index
    %c0_42 = arith.constant 0 : index
    %43 = vector.load %arg6[%c0_41, %c0_42] : memref<256x128xbf16, #tpu.memory_space<vmem>>, vector<256x128xbf16>
    %cst_43 = arith.constant dense<0.000000e+00> : vector<18x128xf32>
    %44 = tpu.matmul %37, %43, %cst_43 {dimension_numbers = #tpu.dot_dimension_numbers<[1], [0], [0], [1], [0, 0, 1, 1], [], []>} : vector<18x256xbf16>, vector<256x128xbf16>, vector<18x128xf32> -> vector<18x128xf32>
    %45 = arith.addf %42, %44 : vector<18x128xf32>
    %c0_44 = arith.constant 0 : index
    %c0_45 = arith.constant 0 : index
    %46 = vector.load %arg9[%c0_44, %c0_45] : memref<1x128xf32, #tpu.memory_space<vmem>>, vector<1x128xf32>
    %47 = vector.broadcast %46 : vector<1x128xf32> to vector<18x128xf32>
    %48 = arith.addf %45, %47 : vector<18x128xf32>
    %cst_46 = arith.constant 0.000000e+00 : f32
    %49 = vector.broadcast %cst_46 : f32 to vector<18x128xf32>
    %50 = arith.maximumf %48, %49 : vector<18x128xf32>
    %51 = vector.extract_strided_slice %41 {offsets = [0, 128], sizes = [18, 128], strides = [1, 1]} : vector<18x256xf32> to vector<18x128xf32>
    %c0_47 = arith.constant 0 : index
    %c0_48 = arith.constant 0 : index
    %52 = vector.load %arg8[%c0_47, %c0_48] : memref<256x128xbf16, #tpu.memory_space<vmem>>, vector<256x128xbf16>
    %cst_49 = arith.constant dense<0.000000e+00> : vector<18x128xf32>
    %53 = tpu.matmul %39, %52, %cst_49 {dimension_numbers = #tpu.dot_dimension_numbers<[1], [0], [0], [1], [0, 0, 1, 1], [], []>} : vector<18x256xbf16>, vector<256x128xbf16>, vector<18x128xf32> -> vector<18x128xf32>
    %54 = arith.addf %51, %53 : vector<18x128xf32>
    %c0_50 = arith.constant 0 : index
    %c0_51 = arith.constant 0 : index
    %55 = vector.load %arg9[%c0_50, %c0_51] : memref<1x128xf32, #tpu.memory_space<vmem>>, vector<1x128xf32>
    %56 = vector.broadcast %55 : vector<1x128xf32> to vector<18x128xf32>
    %57 = arith.addf %54, %56 : vector<18x128xf32>
    %cst_52 = arith.constant 0.000000e+00 : f32
    %58 = vector.broadcast %cst_52 : f32 to vector<18x128xf32>
    %59 = arith.maximumf %57, %58 : vector<18x128xf32>
    %60 = vector.extract_strided_slice %50 {offsets = [0, 0], sizes = [8, 128], strides = [1, 1]} : vector<18x128xf32> to vector<8x128xf32>
    %c1_53 = arith.constant 1 : index
    %c0_54 = arith.constant 0 : index
    %61 = vector.load %arg16[%c1_53, %c0_54] : memref<20x256xf32, #tpu.memory_space<vmem>>, vector<8x128xf32>
    tpu.vector_store %arg16[%c1_53, %c0_54], %60 {strides = array<i32>} : memref<20x256xf32, #tpu.memory_space<vmem>>, vector<8x128xf32>,
    %62 = vector.extract_strided_slice %59 {offsets = [0, 0], sizes = [8, 128], strides = [1, 1]} : vector<18x128xf32> to vector<8x128xf32>
    %c1_55 = arith.constant 1 : index
    %c128_56 = arith.constant 128 : index
    %63 = vector.load %arg16[%c1_55, %c128_56] : memref<20x256xf32, #tpu.memory_space<vmem>>, vector<8x128xf32>
    tpu.vector_store %arg16[%c1_55, %c128_56], %62 {strides = array<i32>} : memref<20x256xf32, #tpu.memory_space<vmem>>, vector<8x128xf32>,
    %64 = vector.extract_strided_slice %50 {offsets = [10, 0], sizes = [8, 128], strides = [1, 1]} : vector<18x128xf32> to vector<8x128xf32>
    %c11_57 = arith.constant 11 : index
    %c0_58 = arith.constant 0 : index
    %65 = vector.load %arg16[%c11_57, %c0_58] : memref<20x256xf32, #tpu.memory_space<vmem>>, vector<8x128xf32>
    tpu.vector_store %arg16[%c11_57, %c0_58], %64 {strides = array<i32>} : memref<20x256xf32, #tpu.memory_space<vmem>>, vector<8x128xf32>,
    %66 = vector.extract_strided_slice %59 {offsets = [10, 0], sizes = [8, 128], strides = [1, 1]} : vector<18x128xf32> to vector<8x128xf32>
    %c11_59 = arith.constant 11 : index
    %c128_60 = arith.constant 128 : index
    %67 = vector.load %arg16[%c11_59, %c128_60] : memref<20x256xf32, #tpu.memory_space<vmem>>, vector<8x128xf32>
    tpu.vector_store %arg16[%c11_59, %c128_60], %66 {strides = array<i32>} : memref<20x256xf32, #tpu.memory_space<vmem>>, vector<8x128xf32>,
    %c1_61 = arith.constant 1 : index
    %c0_62 = arith.constant 0 : index
    %68 = vector.load %arg16[%c1_61, %c0_62] : memref<20x256xf32, #tpu.memory_space<vmem>>, vector<18x256xf32>
    %69 = arith.truncf %68 : vector<18x256xf32> to vector<18x256xbf16>
    %c0_63 = arith.constant 0 : index
    %c128_64 = arith.constant 128 : index
    %70 = vector.load %arg16[%c0_63, %c128_64] : memref<20x256xf32, #tpu.memory_space<vmem>>, vector<18x128xf32>
    %71 = arith.truncf %70 : vector<18x128xf32> to vector<18x128xbf16>
    %c2_65 = arith.constant 2 : index
    %c0_66 = arith.constant 0 : index
    %72 = vector.load %arg16[%c2_65, %c0_66] : memref<20x256xf32, #tpu.memory_space<vmem>>, vector<18x128xf32>
    %73 = arith.truncf %72 : vector<18x128xf32> to vector<18x128xbf16>
    %c0_67 = arith.constant 0 : index
    %c0_68 = arith.constant 0 : index
    %74 = vector.load %arg11[%c0_67, %c0_68] : memref<256x256xbf16, #tpu.memory_space<vmem>>, vector<256x256xbf16>
    %cst_69 = arith.constant dense<0.000000e+00> : vector<18x256xf32>
    %75 = tpu.matmul %69, %74, %cst_69 {dimension_numbers = #tpu.dot_dimension_numbers<[1], [0], [0], [1], [0, 0, 1, 1], [], []>} : vector<18x256xbf16>, vector<256x256xbf16>, vector<18x256xf32> -> vector<18x256xf32>
    %76 = vector.extract_strided_slice %75 {offsets = [0, 0], sizes = [18, 128], strides = [1, 1]} : vector<18x256xf32> to vector<18x128xf32>
    %c0_70 = arith.constant 0 : index
    %c0_71 = arith.constant 0 : index
    %77 = vector.load %arg10[%c0_70, %c0_71] : memref<128x128xbf16, #tpu.memory_space<vmem>>, vector<128x128xbf16>
    %cst_72 = arith.constant dense<0.000000e+00> : vector<18x128xf32>
    %78 = tpu.matmul %71, %77, %cst_72 {dimension_numbers = #tpu.dot_dimension_numbers<[1], [0], [0], [1], [0, 0, 1, 1], [], []>} : vector<18x128xbf16>, vector<128x128xbf16>, vector<18x128xf32> -> vector<18x128xf32>
    %79 = arith.addf %76, %78 : vector<18x128xf32>
    %c0_73 = arith.constant 0 : index
    %c0_74 = arith.constant 0 : index
    %80 = vector.load %arg13[%c0_73, %c0_74] : memref<1x128xf32, #tpu.memory_space<vmem>>, vector<1x128xf32>
    %81 = vector.broadcast %80 : vector<1x128xf32> to vector<18x128xf32>
    %82 = arith.addf %79, %81 : vector<18x128xf32>
    %cst_75 = arith.constant 0.000000e+00 : f32
    %83 = vector.broadcast %cst_75 : f32 to vector<18x128xf32>
    %84 = arith.maximumf %82, %83 : vector<18x128xf32>
    %85 = vector.extract_strided_slice %75 {offsets = [0, 128], sizes = [18, 128], strides = [1, 1]} : vector<18x256xf32> to vector<18x128xf32>
    %c0_76 = arith.constant 0 : index
    %c0_77 = arith.constant 0 : index
    %86 = vector.load %arg12[%c0_76, %c0_77] : memref<128x128xbf16, #tpu.memory_space<vmem>>, vector<128x128xbf16>
    %cst_78 = arith.constant dense<0.000000e+00> : vector<18x128xf32>
    %87 = tpu.matmul %73, %86, %cst_78 {dimension_numbers = #tpu.dot_dimension_numbers<[1], [0], [0], [1], [0, 0, 1, 1], [], []>} : vector<18x128xbf16>, vector<128x128xbf16>, vector<18x128xf32> -> vector<18x128xf32>
    %88 = arith.addf %85, %87 : vector<18x128xf32>
    %c0_79 = arith.constant 0 : index
    %c0_80 = arith.constant 0 : index
    %89 = vector.load %arg13[%c0_79, %c0_80] : memref<1x128xf32, #tpu.memory_space<vmem>>, vector<1x128xf32>
    %90 = vector.broadcast %89 : vector<1x128xf32> to vector<18x128xf32>
    %91 = arith.addf %88, %90 : vector<18x128xf32>
    %cst_81 = arith.constant 0.000000e+00 : f32
    %92 = vector.broadcast %cst_81 : f32 to vector<18x128xf32>
    %93 = arith.maximumf %91, %92 : vector<18x128xf32>
    %c0_82 = arith.constant 0 : index
    %c0_83 = arith.constant 0 : index
    %c0_84 = arith.constant 0 : index
    %94 = vector.load %arg3[%c0_82, %c0_83, %c0_84] : memref<2x2x128xf32, #tpu.memory_space<vmem>>, vector<1x1x128xf32>
    %95 = vector.shape_cast %94 : vector<1x1x128xf32> to vector<1x128xf32>
    %c0_85 = arith.constant 0 : index
    %c1_86 = arith.constant 1 : index
    %c0_87 = arith.constant 0 : index
    %96 = vector.load %arg3[%c0_85, %c1_86, %c0_87] : memref<2x2x128xf32, #tpu.memory_space<vmem>>, vector<1x1x128xf32>
    %97 = vector.shape_cast %96 : vector<1x1x128xf32> to vector<1x128xf32>
    %98 = vector.extract_strided_slice %84 {offsets = [0, 0], sizes = [8, 128], strides = [1, 1]} : vector<18x128xf32> to vector<8x128xf32>
    %99 = vector.broadcast %95 : vector<1x128xf32> to vector<8x128xf32>
    %100 = arith.mulf %98, %99 : vector<8x128xf32>
    %101 = vector.broadcast %97 : vector<1x128xf32> to vector<8x128xf32>
    %102 = arith.addf %100, %101 : vector<8x128xf32>
    %c0_88 = arith.constant 0 : index
    %c0_89 = arith.constant 0 : index
    %103 = vector.load %arg14[%c0_88, %c0_89] : memref<16x256xf32, #tpu.memory_space<vmem>>, vector<8x128xf32>
    tpu.vector_store %arg14[%c0_88, %c0_89], %102 {strides = array<i32>} : memref<16x256xf32, #tpu.memory_space<vmem>>, vector<8x128xf32>,
    %104 = vector.extract_strided_slice %93 {offsets = [0, 0], sizes = [8, 128], strides = [1, 1]} : vector<18x128xf32> to vector<8x128xf32>
    %105 = vector.broadcast %95 : vector<1x128xf32> to vector<8x128xf32>
    %106 = arith.mulf %104, %105 : vector<8x128xf32>
    %107 = vector.broadcast %97 : vector<1x128xf32> to vector<8x128xf32>
    %108 = arith.addf %106, %107 : vector<8x128xf32>
    %c0_90 = arith.constant 0 : index
    %c128_91 = arith.constant 128 : index
    %109 = vector.load %arg14[%c0_90, %c128_91] : memref<16x256xf32, #tpu.memory_space<vmem>>, vector<8x128xf32>
    tpu.vector_store %arg14[%c0_90, %c128_91], %108 {strides = array<i32>} : memref<16x256xf32, #tpu.memory_space<vmem>>, vector<8x128xf32>,
    %c1_92 = arith.constant 1 : index
    %c0_93 = arith.constant 0 : index
    %c0_94 = arith.constant 0 : index
    %110 = vector.load %arg3[%c1_92, %c0_93, %c0_94] : memref<2x2x128xf32, #tpu.memory_space<vmem>>, vector<1x1x128xf32>
    %111 = vector.shape_cast %110 : vector<1x1x128xf32> to vector<1x128xf32>
    %c1_95 = arith.constant 1 : index
    %c1_96 = arith.constant 1 : index
    %c0_97 = arith.constant 0 : index
    %112 = vector.load %arg3[%c1_95, %c1_96, %c0_97] : memref<2x2x128xf32, #tpu.memory_space<vmem>>, vector<1x1x128xf32>
    %113 = vector.shape_cast %112 : vector<1x1x128xf32> to vector<1x128xf32>
    %114 = vector.extract_strided_slice %84 {offsets = [10, 0], sizes = [8, 128], strides = [1, 1]} : vector<18x128xf32> to vector<8x128xf32>
    %115 = vector.broadcast %111 : vector<1x128xf32> to vector<8x128xf32>
    %116 = arith.mulf %114, %115 : vector<8x128xf32>
    %117 = vector.broadcast %113 : vector<1x128xf32> to vector<8x128xf32>
    %118 = arith.addf %116, %117 : vector<8x128xf32>
    %c8 = arith.constant 8 : index
    %c0_98 = arith.constant 0 : index
    %119 = vector.load %arg14[%c8, %c0_98] : memref<16x256xf32, #tpu.memory_space<vmem>>, vector<8x128xf32>
    tpu.vector_store %arg14[%c8, %c0_98], %118 {strides = array<i32>} : memref<16x256xf32, #tpu.memory_space<vmem>>, vector<8x128xf32>,
    %120 = vector.extract_strided_slice %93 {offsets = [10, 0], sizes = [8, 128], strides = [1, 1]} : vector<18x128xf32> to vector<8x128xf32>
    %121 = vector.broadcast %111 : vector<1x128xf32> to vector<8x128xf32>
    %122 = arith.mulf %120, %121 : vector<8x128xf32>
    %123 = vector.broadcast %113 : vector<1x128xf32> to vector<8x128xf32>
    %124 = arith.addf %122, %123 : vector<8x128xf32>
    %c8_99 = arith.constant 8 : index
    %c128_100 = arith.constant 128 : index
    %125 = vector.load %arg14[%c8_99, %c128_100] : memref<16x256xf32, #tpu.memory_space<vmem>>, vector<8x128xf32>
    tpu.vector_store %arg14[%c8_99, %c128_100], %124 {strides = array<i32>} : memref<16x256xf32, #tpu.memory_space<vmem>>, vector<8x128xf32>,
    return
  }
  func.func @transform_0(%arg0: i32) -> (i32, i32) {
    %c0_i32 = arith.constant 0 : i32
    %c0_i32_0 = arith.constant 0 : i32
    return %arg0, %c0_i32 : i32, i32
  }
  func.func @transform_1(%arg0: i32) -> (i32, i32) {
    %c0_i32 = arith.constant 0 : i32
    %c0_i32_0 = arith.constant 0 : i32
    return %arg0, %c0_i32 : i32, i32
  }
  func.func @transform_2(%arg0: i32) -> (i32, i32, i32) {
    %c0_i32 = arith.constant 0 : i32
    %c0_i32_0 = arith.constant 0 : i32
    %c0_i32_1 = arith.constant 0 : i32
    return %arg0, %c0_i32, %c0_i32_0 : i32, i32, i32
  }
  func.func @transform_3(%arg0: i32) -> (i32, i32) {
    %c0_i32 = arith.constant 0 : i32
    %c0_i32_0 = arith.constant 0 : i32
    %c0_i32_1 = arith.constant 0 : i32
    return %c0_i32, %c0_i32_0 : i32, i32
  }
  func.func @transform_4(%arg0: i32) -> (i32, i32) {
    %c0_i32 = arith.constant 0 : i32
    %c0_i32_0 = arith.constant 0 : i32
    %c0_i32_1 = arith.constant 0 : i32
    return %c0_i32, %c0_i32_0 : i32, i32
  }
  func.func @transform_5(%arg0: i32) -> (i32, i32) {
    %c0_i32 = arith.constant 0 : i32
    %c0_i32_0 = arith.constant 0 : i32
    %c0_i32_1 = arith.constant 0 : i32
    return %c0_i32, %c0_i32_0 : i32, i32
  }
  func.func @transform_6(%arg0: i32) -> (i32, i32) {
    %c0_i32 = arith.constant 0 : i32
    %c0_i32_0 = arith.constant 0 : i32
    %c0_i32_1 = arith.constant 0 : i32
    return %c0_i32, %c0_i32_0 : i32, i32
  }
  func.func @transform_7(%arg0: i32) -> (i32, i32) {
    %c0_i32 = arith.constant 0 : i32
    %c0_i32_0 = arith.constant 0 : i32
    %c0_i32_1 = arith.constant 0 : i32
    return %c0_i32, %c0_i32_0 : i32, i32
  }
  func.func @transform_8(%arg0: i32) -> (i32, i32) {
    %c0_i32 = arith.constant 0 : i32
    %c0_i32_0 = arith.constant 0 : i32
    %c0_i32_1 = arith.constant 0 : i32
    return %c0_i32, %c0_i32_0 : i32, i32
  }
  func.func @transform_9(%arg0: i32) -> (i32, i32) {
    %c0_i32 = arith.constant 0 : i32
    %c0_i32_0 = arith.constant 0 : i32
    %c0_i32_1 = arith.constant 0 : i32
    return %c0_i32, %c0_i32_0 : i32, i32
  }
  func.func @transform_10(%arg0: i32) -> (i32, i32) {
    %c0_i32 = arith.constant 0 : i32
    %c0_i32_0 = arith.constant 0 : i32
    %c0_i32_1 = arith.constant 0 : i32
    return %c0_i32, %c0_i32_0 : i32, i32
  }
  func.func @transform_11(%arg0: i32) -> (i32, i32) {
    %c0_i32 = arith.constant 0 : i32
    %c0_i32_0 = arith.constant 0 : i32
    %c0_i32_1 = arith.constant 0 : i32
    return %c0_i32, %c0_i32_0 : i32, i32
  }
  func.func @transform_12(%arg0: i32) -> (i32, i32) {
    %c0_i32 = arith.constant 0 : i32
    %c0_i32_0 = arith.constant 0 : i32
    %c0_i32_1 = arith.constant 0 : i32
    return %c0_i32, %c0_i32_0 : i32, i32
  }
  func.func @transform_13(%arg0: i32) -> (i32, i32) {
    %c0_i32 = arith.constant 0 : i32
    %c0_i32_0 = arith.constant 0 : i32
    return %arg0, %c0_i32 : i32, i32
  }
}

</mosaic_0001>

<bundles_post_ra>
// kernel: tpu_custom_call.1
= control target key start
LH: loop header
LB: loop body
LE: loop exit
PB: predicated region body
PF: predicated region fallthrough
CT: control target
= control target key end

     0   :  { %s4357_s0 = inlined_call_operand.hbm [shape: bf16[32,128], index: 0, kind: input, shape index: {}]   ;;  %s4358_s1 = inlined_call_operand.hbm [shape: bf16[32,256], index: 1, kind: input, shape index: {}]   ;;  %s4359_s2 = inlined_call_operand.hbm [shape: f32[4,2,128], index: 2, kind: input, shape index: {}]   ;;  %s4360_s3 = inlined_call_operand.hbm [shape: bf16[128,256], index: 3, kind: input, shape index: {}]   ;;  %s4361_s4 = inlined_call_operand.vmem [shape: f32[1,256], index: 4, kind: input, shape index: {}]   ;;  %s4362_s5 = inlined_call_operand.hbm [shape: bf16[256,128], index: 5, kind: input, shape index: {}]   ;;  %s4363_s6 = inlined_call_operand.hbm [shape: bf16[512,256], index: 6, kind: input, shape index: {}]   ;;  %s4364_s7 = inlined_call_operand.hbm [shape: bf16[256,128], index: 7, kind: input, shape index: {}]   ;;  %s4365_s8 = inlined_call_operand.vmem [shape: f32[1,128], index: 8, kind: input, shape index: {}]   ;;  %s4366_s9 = inlined_call_operand.hbm [shape: bf16[128,128], index: 9, kind: input, shape index: {}]   ;;  %s4367_s10 = inlined_call_operand.hbm [shape: bf16[256,256], index: 10, kind: input, shape index: {}]   ;;  %s4368_s11 = inlined_call_operand.hbm [shape: bf16[128,128], index: 11, kind: input, shape index: {}]   ;;  %s4369_s12 = inlined_call_operand.vmem [shape: f32[1,128], index: 12, kind: input, shape index: {}]   ;;  %s4370_s13 = inlined_call_operand.hbm [shape: f32[32,256], index: 13, kind: output, shape index: {}]  }
   0x1   :  { %4402 = sst [smem:[#allocation37_spill]] %s4358_s1 }
   0x2   :  { %4403 = sst [smem:[#allocation38_spill]] %s4360_s3 }
   0x3   :  { %4404 = sst [smem:[#allocation39_spill]] %s4361_s4 }
   0x4   :  { %4405 = sst [smem:[#allocation40_spill]] %s4362_s5 }
   0x5   :  { %4406 = sst [smem:[#allocation41_spill]] %s4363_s6 }
   0x6   :  { %4407 = sst [smem:[#allocation42_spill]] %s4365_s8 }
   0x7   :  { %4408 = sst [smem:[#allocation43_spill]] %s4366_s9 }
   0x8   :  { %4409 = sst [smem:[#allocation44_spill]] %s4369_s12 }
   0x9   :  { %4410 = sst [smem:[#allocation45_spill]] %s4370_s13 }
   0xa   :  { %18 = vsyncpa [#allocation5], 0 }
   0xb   :  { %20 = vsyncpa [#allocation5 + $0x1], 0 }
   0xc   :  { %21 = vsyncpa [#allocation8], 0 }
   0xd   :  { %23 = vsyncpa [#allocation8 + $0x1], 0 }
   0xe   :  { %24 = vsyncpa [#allocation11], 0 }
   0xf   :  { %25 = vsyncpa [#allocation14], 0 }
  0x10   :  { %26 = vsyncpa [#allocation17], 0 }
  0x11   :  { %27 = vsyncpa [#allocation20], 0 }
  0x12   :  { %28 = vsyncpa [#allocation6], 0 }
  0x13   :  { %30 = vsyncpa [#allocation6 + $0x1], 0  ;;  %s3839_s25 = smov 0   ;;  %s3841_s26 = smov 0  }
  0x14   :  { %s3843_s27 = smov 0   ;;  %s3845_s28 = smov 0  }
  0x15 LB: > { %4411 = sst [smem:[#allocation29_spill]] %s3734_s25  ;;  %s3748_s29 = smov [#allocation10]   ;;  %s3746_s28 = sphi %s3845_s28, %s4463_s28   ;;  %s3742_s27 = sphi %s3843_s27, %s4468_s27   ;;  %s3738_s26 = sphi %s3841_s26, %s4467_s26   ;;  %s3734_s25 = sphi %s3839_s25, %s4466_s25  }
  0x16   : > { %4412 = sst [smem:[#allocation30_spill]] %s3742_s27  ;;  %s367_s30 = sshll.u32 %s3748_s29, 4  ;;  %s3865_s30 = int_to_ptr.vmem [resolvable:$true] %s367_s30 }
  0x17   : > { %s3860_s14 = sadd.s32 4294967295, %s3746_s28   ;;  %p2689_p0 = scmp.ge.s32.totalorder %s3746_s28, 1 }
  0x18   : > { %4413 = sst [smem:[#allocation31_spill]] %s3860_s14  ;;  %p4373_p1 = scmp.eq.s32.totalorder %s3860_s14, 0 }
  0x19   : > { %p355_p2 = scmp.lt.s32.totalorder %s3746_s28, 3  ;;  %s3749_s16 = smov [#allocation13]  }
  0x1a   : > { %s396_s17 = sshll.u32 %s3749_s16, 4  ;;  %s3750_s19 = smov [#allocation16]   ;;  %s3880_s17 = int_to_ptr.vmem [resolvable:$true] %s396_s17 }
  0x1b   : > { %p3867_p3 = pnand %p2689_p0, %p355_p2  ;;  %s3882_s20 = sshll.u32 %s3750_s19, 4  ;;  %s426_s20 = int_to_ptr.vmem [resolvable:$true] %s3882_s20 }
  0x1c   : > { %s4417_s3 = sld [smem:[#allocation38_spill]] }
  0x1d   : > { %s4414_s15 = scalar_select %p3867_p3, 1, 0 }
  0x1e   : > { %p3057_p5 = pneg %p3867_p3 }
  0x1f   : > { %4415 = sst [smem:[#allocation32_spill]] %s4414_s15 }
  0x20   : > { %p3876_p6 = pnand %p3057_p5, %p4373_p1 }
  0x22   : > { %s4416_s18 = scalar_select %p3876_p6, 1, 0 }
  0x23   : > { %s3374_s23 = scalar_lea.hbm %s4417_s3, 2048  ;;  %p3892_p8 = pneg %p3876_p6 }
  0x24   : > { %p3375_p7 = scmp.ne.s32.totalorder %s4417_s3, %s3374_s23  ;;  %p3381_p11 = scmp.lt.u32.totalorder %s3374_s23, %s4417_s3 }
  0x25   : > { %s4418_s16 = scalar_select %p3892_p8, 1, 0 }
  0x26   : > { %p3377_p9 = pnand %p3892_p8, %p3375_p7 }
  0x28   : > { %p3378_p10 = pneg %p3377_p9 }
  0x2a   : > { %p3383_p12 = pnand %p3381_p11, %p3378_p10 }
  0x2c   : > { %3386 = shalt.err (!%p3383_p12)
}
  0x2d   : > { %s3387_s21 = scalar_lea.vmem %s3865_s30, 2048  ;;  %p3395_p5 = scmp.lt.s32.totalorder %s3865_s30, %s3865_s30 }
  0x2e   : > { %p3388_p13 = scmp.ne.s32.totalorder %s3865_s30, %s3387_s21  ;;  %p3396_p4 = scmp.lt.s32.totalorder %s3387_s21, %s3387_s21 }
  0x30   : > { %p3390_p0 = pnand %p3388_p13, %p3892_p8  ;;  %p3397_p7 = por %p3396_p4, %p3395_p5 }
  0x32   : > { %p3391_p2 = pneg %p3390_p0 }
  0x34   : > { %p3398_p9 = pnand %p3397_p7, %p3391_p2 }
  0x36   : > { %3401 = shalt.err (!%p3398_p9)
}
  0x37   : > { %s4379_s22 = smov 128   ;;  %s4381_s13 = smov 8  }
  0x38   : > { %3060 = dma.hbm_to_vmem [thread:$0]  (!%p3876_p6), %s4417_s3, 2048, %s3865_s30, [#allocation11], %s4379_s22, %s4379_s22, %s4381_s13  }
  0x39   : > { %s4419_s6 = sld [smem:[#allocation41_spill]] }
  0x3f   : > { %s3402_s21 = scalar_lea.hbm %s4419_s6, 8192 }
  0x40   : > { %p3403_p4 = scmp.ne.s32.totalorder %s4419_s6, %s3402_s21  ;;  %p3409_p12 = scmp.lt.u32.totalorder %s3402_s21, %s4419_s6 }
  0x42   : > { %p3405_p10 = pnand %p3403_p4, %p3892_p8 }
  0x44   : > { %p3406_p11 = pneg %p3405_p10 }
  0x46   : > { %p3411_p13 = pnand %p3409_p12, %p3406_p11 }
  0x48   : > { %3414 = shalt.err (!%p3411_p13)
}
  0x49   : > { %s3415_s30 = scalar_lea.vmem %s3880_s17, 8192  ;;  %p3423_p7 = scmp.lt.s32.totalorder %s3880_s17, %s3880_s17 }
  0x4a   : > { %p3416_p0 = scmp.ne.s32.totalorder %s3880_s17, %s3415_s30  ;;  %p3424_p9 = scmp.lt.s32.totalorder %s3415_s30, %s3415_s30 }
  0x4c   : > { %p3418_p2 = pnand %p3416_p0, %p3892_p8  ;;  %p3425_p4 = por %p3424_p9, %p3423_p7 }
  0x4e   : > { %p3419_p5 = pneg %p3418_p2 }
  0x50   : > { %p3426_p10 = pnand %p3425_p4, %p3419_p5 }
  0x52   : > { %3429 = shalt.err (!%p3426_p10)
}
  0x53   : > { %3066 = dma.hbm_to_vmem [thread:$0]  (!%p3876_p6), %s4419_s6, 8192, %s3880_s17, [#allocation14], %s4379_s22, %s4379_s22, %s4381_s13  }
  0x54   : > { %s4420_s9 = sld [smem:[#allocation43_spill]] }
  0x5a   : > { %s3430_s23 = scalar_lea.hbm %s4420_s9, 1024 }
  0x5b   : > { %p3431_p11 = scmp.ne.s32.totalorder %s4420_s9, %s3430_s23  ;;  %p3437_p0 = scmp.lt.u32.totalorder %s3430_s23, %s4420_s9 }
  0x5d   : > { %p3433_p12 = pnand %p3431_p11, %p3892_p8 }
  0x5f   : > { %p3434_p13 = pneg %p3433_p12 }
  0x61   : > { %p3439_p2 = pnand %p3437_p0, %p3434_p13 }
  0x63   : > { %3442 = shalt.err (!%p3439_p2)
}
  0x64   : > { %s3443_s30 = scalar_lea.vmem %s426_s20, 1024  ;;  %p3451_p4 = scmp.lt.s32.totalorder %s426_s20, %s426_s20 }
  0x65   : > { %p3444_p5 = scmp.ne.s32.totalorder %s426_s20, %s3443_s30  ;;  %p3452_p10 = scmp.lt.s32.totalorder %s3443_s30, %s3443_s30 }
  0x67   : > { %p3446_p7 = pnand %p3444_p5, %p3892_p8  ;;  %p3453_p1 = por %p3452_p10, %p3451_p4 }
  0x69   : > { %p3447_p9 = pneg %p3446_p7 }
  0x6b   : > { %p3454_p3 = pnand %p3453_p1, %p3447_p9 }
  0x6d   : > { %3457 = shalt.err (!%p3454_p3)
}
  0x6e   : > { %s4375_s17 = smov 64   ;;  %s4377_s4 = smov 4  }
  0x6f   : > { %3072 = dma.hbm_to_vmem [thread:$0]  (!%p3876_p6), %s4420_s9, 1024, %s426_s20, [#allocation17], %s4375_s17, %s4375_s17, %s4377_s4  }
  0x70   : > { %s2688_s15 = sadd.s32 4294967294, %s3746_s28   ;;  %s3966_s23 = sadd.s32 1, %s3746_s28  }
  0x71   : > { %4421 = sst [smem:[#allocation33_spill]] %s3966_s23  ;;  %s43_s24 = sadd.s32 1, %s3742_s27 }
  0x72   : > { %s40_s29 = ssub.s32 %s3746_s28, %s3966_s23  ;;  %p50_p1 = scmp.ne.s32.totalorder %s3742_s27, %s3738_s26 }
  0x73   : > { %p41_p3 = scmp.eq.s32.totalorder %s40_s29, 0  ;;  %p51_p11 = scmp.eq.s32.totalorder %s3746_s28, 0 }
  0x74   : > { %p56_p12 = scmp.ne.s32.totalorder %s3738_s26, %s3734_s25  ;;  %p342_p13 = scmp.eq.s32.totalorder %s3860_s14, 1 }
  0x75   : > { %s3978_s19 = scalar_select %p41_p3, %s3742_s27, %s43_s24  }
  0x76   : > { %p52_p0 = por %p51_p11, %p50_p1  ;;  %p4423_p2 = scmp.eq.s32.totalorder %s3860_s14, 0 }
  0x77   : > { %4422 = sst [smem:[#allocation34_spill]] %s3978_s19  ;;  %p3986_p7 = por %p342_p13, %p50_p1 }
  0x78   : > { %p3982_p5 = por %p4423_p2, %p56_p12  ;;  %p348_p9 = scmp.eq.s32.totalorder %s2688_s15, 1 }
  0x79   : > { %s4425_s21 = scalar_select %p3986_p7, 1, 0 }
  0x7a   : > { %s4424_s20 = scalar_select %p3982_p5, 1, 0 }
  0x7b   : > { %4426 = sst [smem:[#allocation35_spill]] %s4425_s21  ;;  %p3100_p4 = scmp.lt.s32.totalorder %s3746_s28, 2 }
  0x7c   : > { %s3992_s30 = sand.u32 1, %s3742_s27   ;;  %p3994_p10 = por %p348_p9, %p56_p12 }
  0x7d   : > { %s489_s12 = sand.u32 1, %s3746_s28   ;;  %p3999_p3 = pnand %p3100_p4, %p52_p0 }
  0x7e   : > { %s4427_s8 = scalar_select %p3994_p10, 1, 0 }
  0x7f   : > { %s4429_s24 = scalar_select %p3999_p3, 1, 0 }
  0x80   : > { %4428 = sst [smem:[#allocation36_spill]] %s4427_s8  ;;  %s2701_s29 = sshll.u32 %s3992_s30, 4 }
  0x81   : > { %s2897_s17 = sshll.u32 %s3746_s28, 8  ;;  %s4430_s1 = sld [smem:[#allocation37_spill]] }
  0x82   : > { %s493_s13 = scalar_lea.vmem [#allocation7], %s2701_s29  ;;  %s4012_s6 = scalar_lea.sflag [#allocation8], %s489_s12 }
  0x83   : > { %s501_s3 = sshll.u32 %s493_s13, 4  ;;  %p4018_p11 = pneg %p3999_p3  ;;  %s4010_s3 = int_to_ptr.vmem [resolvable:$true] %s501_s3 }
  0x85   : > { %s4431_s19 = scalar_select %p4018_p11, 1, 0 }
  0x87   : > { %s4008_s15 = scalar_lea.hbm %s4430_s1, %s2897_s17  ;;  %s3463_s4 = scalar_lea.hbm %s4430_s1, 512 }
  0x88   : > { %s3458_s9 = scalar_lea.hbm %s4008_s15, 256  ;;  %p3464_p0 = scmp.lt.u32.totalorder %s4008_s15, %s4430_s1 }
  0x89   : > { %p3459_p1 = scmp.ne.s32.totalorder %s4008_s15, %s3458_s9  ;;  %p3465_p2 = scmp.lt.u32.totalorder %s3463_s4, %s3458_s9 }
  0x8a   : > { %p3467_p4 = scmp.lt.u32.totalorder %s3458_s9, %s4008_s15 }
  0x8b   : > { %p3461_p12 = pnand %p4018_p11, %p3459_p1  ;;  %p3466_p9 = por %p3465_p2, %p3464_p0 }
  0x8d   : > { %p3462_p13 = pneg %p3461_p12  ;;  %p3468_p10 = por %p3467_p4, %p3466_p9 }
  0x8f   : > { %p3469_p7 = pnand %p3468_p10, %p3462_p13 }
  0x91   : > { %3472 = shalt.err (!%p3469_p7)
}
  0x92   : > { %s3473_s12 = scalar_lea.vmem %s4010_s3, 256  ;;  %s3755_s22 = smov [#allocation7]  }
  0x93   : > { %p3474_p1 = scmp.ne.s32.totalorder %s4010_s3, %s3473_s12  ;;  %s3478_s17 = sshll.u32 %s3755_s22, 4  ;;  %s3479_s17 = int_to_ptr.vmem [resolvable:$false] %s3478_s17 }
  0x94   : > { %s3480_s13 = scalar_lea.vmem %s3479_s17, 512  ;;  %p3481_p6 = scmp.lt.s32.totalorder %s4010_s3, %s3479_s17 }
  0x95   : > { %p3476_p12 = pnand %p3474_p1, %p4018_p11  ;;  %p3482_p8 = scmp.lt.s32.totalorder %s3480_s13, %s3473_s12 }
  0x97   : > { %p3477_p5 = pneg %p3476_p12  ;;  %p3483_p0 = por %p3482_p8, %p3481_p6 }
  0x99   : > { %p3484_p2 = pnand %p3483_p0, %p3477_p5 }
  0x9b   : > { %3487 = shalt.err (!%p3484_p2)
}
  0x9c   : > { %s4432_s9 = smov 8   ;;  %s4433_s4 = smov 128  }
  0x9d   : > { %3085 = dma.hbm_to_vmem [thread:$0]  (!%p3999_p3), %s4008_s15, 256, %s4010_s3, %s4012_s6, %s4433_s4, %s4433_s4, %s4432_s9  }
  0x9e   : > { %s3756_s29 = smov [#allocation12]   ;;  %s3757_s22 = smov [#allocation15]  }
  0x9f   : > { %s383_s1 = sshll.u32 %s3756_s29, 4  ;;  %s409_s27 = sshll.u32 %s3757_s22, 4  ;;  %s384_s1 = int_to_ptr.vmem [resolvable:$true] %s383_s1  ;;  %s410_s27 = int_to_ptr.vmem [resolvable:$true] %s409_s27 }
  0xa0   : > { %s4434_s5 = sld [smem:[#allocation40_spill]]  ;;  %p4435_p8 = scmp.ne.s32.totalorder %s4418_s16, 0 }
  0xa6   : > { %s3488_s13 = scalar_lea.hbm %s4434_s5, 2048 }
  0xa7   : > { %p3489_p6 = scmp.ne.s32.totalorder %s4434_s5, %s3488_s13  ;;  %p3495_p10 = scmp.lt.u32.totalorder %s3488_s13, %s4434_s5 }
  0xa9   : > { %p3491_p5 = pnand %p3489_p6, %p4435_p8 }
  0xab   : > { %p3492_p7 = pneg %p3491_p5 }
  0xad   : > { %p3497_p13 = pnand %p3495_p10, %p3492_p7 }
  0xaf   : > { %3500 = shalt.err (!%p3497_p13)
}
  0xb0   : > { %s3501_s3 = scalar_lea.vmem %s384_s1, 2048  ;;  %p3509_p12 = scmp.lt.s32.totalorder %s384_s1, %s384_s1 }
  0xb1   : > { %p3502_p9 = scmp.ne.s32.totalorder %s384_s1, %s3501_s3  ;;  %p3510_p0 = scmp.lt.s32.totalorder %s3501_s3, %s3501_s3 }
  0xb3   : > { %p3504_p4 = pnand %p3502_p9, %p4435_p8  ;;  %p3511_p2 = por %p3510_p0, %p3509_p12 }
  0xb5   : > { %p3505_p1 = pneg %p3504_p4 }
  0xb7   : > { %p3512_p3 = pnand %p3511_p2, %p3505_p1 }
  0xb9   : > { %3515 = shalt.err (!%p3512_p3)
}
  0xba   : > { %p4436_p6 = scmp.ne.s32.totalorder %s4416_s18, 0  ;;  %s4437_s23 = smov 4  }
  0xbb   : > { %s4438_s8 = smov 64   ;;  %s3516_s22 = scalar_lea.hbm %s4364_s7, 2048 }
  0xbc   : > { %3063 = dma.hbm_to_vmem [thread:$0]  (!%p4436_p6), %s4434_s5, 2048, %s384_s1, [#allocation11], %s4438_s8, %s4438_s8, %s4437_s23  }
  0xbd   : > { %p3517_p5 = scmp.ne.s32.totalorder %s4364_s7, %s3516_s22  ;;  %p3523_p10 = scmp.lt.u32.totalorder %s3516_s22, %s4364_s7 }
  0xbf   : > { %p3519_p3 = pnand %p3517_p5, %p4435_p8 }
  0xc1   : > { %p3520_p7 = pneg %p3519_p3 }
  0xc3   : > { %p3525_p13 = pnand %p3523_p10, %p3520_p7 }
  0xc5   : > { %3528 = shalt.err (!%p3525_p13)
}
  0xc6   : > { %s3529_s25 = scalar_lea.vmem %s410_s27, 2048  ;;  %p3537_p12 = scmp.lt.s32.totalorder %s410_s27, %s410_s27 }
  0xc7   : > { %p3530_p9 = scmp.ne.s32.totalorder %s410_s27, %s3529_s25  ;;  %p3538_p0 = scmp.lt.s32.totalorder %s3529_s25, %s3529_s25 }
  0xc9   : > { %p3532_p4 = pnand %p3530_p9, %p4435_p8  ;;  %p3539_p2 = por %p3538_p0, %p3537_p12 }
  0xcb   : > { %p3533_p1 = pneg %p3532_p4 }
  0xcd   : > { %p3540_p11 = pnand %p3539_p2, %p3533_p1 }
  0xcf   : > { %3543 = shalt.err (!%p3540_p11)
}
  0xd0   : > { %3069 = dma.hbm_to_vmem [thread:$0]  (!%p4436_p6), %s4364_s7, 2048, %s410_s27, [#allocation14], %s4438_s8, %s4438_s8, %s4437_s23  }
  0xd1   : > { %s3758_s15 = smov [#allocation18]   ;;  %s3759_s22 = smov [#allocation19]  }
  0xd2   : > { %s438_s29 = sshll.u32 %s3758_s15, 4  ;;  %s451_s17 = sshll.u32 %s3759_s22, 4  ;;  %s439_s29 = int_to_ptr.vmem [resolvable:$true] %s438_s29  ;;  %s452_s17 = int_to_ptr.vmem [resolvable:$true] %s451_s17 }
  0xd3   : > { %s3544_s3 = scalar_lea.hbm %s4367_s10, 4096 }
  0xd4   : > { %p3545_p11 = scmp.ne.s32.totalorder %s4367_s10, %s3544_s3  ;;  %p3551_p7 = scmp.lt.u32.totalorder %s3544_s3, %s4367_s10 }
  0xd6   : > { %p3547_p5 = pnand %p3545_p11, %p4435_p8 }
  0xd8   : > { %p3548_p3 = pneg %p3547_p5 }
  0xda   : > { %p3553_p10 = pnand %p3551_p7, %p3548_p3 }
  0xdc   : > { %3556 = shalt.err (!%p3553_p10)
}
  0xdd   : > { %s3557_s27 = scalar_lea.vmem %s439_s29, 4096  ;;  %p3565_p1 = scmp.lt.s32.totalorder %s439_s29, %s439_s29 }
  0xde   : > { %p3558_p13 = scmp.ne.s32.totalorder %s439_s29, %s3557_s27  ;;  %p3566_p12 = scmp.lt.s32.totalorder %s3557_s27, %s3557_s27 }
  0xe0   : > { %p3560_p9 = pnand %p3558_p13, %p4435_p8  ;;  %p3567_p0 = por %p3566_p12, %p3565_p1 }
  0xe2   : > { %p3561_p4 = pneg %p3560_p9 }
  0xe4   : > { %p3568_p2 = pnand %p3567_p0, %p3561_p4 }
  0xe6   : > { %3571 = shalt.err (!%p3568_p2)
}
  0xe7   : > { %3075 = dma.hbm_to_vmem [thread:$0]  (!%p4436_p6), %s4367_s10, 4096, %s439_s29, [#allocation17], %s4433_s4, %s4433_s4, %s4432_s9  }
  0xe8   : > { %s3572_s22 = scalar_lea.hbm %s4368_s11, 1024 }
  0xe9   : > { %p3573_p11 = scmp.ne.s32.totalorder %s4368_s11, %s3572_s22  ;;  %p3579_p7 = scmp.lt.u32.totalorder %s3572_s22, %s4368_s11 }
  0xeb   : > { %p3575_p5 = pnand %p3573_p11, %p4435_p8 }
  0xed   : > { %p3576_p3 = pneg %p3575_p5 }
  0xef   : > { %p3581_p10 = pnand %p3579_p7, %p3576_p3 }
  0xf1   : > { %3584 = shalt.err (!%p3581_p10)
}
  0xf2   : > { %s3585_s1 = scalar_lea.vmem %s452_s17, 1024  ;;  %p3593_p1 = scmp.lt.s32.totalorder %s452_s17, %s452_s17 }
  0xf3   : > { %p3586_p13 = scmp.ne.s32.totalorder %s452_s17, %s3585_s1  ;;  %p3594_p12 = scmp.lt.s32.totalorder %s3585_s1, %s3585_s1 }
  0xf5   : > { %p3588_p9 = pnand %p3586_p13, %p4435_p8  ;;  %p3595_p0 = por %p3594_p12, %p3593_p1 }
  0xf7   : > { %p3589_p4 = pneg %p3588_p9 }
  0xf9   : > { %p3596_p2 = pnand %p3595_p0, %p3589_p4 }
  0xfb   : > { %3599 = shalt.err (!%p3596_p2)
}
  0xfc   : > { %3078 = dma.hbm_to_vmem [thread:$0]  (!%p4436_p6), %s4368_s11, 1024, %s452_s17, [#allocation20], %s4438_s8, %s4438_s8, %s4437_s23  }
  0xfd   : > { %s2698_s16 = sshll.u32 %s3992_s30, 3  ;;  %s2895_s29 = sshll.u32 %s3746_s28, 7 }
  0xfe   : > { %s4134_s14 = scalar_lea.hbm %s4357_s0, %s2895_s29  ;;  %s472_s18 = scalar_lea.vmem [#allocation4], %s2698_s16 }
  0xff   : > { %s479_s21 = sshll.u32 %s472_s18, 4  ;;  %s2705_s15 = sshll.u32 %s3992_s30, 2  ;;  %s4137_s21 = int_to_ptr.vmem [resolvable:$true] %s479_s21 }
 0x100   : > { %s469_s22 = scalar_lea.sflag [#allocation5], %s3992_s30  ;;  %s3600_s12 = scalar_lea.hbm %s4134_s14, 128 }
 0x101   : > { %p3601_p8 = scmp.ne.s32.totalorder %s4134_s14, %s3600_s12  ;;  %p4439_p6 = scmp.ne.s32.totalorder %s4431_s19, 0 }
 0x102   : > { %s3605_s3 = scalar_lea.hbm %s4357_s0, 256  ;;  %p3606_p3 = scmp.lt.u32.totalorder %s4134_s14, %s4357_s0 }
 0x103   : > { %p3603_p11 = pnand %p3601_p8, %p4439_p6  ;;  %p3607_p7 = scmp.lt.u32.totalorder %s3605_s3, %s3600_s12 }
 0x104   : > { %p3609_p13 = scmp.lt.u32.totalorder %s3600_s12, %s4134_s14 }
 0x105   : > { %p3604_p5 = pneg %p3603_p11  ;;  %p3608_p10 = por %p3607_p7, %p3606_p3 }
 0x107   : > { %p3610_p9 = por %p3609_p13, %p3608_p10 }
 0x109   : > { %p3611_p4 = pnand %p3610_p9, %p3604_p5 }
 0x10b   : > { %3614 = shalt.err (!%p3611_p4)
}
 0x10c   : > { %s3615_s9 = scalar_lea.vmem %s4137_s21, 128  ;;  %s3760_s4 = smov [#allocation4]  }
 0x10d   : > { %p3616_p1 = scmp.ne.s32.totalorder %s4137_s21, %s3615_s9  ;;  %s3620_s16 = sshll.u32 %s3760_s4, 4  ;;  %s3621_s16 = int_to_ptr.vmem [resolvable:$false] %s3620_s16 }
 0x10e   : > { %s3622_s29 = scalar_lea.vmem %s3621_s16, 256  ;;  %p3623_p2 = scmp.lt.s32.totalorder %s4137_s21, %s3621_s16 }
 0x10f   : > { %p3618_p12 = pnand %p3616_p1, %p4439_p6  ;;  %p3624_p8 = scmp.lt.s32.totalorder %s3622_s29, %s3615_s9 }
 0x111   : > { %p3619_p0 = pneg %p3618_p12  ;;  %p3625_p11 = por %p3624_p8, %p3623_p2 }
 0x113   : > { %p3626_p3 = pnand %p3625_p11, %p3619_p0 }
 0x115   : > { %3629 = shalt.err (!%p3626_p3)
}
 0x116   : > { %p4440_p5 = scmp.ne.s32.totalorder %s4429_s24, 0  ;;  %s2898_s27 = sshll.u32 %s3746_s28, 6 }
 0x117   : > { %s515_s5 = scalar_lea.vmem [#allocation9], %s2705_s15  ;;  %s4172_s13 = scalar_lea.hbm %s4359_s2, %s2898_s27 }
 0x118   : > { %3082 = dma.hbm_to_vmem [thread:$0]  (!%p4440_p5), %s4134_s14, 128, %s4137_s21, %s469_s22, %s4438_s8, %s4438_s8, %s4437_s23  }
 0x119   : > { %s522_s18 = sshll.u32 %s515_s5, 4  ;;  %s3630_s3 = scalar_lea.hbm %s4172_s13, 64  ;;  %s4174_s18 = int_to_ptr.vmem [resolvable:$true] %s522_s18 }
 0x11a   : > { %p3631_p7 = scmp.ne.s32.totalorder %s4172_s13, %s3630_s3  ;;  %s3635_s8 = scalar_lea.hbm %s4359_s2, 128 }
 0x11b   : > { %p3636_p9 = scmp.lt.u32.totalorder %s4172_s13, %s4359_s2  ;;  %p3637_p4 = scmp.lt.u32.totalorder %s3635_s8, %s3630_s3 }
 0x11c   : > { %p3633_p10 = pnand %p3631_p7, %p4439_p6  ;;  %p3639_p12 = scmp.lt.u32.totalorder %s3630_s3, %s4172_s13 }
 0x11d   : > { %p3638_p1 = por %p3637_p4, %p3636_p9 }
 0x11e   : > { %p3634_p13 = pneg %p3633_p10 }
 0x11f   : > { %p3640_p0 = por %p3639_p12, %p3638_p1 }
 0x121   : > { %p3641_p2 = pnand %p3640_p0, %p3634_p13 }
 0x123   : > { %3644 = shalt.err (!%p3641_p2)
}
 0x124   : > { %s3645_s15 = scalar_lea.vmem %s4174_s18, 64  ;;  %s3761_s22 = smov [#allocation9]  }
 0x125   : > { %p3646_p8 = scmp.ne.s32.totalorder %s4174_s18, %s3645_s15  ;;  %s3650_s25 = sshll.u32 %s3761_s22, 4  ;;  %s3651_s25 = int_to_ptr.vmem [resolvable:$false] %s3650_s25 }
 0x126   : > { %s3652_s1 = scalar_lea.vmem %s3651_s25, 128  ;;  %p3653_p7 = scmp.lt.s32.totalorder %s4174_s18, %s3651_s25 }
 0x127   : > { %p3648_p11 = pnand %p3646_p8, %p4439_p6  ;;  %p3654_p10 = scmp.lt.s32.totalorder %s3652_s1, %s3645_s15 }
 0x129   : > { %p3649_p3 = pneg %p3648_p11  ;;  %p3655_p9 = por %p3654_p10, %p3653_p7 }
 0x12b   : > { %p3656_p4 = pnand %p3655_p9, %p3649_p3 }
 0x12d   : > { %3659 = shalt.err (!%p3656_p4)
}
 0x12e   : > { %s3762_s9 = smov 32   ;;  %s3763_s4 = smov 2  }
 0x12f   : > { %3088 = dma.hbm_to_vmem [thread:$0]  (!%p4440_p5), %s4172_s13, 64, %s4174_s18, %s4012_s6, %s3762_s9, %s3762_s9, %s3763_s4  }
 0x130   : > { %s4441_s19 = sld [smem:[#allocation32_spill]] }
 0x136   : > { %p4442_p6 = scmp.ne.s32.totalorder %s4441_s19, 0 }
 0x137   : > { %s4201_s16 = sand.u32 (!%p4442_p6), 1, %s3738_s26   ;;  %p4443_p13 = scmp.ne.s32.totalorder (!%p4442_p6), %s4424_s20, 0 }
 0x138   : > { %534 = sbr.rel (%p4442_p6) target bundleno = 1198 (0x4ae), region = 72  ;;  %s2709_s29 = sshll.u32 (!%p4442_p6), %s4201_s16, 3 }
 0x139   : > { %s537_s27 = scalar_lea.sflag (!%p4442_p6), [#allocation5], %s4201_s16  ;;  %s4205_s5 = scalar_lea.vmem (!%p4442_p6), [#allocation4], %s2709_s29 }
 0x13f   : > { %3705 = dma.done.wait (%p4443_p13), %s537_s27, 128  }
 0x140   : > { %3707 = vsyncadd (%p4443_p13), %s537_s27, 4294967168  ;;  %s4444_s24 = sld [smem:[#allocation31_spill]]  ;;  %s2710_s18 = sshll.u32 %s4201_s16, 4 }
 0x141   : > { %s4213_s17 = scalar_lea.vmem [#allocation7], %s2710_s18 }
 0x146   : > { %s545_s6 = sand.u32 1, %s4444_s24  }
 0x147   : > { %s546_s12 = scalar_lea.sflag [#allocation8], %s545_s6 }
 0x148   : > { %3709 = dma.done.wait (%p4443_p13), %s546_s12, 320  }
 0x149   : > { %3711 = vsyncadd (%p4443_p13), %s546_s12, 4294966976  ;;  %s2711_s13 = sshll.u32 %s4201_s16, 2  ;;  %p4445_p5 = scmp.eq.s32.totalorder %s4444_s24, 0 }
 0x14a   : > { %s4220_s3 = scalar_lea.vmem [#allocation9], %s2711_s13 }
 0x14b   : > { %3713 = dma.done.wait (%p4445_p5), [#allocation11], 4096   ;;  %p4446_p1 = pmov %p4445_p5 }
 0x14d   : > { %3715 = vsyncadd (%p4446_p1), [#allocation11], 4294963200  ;;  %p4447_p12 = pmov %p4446_p1 }
 0x14e   : > { %p4448_p0 = pmov %p4446_p1 }
 0x14f   : > { %3717 = dma.done.wait (%p4447_p12), [#allocation14], 10240  }
 0x150   : > { %3719 = vsyncadd (%p4448_p0), [#allocation14], 4294957056  ;;  %p4449_p2 = pmov %p4448_p0 }
 0x151   : > { %p4450_p8 = pmov %p4448_p0 }
 0x152   : > { %3721 = dma.done.wait (%p4449_p2), [#allocation17], 5120  }
 0x153   : > { %3723 = vsyncadd (%p4450_p8), [#allocation17], 4294962176  ;;  %p4451_p11 = pmov %p4448_p0 }
 0x154   : > { %p4452_p3 = pmov %p4448_p0 }
 0x155   : > { %3725 = dma.done.wait (%p4451_p11), [#allocation20], 1024  }
 0x156   : > { %3727 = vsyncadd (%p4452_p3), [#allocation20], 4294966272  ;;  %v644_v0 = vlaneseq  ;;  %v3764_v1 = vmov 0   ;;  %v3765_v2 = vmov 0.0   ;;  %v3158_v3 = vld [vmem:[#allocation10 + $0x4] ss:$8 sps:$4 sm:$0xff]  }
 0x157   : > { %820 = vmatprep.mubr.bf16.mxu0 %v3764_v1  ;;  %v3160_v4 = vld [vmem:[#allocation10] ss:$8 sps:$4 sm:$0xff]   ;;  %788 = vmatprep.subr.bf16.mxu0 %v3158_v3  ;;  %v3161_v5 = vld [vmem:[#allocation10 + $0x14] ss:$8 sps:$4 sm:$0xff]   ;;  %v3163_v6 = vld [vmem:[#allocation10 + $0x10] ss:$8 sps:$4 sm:$0xff]  }
 0x158   : > { %vm646_vm0 = vcmp.lt.s32.totalorder %v644_v0, 512  ;;  %vm653_vm1 = vcmp.lt.s32.totalorder %v644_v0, 256  ;;  %789 = vmatpush1.bf16.msra.mxu0 %v3160_v4  ;;  %v3164_v7 = vld [vmem:[#allocation10 + $0x24] ss:$8 sps:$4 sm:$0xff]   ;;  %v3166_v8 = vld [vmem:[#allocation10 + $0x20] ss:$8 sps:$4 sm:$0xff]  }
 0x159   : > { %648 = vst.msk [vmem:[#allocation2] ss:$8 sm:$0xf] %vm646_vm0, %v3765_v2  ;;  %651 = vst.msk [vmem:[#allocation2 + $0x21] ss:$8 sm:$0xf] %vm646_vm0, %v3765_v2  ;;  %790 = vmatprep.subr.bf16.mxu0 %v3161_v5 }
 0x15a   : > { %655 = vst.msk [vmem:[#allocation3] ss:$8 sm:$0x3] %vm653_vm1, %v3765_v2  ;;  %658 = vst.msk [vmem:[#allocation3 + $0x11] ss:$8 sm:$0x3] %vm653_vm1, %v3765_v2 }
 0x15b   : > { %661 = vst.msk [vmem:[#allocation2 + $0x22] ss:$8 sm:$0xf] %vm646_vm0, %v3765_v2  ;;  %664 = vst.msk [vmem:[#allocation2 + $0x43] ss:$8 sm:$0xf] %vm646_vm0, %v3765_v2 }
 0x15c   : > { %667 = vst.msk [vmem:[#allocation3 + $0x12] ss:$8 sm:$0x3] %vm653_vm1, %v3765_v2  ;;  %670 = vst.msk [vmem:[#allocation3 + $0x23] ss:$8 sm:$0x3] %vm653_vm1, %v3765_v2  ;;  %791 = vmatpush1.bf16.msra.mxu0 %v3163_v6 }
 0x15d   : > { %792 = vmatprep.subr.bf16.mxu0 %v3164_v7  ;;  %v3167_v9 = vld [vmem:[#allocation10 + $0x34] ss:$8 sps:$4 sm:$0xff]   ;;  %v3169_v10 = vld [vmem:[#allocation10 + $0x30] ss:$8 sps:$4 sm:$0xff]   ;;  %v3170_v11 = vld [vmem:[#allocation10 + $0x44] ss:$8 sps:$4 sm:$0xff]  }
 0x15e   : > { %v3183_v12 = vld [vmem:[#allocation13 + $0x4] ss:$8 sps:$4 sm:$0xff]   ;;  %v3185_v13 = vld [vmem:[#allocation13] ss:$8 sps:$4 sm:$0xff]   ;;  %v3186_v14 = vld [vmem:[#allocation13 + $0x14] ss:$8 sps:$4 sm:$0xff]  }
 0x15f   : > { %1366 = vmatprep.subr.bf16.mxu1 %v3183_v12  ;;  %v3172_v15 = vld [vmem:[#allocation10 + $0x40] ss:$8 sps:$4 sm:$0xff]   ;;  %v3188_v16 = vld [vmem:[#allocation13 + $0x10] ss:$8 sps:$4 sm:$0xff]   ;;  %v3173_v17 = vld [vmem:[#allocation10 + $0x54] ss:$8 sps:$4 sm:$0xff]  }
 0x160   : > { %793 = vmatpush1.bf16.msra.mxu0 %v3166_v8  ;;  %1367 = vmatpush1.bf16.msra.mxu1 %v3185_v13  ;;  %v3189_v18 = vld [vmem:[#allocation13 + $0x24] ss:$8 sps:$4 sm:$0xff]   ;;  %v3175_v19 = vld [vmem:[#allocation10 + $0x50] ss:$8 sps:$4 sm:$0xff]   ;;  %v3191_v20 = vld [vmem:[#allocation13 + $0x20] ss:$8 sps:$4 sm:$0xff]  }
 0x161   : > { %794 = vmatprep.subr.bf16.mxu0 %v3167_v9  ;;  %1368 = vmatprep.subr.bf16.mxu1 %v3186_v14  ;;  %v3176_v21 = vld [vmem:[#allocation10 + $0x64] ss:$8 sps:$4 sm:$0xff]   ;;  %v3192_v22 = vld [vmem:[#allocation13 + $0x34] ss:$8 sps:$4 sm:$0xff]   ;;  %v3178_v23 = vld [vmem:[#allocation10 + $0x60] ss:$8 sps:$4 sm:$0xff]  }
 0x162   : > { %v3179_v24 = vld [vmem:[#allocation10 + $0x74] ss:$8 sps:$4 sm:$0xff]   ;;  %v3194_v25 = vld [vmem:[#allocation13 + $0x30] ss:$8 sps:$4 sm:$0xff]   ;;  %v3195_v26 = vld [vmem:[#allocation13 + $0x44] ss:$8 sps:$4 sm:$0xff]  }
 0x163   : > { %v3181_v27 = vld [vmem:[#allocation10 + $0x70] ss:$8 sps:$4 sm:$0xff]   ;;  %v3197_v28 = vld [vmem:[#allocation13 + $0x40] ss:$8 sps:$4 sm:$0xff]   ;;  %v3198_v29 = vld [vmem:[#allocation13 + $0x54] ss:$8 sps:$4 sm:$0xff]  }
 0x164   : > { %795 = vmatpush1.bf16.msra.mxu0 %v3169_v10  ;;  %1369 = vmatpush1.bf16.msra.mxu1 %v3188_v16  ;;  %v3204_v30 = vld [vmem:[#allocation12 + $0x40] sm:$0xff]   ;;  %v3182_v31 = vld [vmem:[%s4205_s5] sm:$0xff]   ;;  %v3219_v43 = vld [vmem:[#allocation12 + $0x58] sm:$0xff]   ;;  %vm977_vm2 = vsmask.f32 7424  ;;  %s4453_s30 = sld [smem:[#allocation39_spill]] }
 0x165   : > { %796 = vmatprep.subr.bf16.mxu0 %v3170_v11  ;;  %1370 = vmatprep.subr.bf16.mxu1 %v3189_v18  ;;  %v3200_v32 = vld [vmem:[#allocation13 + $0x50] ss:$8 sps:$4 sm:$0xff]   ;;  %v3201_v33 = vld [vmem:[#allocation13 + $0x64] ss:$8 sps:$4 sm:$0xff]   ;;  %v3203_v36 = vld [vmem:[#allocation13 + $0x60] ss:$8 sps:$4 sm:$0xff]  }
 0x166   : > { %v3205_v34 = vld [vmem:[#allocation12] sm:$0xff]   ;;  %v3209_v35 = vld [vmem:[#allocation12 + $0x48] sm:$0xff]   ;;  %v3206_v38 = vld [vmem:[#allocation13 + $0x74] ss:$8 sps:$4 sm:$0xff]   ;;  %vm1696_vm3 = vcmask 1046528   ;;  %s4454_s21 = sld [smem:[#allocation42_spill]] }
 0x167   : > { %v3210_v37 = vld [vmem:[#allocation12 + $0x8] sm:$0xff]   ;;  %v3214_v39 = vld [vmem:[#allocation12 + $0x50] sm:$0xff]   ;;  %v3220_v45 = vld [vmem:[#allocation12 + $0x18] sm:$0xff]   ;;  %vm1872_vm4 = vcmask 1040384   ;;  %s4455_s25 = sld [smem:[#allocation44_spill]]  ;;  %s2719_s1 = sshll.u32 %s4201_s16, 5 }
 0x168   : > { %797 = vmatpush1.bf16.msra.mxu0 %v3172_v15  ;;  %1371 = vmatpush1.bf16.msra.mxu1 %v3191_v20  ;;  %v3208_v40 = vld [vmem:[#allocation13 + $0x70] ss:$8 sps:$4 sm:$0xff]   ;;  %v3211_v42 = vld [vmem:[#allocation13 + $0x84] ss:$8 sps:$4 sm:$0xff]   ;;  %v3213_v44 = vld [vmem:[#allocation13 + $0x80] ss:$8 sps:$4 sm:$0xff]  }
 0x169   : > { %798 = vmatprep.subr.bf16.mxu0 %v3173_v17  ;;  %1372 = vmatprep.subr.bf16.mxu1 %v3192_v22  ;;  %v3215_v41 = vld [vmem:[#allocation12 + $0x10] sm:$0xff]   ;;  %v3221_v48 = vld [vmem:[#allocation13 + $0xa4] ss:$8 sps:$4 sm:$0xff]   ;;  %v3232_v6 = vld [vmem:[#allocation13 + $0xc0] ss:$8 sps:$4 sm:$0xff]   ;;  %s4297_s9 = scalar_lea.vmem [#allocation21], %s2719_s1 }
 0x16a   : > { %v3216_v46 = vld [vmem:[#allocation13 + $0x94] ss:$8 sps:$4 sm:$0xff]   ;;  %v3218_v47 = vld [vmem:[#allocation13 + $0x90] ss:$8 sps:$4 sm:$0xff]   ;;  %v933_v49 = vld [vmem:[#allocation13 + $0xa0] sm:$0xff]  ;;  %vm2473_vm5 = vcmask 1045504  }
 0x16b   : > { %v934_v50 = vld [vmem:[#allocation13 + $0xa8] sm:$0xff]  ;;  %v3223_v52 = vld [vmem:[#allocation12 + $0x60] sm:$0xff]   ;;  %v3225_v54 = vld [vmem:[#allocation13 + $0xb4] ss:$8 sps:$4 sm:$0xff]   ;;  %s2505_s4 = sshll.u32 %s4297_s9, 4  ;;  %s4456_s19 = sld [smem:[#allocation35_spill]]  ;;  %s4306_s4 = int_to_ptr.vmem [resolvable:$true] %s2505_s4 }
 0x16c   : > { %799 = vmatpush1.bf16.msra.mxu0 %v3175_v19  ;;  %1373 = vmatpush1.bf16.msra.mxu1 %v3194_v25  ;;  %v2757_v51 = vcombine.low %v933_v49, %v934_v50  ;;  %v3224_v53 = vld [vmem:[#allocation12 + $0x20] sm:$0xff]   ;;  %v831_v55 = vld [vmem:[%s4213_s17] sm:$0xff]  ;;  %v3233_v7 = vld [vmem:[#allocation12 + $0x70] sm:$0xff]   ;;  %s2900_s29 = sshll.u32 %s4444_s24, 9  ;;  %s4457_s6 = sld [smem:[#allocation45_spill]] }
 0x16d   : > { %800 = vmatprep.subr.bf16.mxu0 %v3176_v21  ;;  %1374 = vmatprep.subr.bf16.mxu1 %v3195_v26  ;;  %v832_v56 = vld [vmem:[%s4213_s17 + $0x8] sm:$0xff]  ;;  %v833_v58 = vunpack.c.l.bf16 %v831_v55  ;;  %v3228_v59 = vld [vmem:[#allocation12 + $0x68] sm:$0xff]   ;;  %v834_v60 = vunpack.c.h.bf16 %v831_v55  ;;  %v3238_v11 = vld [vmem:[#allocation12 + $0x78] sm:$0xff]   ;;  %s2491_s12 = scalar_lea.sflag [#allocation6], %s4201_s16  ;;  %s3660_s17 = scalar_lea.vmem %s4306_s4, 512 }
 0x16e   : > { %v3227_v57 = vld [vmem:[#allocation13 + $0xb0] ss:$8 sps:$4 sm:$0xff]   ;;  %v836_v61 = vunpack.c.h.bf16 %v832_v56  ;;  %v835_v62 = vunpack.c.l.bf16 %v832_v56  ;;  %v3229_v63 = vld [vmem:[#allocation12 + $0x28] sm:$0xff]   ;;  %v3235_v9 = vld [vmem:[#allocation13 + $0xd4] ss:$8 sps:$4 sm:$0xff]   ;;  %p3661_p7 = scmp.ne.s32.totalorder %s4306_s4, %s3660_s17  ;;  %s3766_s24 = smov [#allocation21]  }
 0x16f   : > { %v843_v1 = vrot.slane %v833_v58, 7  ;;  %v3230_v2 = vld [vmem:[#allocation13 + $0xc4] ss:$8 sps:$4 sm:$0xff]   ;;  %v853_v3 = vrot.slane %v834_v60, 7  ;;  %v3234_v8 = vld [vmem:[#allocation12 + $0x30] sm:$0xff]   ;;  %v3239_v13 = vld [vmem:[#allocation12 + $0x38] sm:$0xff]  }
 0x170   : > { %801 = vmatpush1.bf16.msra.mxu0 %v3178_v23  ;;  %1375 = vmatpush1.bf16.msra.mxu1 %v3197_v28  ;;  %v873_v4 = vrot.slane %v836_v61, 5  ;;  %v863_v5 = vrot.slane %v835_v62, 5  ;;  %v3237_v10 = vld [vmem:[#allocation13 + $0xd0] ss:$8 sps:$4 sm:$0xff]   ;;  %v3240_v12 = vld [vmem:[#allocation13 + $0xe4] ss:$8 sps:$4 sm:$0xff]  }
 0x171   : > { %802 = vmatprep.subr.bf16.mxu0 %v3179_v24  ;;  %1376 = vmatprep.subr.bf16.mxu1 %v3198_v29  ;;  %845 = vst [vmem:[#allocation2 + $0x8] sm:$0xfe] %v843_v1  ;;  %846 = vst [vmem:[#allocation2 + $0x28] sm:$0x1] %v843_v1  ;;  %v3243_v14 = vld [vmem:[#allocation15 + $0x40] sm:$0xff]   ;;  %p4458_p10 = scmp.ne.s32.totalorder %s4456_s19, 0 }
 0x172   : > { %855 = vst [vmem:[#allocation2 + $0x18] sm:$0xfe] %v853_v3  ;;  %856 = vst [vmem:[#allocation2 + $0x38] sm:$0x1] %v853_v3  ;;  %v3242_v15 = vld [vmem:[#allocation13 + $0xe0] ss:$8 sps:$4 sm:$0xff]   ;;  %s4311_s18 = scalar_lea.hbm %s4457_s6, %s2900_s29 }
 0x173   : > { %875 = vst [vmem:[#allocation2 + $0x38] sm:$0xf8] %v873_v4  ;;  %876 = vst [vmem:[#allocation2 + $0x58] sm:$0x7] %v873_v4  ;;  %v3245_v24 = vld [vmem:[#allocation13 + $0xf4] ss:$8 sps:$4 sm:$0xff]   ;;  %p3662_p9 = pnand %p3661_p7, %p4458_p10 }
 0x174   : > { %803 = vmatpush1.bf16.msra.mxu0 %v3181_v27  ;;  %1377 = vmatpush1.bf16.msra.mxu1 %v3200_v32  ;;  %865 = vst [vmem:[#allocation2 + $0x28] sm:$0xf8] %v863_v5  ;;  %866 = vst [vmem:[#allocation2 + $0x48] sm:$0x7] %v863_v5  ;;  %v3247_v26 = vld [vmem:[#allocation13 + $0xf0] ss:$8 sps:$4 sm:$0xff]  }
 0x175   : > { %2901 = vmatprep.subr.bf16.mxu0 %v3204_v30  ;;  %1378 = vmatprep.subr.bf16.mxu1 %v3201_v33  ;;  %v3252_v32 = vld [vmem:[#allocation13 + $0x104] ss:$8 sps:$4 sm:$0xff]   ;;  %p3663_p4 = pneg %p3662_p9  ;;  %s3664_s13 = sshll.u32 %s3766_s24, 4  ;;  %s3665_s13 = int_to_ptr.vmem [resolvable:$false] %s3664_s13 }
 0x176   : > { %v3244_v55 = vld [vmem:[#allocation15] sm:$0xff]   ;;  %p3667_p6 = scmp.lt.s32.totalorder %s4306_s4, %s3665_s13 }
 0x177   : > { %821 = vmatmul.mubr.bf16.vlgmr.msra.gmra.mrb[0].mxu0 %v3182_v31 }
 0x178   : > { %2902 = vmatpush3.bf16.msra.mxu0 %v3205_v34  ;;  %1379 = vmatpush1.bf16.msra.mxu1 %v3203_v36  ;;  %v878_v19 = vld [vmem:[#allocation2 + $0x8] sm:$0xfe]  ;;  %v693_v36 = vshrl.u32 %v644_v0, 7 }
 0x179   : > { %2903 = vmatprep.subr.bf16.mxu0 %v3209_v35  ;;  %1380 = vmatprep.subr.bf16.mxu1 %v3206_v38  ;;  %v898_v17 = vld [vmem:[#allocation2 + $0x18] sm:$0xff]  ;;  %v690_v38 = vld [vmem:[%s4453_s30] sm:$0x3]  ;;  %v906_v56 = vld [vmem:[#allocation2 + $0x8] sm:$0xfc] }
 0x17a   : > { %v884_v16 = vld [vmem:[#allocation2 + $0x38] sm:$0xff] }
 0x17b   : > { %v902_v18 = vpack.c.bf16 %v884_v16, %v898_v17  ;;  %v4243_v20 = vld [vmem:[#allocation2 + $0x28] sm:$0xff]  ;;  %v888_v4 = vld [vmem:[#allocation2 + $0x58] sm:$0x7] }
 0x17c   : > { %2904 = vmatpush3.bf16.msra.mxu0 %v3210_v37  ;;  %1381 = vmatpush1.bf16.msra.mxu1 %v3208_v40  ;;  %v886_v21 = vld [vmem:[#allocation2 + $0x48] sm:$0x7]  ;;  %v890_v22 = vpack.c.bf16 %v4243_v20, %v878_v19  ;;  %v694_v37 = vsub.s32 0, %v693_v36 }
 0x17d   : > { %2905 = vmatprep.subr.bf16.mxu0 %v3214_v39  ;;  %1382 = vmatprep.subr.bf16.mxu1 %v3211_v42  ;;  %v894_v23 = vpack.c.bf16 %v886_v21, %v886_v21  ;;  %v698_v39 = vsub.s32 1, %v693_v36  ;;  %v3250_v19 = vld [vmem:[#allocation13 + $0x100] ss:$8 sps:$4 sm:$0xff]  }
 0x17e   : > { %1628 = vmatprep.mubr.bf16.mxu0 %v902_v18  ;;  %v993_v25 = vshll.u32 %v890_v22, 16  ;;  %v991_v27 = vshrl.u32 %v890_v22, 16  ;;  %v695_v40 = vrot.slane %v690_v38, %v694_v37  ;;  %v3259_v37 = vld [vmem:[#allocation15 + $0x18] sm:$0xff]  }
 0x17f   : > { %v998_v28 = vshll.u32 %v894_v23, 16  ;;  %v1029_v34 = vshrl.u32 %v894_v23, 16 }
 0x180   : > { %2906 = vmatpush3.bf16.msra.mxu0 %v3215_v41  ;;  %1383 = vmatpush1.bf16.msra.mxu1 %v3213_v44  ;;  %v995_v29 = vrot.slane %v993_v25, 1  ;;  %v699_v41 = vrot.slane %v690_v38, %v698_v39  ;;  %v3263_v39 = vld [vmem:[#allocation15 + $0x60] sm:$0xff]  }
 0x181   : > { %2907 = vmatprep.subr.bf16.mxu0 %v3219_v43  ;;  %1384 = vmatprep.subr.bf16.mxu1 %v3216_v46  ;;  %v1000_v30 = vrot.slane %v998_v28, 1  ;;  %v3254_v28 = vld [vmem:[#allocation15 + $0x10] sm:$0xff]  }
 0x182   : > { %v996_v31 = vor.u32 %v995_v29, %v991_v27 }
 0x183   : > { %v4247_v35 = vor.u32 %v1029_v34, %v1000_v30 }
 0x184   : > { %2908 = vmatpush3.bf16.msra.mxu0 %v3220_v45  ;;  %1385 = vmatpush1.bf16.msra.mxu1 %v3218_v47  ;;  %v1001_v33 = vsel %vm977_vm2, %v996_v31, %v1000_v30  ;;  %v3258_v30 = vld [vmem:[#allocation15 + $0x58] sm:$0xff]  }
 0x185   : > { %1386 = vmatprep.subr.bf16.mxu1 %v3221_v48  ;;  %2909 = vmatprep.subr.bf16.mxu0 %v3223_v52 }
 0x186   : > { %1398 = vmatprep.mubr.bf16.mxu1 %v1001_v33  ;;  %v3262_v33 = vld [vmem:[#allocation13 + $0x124] ss:$8 sps:$4 sm:$0xff]  }
 0x188   : > { %1387 = vmatpush1.bf16.msra.mxu1 %v2757_v51  ;;  %2910 = vmatpush3.bf16.msra.mxu0 %v3224_v53  ;;  %v880_v53 = vld [vmem:[#allocation2 + $0x18] sm:$0xfe] }
 0x189   : > { %1388 = vmatprep.subr.bf16.mxu1 %v3225_v54  ;;  %2911 = vmatprep.subr.bf16.mxu0 %v3228_v59  ;;  %v900_v54 = vld [vmem:[#allocation2 + $0x58] sm:$0x3]  ;;  %v892_v58 = vpack.c.bf16 %v884_v16, %v880_v53 }
 0x18a   : > { %v904_v3 = vpack.c.bf16 %v900_v54, %v900_v54  ;;  %v3253_v16 = vld [vmem:[#allocation15 + $0x50] sm:$0xff]  }
 0x18b   : > { %v1015_v23 = vshrl.u32 %v892_v58, 16  ;;  %v3275_v54 = vld [vmem:[#allocation13 + $0x150] ss:$8 sps:$4 sm:$0xff]  }
 0x18c   : > { %1389 = vmatpush1.bf16.msra.mxu1 %v3227_v57  ;;  %2912 = vmatpush3.bf16.msra.mxu0 %v3229_v63  ;;  %v908_v57 = vld [vmem:[#allocation2 + $0x48] sm:$0xf] }
 0x18d   : > { %1390 = vmatprep.subr.bf16.mxu1 %v3230_v2  ;;  %2913 = vmatprep.subr.bf16.mxu0 %v3233_v7  ;;  %v910_v7 = vpack.c.bf16 %v4243_v20, %v906_v56 }
 0x18f   : > { %v1700_v17 = vrot.slane %v910_v7, 1  ;;  %v3294_v7 = vld [vmem:[#allocation13 + $0x1a4] ss:$8 sps:$4 sm:$0xff]  }
 0x190   : > { %1391 = vmatpush1.bf16.msra.mxu1 %v3232_v6  ;;  %2914 = vmatpush3.bf16.msra.mxu0 %v3234_v8  ;;  %v3248_v6 = vld [vmem:[#allocation15 + $0x48] sm:$0xff]   ;;  %v912_v8 = vpack.c.bf16 %v908_v57, %v908_v57 }
 0x191   : > { %1392 = vmatprep.subr.bf16.mxu1 %v3235_v9  ;;  %2915 = vmatprep.subr.bf16.mxu0 %v3238_v11  ;;  %v1017_v11 = vshll.u32 %v892_v58, 16  ;;  %v3282_v57 = vld [vmem:[#allocation13 + $0x164] ss:$8 sps:$4 sm:$0xff]   ;;  %v3279_v58 = vld [vmem:[#allocation15 + $0x38] sm:$0xff]  }
 0x192   : > { %v4262_v18 = vrot.slane %v912_v8, 1  ;;  %v3292_v8 = vld [vmem:[#allocation13 + $0x1a0] ss:$8 sps:$4 sm:$0xff]  }
 0x193   : > { %v1019_v25 = vrot.slane %v1017_v11, 1  ;;  %v3300_v11 = vld [vmem:[#allocation13 + $0x1c4] ss:$8 sps:$4 sm:$0xff]  }
 0x194   : > { %1393 = vmatpush1.bf16.msra.mxu1 %v3237_v10  ;;  %2916 = vmatpush3.bf16.msra.mxu0 %v3239_v13  ;;  %v3249_v13 = vld [vmem:[#allocation15 + $0x8] sm:$0xff]   ;;  %v1702_v31 = vsel %vm1696_vm3, %v1700_v17, %v4262_v18  ;;  %v3301_v17 = vld [vmem:[#allocation13 + $0x1d0] ss:$8 sps:$4 sm:$0xff]  }
 0x195   : > { %1394 = vmatprep.subr.bf16.mxu1 %v3240_v12  ;;  %2929 = vmatprep.subr.bf16.mxu0 %v3243_v14  ;;  %v4260_v12 = vpack.c.bf16 %v888_v4, %v888_v4  ;;  %v1020_v34 = vor.u32 %v1019_v25, %v1015_v23  ;;  %v3286_v4 = vld [vmem:[#allocation13 + $0x180] ss:$8 sps:$4 sm:$0xff]   ;;  %v3309_v23 = vld [vmem:[#allocation13 + $0x1f4] ss:$8 sps:$4 sm:$0xff]  }
 0x198   : > { %1395 = vmatpush1.bf16.msra.mxu1 %v3242_v15 }
 0x199   : > { %1396 = vmatprep.subr.bf16.mxu1 %v3245_v24  ;;  %v3257_v24 = vld [vmem:[#allocation13 + $0x114] ss:$8 sps:$4 sm:$0xff]  }
 0x19c   : > { %1397 = vmatpush1.bf16.msra.mxu1 %v3247_v26  ;;  %v1022_v26 = vshll.u32 %v4260_v12, 16 }
 0x19d   : > { %1417 = vmatprep.subr.bf16.mxu1 %v3252_v32  ;;  %v3255_v32 = vld [vmem:[#allocation13 + $0x110] ss:$8 sps:$4 sm:$0xff]  }
 0x19e   : > { %v4269_v36 = vrot.slane %v1022_v26, 1  ;;  %v3307_v26 = vld [vmem:[#allocation13 + $0x1f0] ss:$8 sps:$4 sm:$0xff]  }
 0x24a   : > { %v822_v42 = vpop.f32.mrb[0].mxu0 }
 0x24b   : > { %v823_v43 = vadd.f32 %v822_v42, %v695_v40  ;;  %v824_v44 = vpop.f32.mrb[1].mxu0  ;;  %v3267_v42 = vld [vmem:[#allocation13 + $0x134] ss:$8 sps:$4 sm:$0xff]  }
 0x24c   : > { %v825_v45 = vadd.f32 %v824_v44, %v699_v41  ;;  %v826_v46 = vpop.f32.mrb[2].mxu0  ;;  %v3268_v44 = vld [vmem:[#allocation15 + $0x68] sm:$0xff]  }
 0x24d   : > { %v838_v47 = vrot.slane %v823_v43, 7  ;;  %v827_v48 = vadd.f32 %v826_v46, %v695_v40  ;;  %v828_v49 = vpop.f32.mrb[3].mxu0  ;;  %v3260_v40 = vld [vmem:[#allocation13 + $0x120] ss:$8 sps:$4 sm:$0xff]   ;;  %v3272_v46 = vld [vmem:[#allocation13 + $0x144] ss:$8 sps:$4 sm:$0xff]  }
 0x24e   : > { %v848_v50 = vrot.slane %v825_v45, 7  ;;  %v829_v51 = vadd.f32 %v828_v49, %v699_v41  ;;  %v3264_v43 = vld [vmem:[#allocation15 + $0x20] sm:$0xff]   ;;  %v3265_v45 = vld [vmem:[#allocation13 + $0x130] ss:$8 sps:$4 sm:$0xff]  }
 0x24f   : > { %840 = vst [vmem:[#allocation2] sm:$0xfe] %v838_v47  ;;  %841 = vst [vmem:[#allocation2 + $0x20] sm:$0x1] %v838_v47  ;;  %v858_v0 = vrot.slane %v827_v48, 5  ;;  %v3269_v47 = vld [vmem:[#allocation15 + $0x28] sm:$0xff]  }
 0x250   : > { %850 = vst [vmem:[#allocation2 + $0x10] sm:$0xfe] %v848_v50  ;;  %851 = vst [vmem:[#allocation2 + $0x30] sm:$0x1] %v848_v50  ;;  %v868_v52 = vrot.slane %v829_v51, 5  ;;  %v3273_v48 = vld [vmem:[#allocation15 + $0x70] sm:$0xff]  }
 0x251   : > { %860 = vst [vmem:[#allocation2 + $0x20] sm:$0xf8] %v858_v0  ;;  %861 = vst [vmem:[#allocation2 + $0x40] sm:$0x7] %v858_v0  ;;  %v3270_v49 = vld [vmem:[#allocation13 + $0x140] ss:$8 sps:$4 sm:$0xff]  }
 0x252   : > { %870 = vst [vmem:[#allocation2 + $0x30] sm:$0xf8] %v868_v52  ;;  %871 = vst [vmem:[#allocation2 + $0x50] sm:$0x7] %v868_v52  ;;  %v3277_v50 = vld [vmem:[#allocation13 + $0x154] ss:$8 sps:$4 sm:$0xff]  }
 0x253   : > { %v3274_v0 = vld [vmem:[#allocation15 + $0x30] sm:$0xff]   ;;  %v3278_v52 = vld [vmem:[#allocation15 + $0x78] sm:$0xff]  }
 0x256   : > { %v877_v59 = vld [vmem:[#allocation2] sm:$0xfe] }
 0x257   : > { %v897_v63 = vld [vmem:[#allocation2 + $0x10] sm:$0xff]  ;;  %v905_v53 = vld [vmem:[#allocation2] sm:$0xfc] }
 0x258   : > { %v4253_v60 = vld [vmem:[#allocation2 + $0x20] sm:$0xff] }
 0x259   : > { %v885_v61 = vld [vmem:[#allocation2 + $0x40] sm:$0x7]  ;;  %v4255_v62 = vld [vmem:[#allocation2 + $0x30] sm:$0xff]  ;;  %v889_v1 = vpack.c.bf16 %v4253_v60, %v877_v59 }
 0x25a   : > { %v893_v2 = vpack.c.bf16 %v885_v61, %v885_v61  ;;  %v901_v5 = vpack.c.bf16 %v4255_v62, %v897_v63  ;;  %v899_v22 = vld [vmem:[#allocation2 + $0x50] sm:$0x3]  ;;  %v907_v51 = vld [vmem:[#allocation2 + $0x40] sm:$0xf] }
 0x25b   : > { %v981_v9 = vshll.u32 %v889_v1, 16  ;;  %v979_v14 = vshrl.u32 %v889_v1, 16  ;;  %v903_v29 = vpack.c.bf16 %v899_v22, %v899_v22  ;;  %v911_v56 = vpack.c.bf16 %v907_v51, %v907_v51  ;;  %v3280_v59 = vld [vmem:[#allocation13 + $0x160] ss:$8 sps:$4 sm:$0xff]   ;;  %v3285_v1 = vld [vmem:[#allocation13 + $0x174] ss:$8 sps:$4 sm:$0xff]  }
 0x25c   : > { %v986_v10 = vshll.u32 %v893_v2, 16  ;;  %1629 = vmatmul.mubr.bf16.vlgmr.msra.gmra.mrb[4].mxu0 %v901_v5  ;;  %v1026_v38 = vshrl.u32 %v893_v2, 16  ;;  %v3291_v5 = vld [vmem:[#allocation13 + $0x194] ss:$8 sps:$4 sm:$0xff]   ;;  %v3338_v51 = vld [vmem:[#allocation18 + $0x84] ss:$8 sps:$4 sm:$0xff]  }
 0x25d   : > { %2930 = vmatpush3.bf16.msra.mxu0 %v3244_v55  ;;  %v983_v15 = vrot.slane %v981_v9, 1  ;;  %1636 = vmatprep.mubr.bf16.mxu0 %v904_v3  ;;  %v909_v55 = vpack.c.bf16 %v4253_v60, %v905_v53  ;;  %v1698_v63 = vrot.slane %v911_v56, 1  ;;  %v3283_v3 = vld [vmem:[#allocation13 + $0x170] ss:$8 sps:$4 sm:$0xff]   ;;  %v3288_v60 = vld [vmem:[#allocation13 + $0x184] ss:$8 sps:$4 sm:$0xff]  }
 0x25e   : > { %2931 = vmatprep.subr.bf16.mxu0 %v3248_v6  ;;  %v988_v20 = vrot.slane %v986_v10, 1  ;;  %v3289_v6 = vld [vmem:[#allocation13 + $0x190] ss:$8 sps:$4 sm:$0xff]   ;;  %v3297_v9 = vld [vmem:[#allocation13 + $0x1b4] ss:$8 sps:$4 sm:$0xff]  }
 0x25f   : > { %v984_v21 = vor.u32 %v983_v15, %v979_v14  ;;  %v1697_v61 = vrot.slane %v909_v55, 1  ;;  %v3295_v10 = vld [vmem:[#allocation13 + $0x1b0] ss:$8 sps:$4 sm:$0xff]   ;;  %v879_v14 = vld [vmem:[#allocation2 + $0x10] sm:$0xfe] }
 0x260   : > { %v1028_v41 = vor.u32 %v1026_v38, %v988_v20  ;;  %v3303_v15 = vld [vmem:[#allocation13 + $0x1d4] ss:$8 sps:$4 sm:$0xff]   ;;  %v3313_v38 = vld [vmem:[#allocation18 + $0x10] ss:$8 sps:$4 sm:$0xff]   ;;  %v3346_v56 = vld [vmem:[#allocation18 + $0xa4] ss:$8 sps:$4 sm:$0xff]  }
 0x261   : > { %2932 = vmatpush3.bf16.msra.mxu0 %v3249_v13  ;;  %v989_v27 = vsel %vm977_vm2, %v984_v21, %v988_v20  ;;  %v1699_v2 = vsel %vm1696_vm3, %v1697_v61, %v1698_v63  ;;  %v3298_v13 = vld [vmem:[#allocation13 + $0x1c0] ss:$8 sps:$4 sm:$0xff]   ;;  %v3342_v53 = vld [vmem:[#allocation18 + $0x94] ss:$8 sps:$4 sm:$0xff]   ;;  %v3348_v61 = vld [vmem:[#allocation18 + $0xb0] ss:$8 sps:$4 sm:$0xff]  }
 0x262   : > { %1399 = vmatmul.mubr.bf16.vlgmr.msra.gmra.mrb[0].mxu1 %v989_v27  ;;  %2933 = vmatprep.subr.bf16.mxu0 %v3253_v16  ;;  %v891_v16 = vpack.c.bf16 %v4255_v62, %v879_v14  ;;  %v3304_v20 = vld [vmem:[#allocation13 + $0x1e0] ss:$8 sps:$4 sm:$0xff]   ;;  %v3343_v55 = vld [vmem:[#allocation16 + $0x18] sm:$0xff]  }
 0x263   : > { %1418 = vmatpush1.bf16.msra.mxu1 %v3250_v19  ;;  %1408 = vmatprep.mubr.bf16.mxu1 %v4247_v35  ;;  %v1025_v35 = vsel %vm977_vm2, %v1020_v34, %v4269_v36  ;;  %v887_v19 = vld [vmem:[#allocation2 + $0x50] sm:$0x7]  ;;  %v3312_v34 = vld [vmem:[#allocation18 + $0x4] ss:$8 sps:$4 sm:$0xff]  }
 0x264   : > { %1637 = vmatmul.mubr.bf16.gmra.mrb[8].mxu0 %v903_v29  ;;  %1419 = vmatprep.subr.bf16.mxu1 %v3257_v24  ;;  %v1005_v21 = vshll.u32 %v891_v16, 16  ;;  %v895_v22 = vpack.c.bf16 %v887_v19, %v887_v19  ;;  %v1003_v25 = vshrl.u32 %v891_v16, 16 }
 0x265   : > { %2934 = vmatpush3.bf16.msra.mxu0 %v3254_v28  ;;  %1835 = vmatprep.mubr.bf16.mxu0 %v1702_v31  ;;  %v1035_v28 = vshrl.u32 %v4260_v12, 16  ;;  %v3318_v12 = vld [vmem:[#allocation18 + $0x24] ss:$8 sps:$4 sm:$0xff]  }
 0x266   : > { %2935 = vmatprep.subr.bf16.mxu0 %v3258_v30  ;;  %v1007_v24 = vrot.slane %v1005_v21, 1  ;;  %v1010_v27 = vshll.u32 %v895_v22, 16 }
 0x267   : > { %1420 = vmatpush1.bf16.msra.mxu1 %v3255_v32  ;;  %v1037_v30 = vor.u32 %v1035_v28, %v4269_v36  ;;  %v1032_v32 = vshrl.u32 %v895_v22, 16  ;;  %v3321_v36 = vld [vmem:[#allocation18 + $0x34] ss:$8 sps:$4 sm:$0xff]  }
 0x268   : > { %1421 = vmatprep.subr.bf16.mxu1 %v3262_v33  ;;  %v1008_v62 = vor.u32 %v1007_v24, %v1003_v25  ;;  %v1012_v29 = vrot.slane %v1010_v27, 1 }
 0x269   : > { %2936 = vmatpush3.bf16.msra.mxu0 %v3259_v37  ;;  %v3310_v37 = vld [vmem:[#allocation18] ss:$8 sps:$4 sm:$0xff]  }
 0x26a   : > { %1409 = vmatmul.mubr.bf16.gmra.mrb[4].mxu1 %v1028_v41  ;;  %2937 = vmatprep.subr.bf16.mxu0 %v3263_v39  ;;  %v1013_v31 = vsel %vm977_vm2, %v1008_v62, %v1012_v29  ;;  %v1034_v33 = vor.u32 %v1032_v32, %v1012_v29  ;;  %v3315_v39 = vld [vmem:[#allocation18 + $0x14] ss:$8 sps:$4 sm:$0xff]   ;;  %v3331_v41 = vld [vmem:[#allocation16] sm:$0xff]  }
 0x26b   : > { %1422 = vmatpush1.bf16.msra.mxu1 %v3260_v40  ;;  %1449 = vmatprep.mubr.bf16.mxu1 %v1025_v35  ;;  %v3316_v40 = vld [vmem:[#allocation18 + $0x20] ss:$8 sps:$4 sm:$0xff]   ;;  %v3324_v35 = vld [vmem:[#allocation18 + $0x44] ss:$8 sps:$4 sm:$0xff]  }
 0x26c   : > { %1423 = vmatprep.subr.bf16.mxu1 %v3267_v42  ;;  %v3319_v42 = vld [vmem:[#allocation18 + $0x30] ss:$8 sps:$4 sm:$0xff]  }
 0x26d   : > { %2938 = vmatpush3.bf16.msra.mxu0 %v3264_v43  ;;  %v3322_v43 = vld [vmem:[#allocation18 + $0x40] ss:$8 sps:$4 sm:$0xff]  }
 0x26e   : > { %2939 = vmatprep.subr.bf16.mxu0 %v3268_v44  ;;  %v3327_v44 = vld [vmem:[#allocation18 + $0x54] ss:$8 sps:$4 sm:$0xff]  }
 0x26f   : > { %1424 = vmatpush1.bf16.msra.mxu1 %v3265_v45  ;;  %v3325_v45 = vld [vmem:[#allocation18 + $0x50] ss:$8 sps:$4 sm:$0xff]  }
 0x270   : > { %1425 = vmatprep.subr.bf16.mxu1 %v3272_v46  ;;  %v3330_v46 = vld [vmem:[#allocation18 + $0x64] ss:$8 sps:$4 sm:$0xff]  }
 0x271   : > { %2940 = vmatpush3.bf16.msra.mxu0 %v3269_v47  ;;  %v3328_v47 = vld [vmem:[#allocation18 + $0x60] ss:$8 sps:$4 sm:$0xff]  }
 0x272   : > { %2941 = vmatprep.subr.bf16.mxu0 %v3273_v48  ;;  %v3334_v48 = vld [vmem:[#allocation18 + $0x74] ss:$8 sps:$4 sm:$0xff]  }
 0x273   : > { %1426 = vmatpush1.bf16.msra.mxu1 %v3270_v49  ;;  %v3332_v49 = vld [vmem:[#allocation18 + $0x70] ss:$8 sps:$4 sm:$0xff]  }
 0x274   : > { %1427 = vmatprep.subr.bf16.mxu1 %v3277_v50  ;;  %v3335_v50 = vld [vmem:[#allocation16 + $0x8] sm:$0xff]  }
 0x275   : > { %2942 = vmatpush3.bf16.msra.mxu0 %v3274_v0  ;;  %v3336_v0 = vld [vmem:[#allocation18 + $0x80] ss:$8 sps:$4 sm:$0xff]  }
 0x276   : > { %2943 = vmatprep.subr.bf16.mxu0 %v3278_v52  ;;  %v3339_v52 = vld [vmem:[#allocation16 + $0x10] sm:$0xff]  }
 0x277   : > { %1428 = vmatpush1.bf16.msra.mxu1 %v3275_v54  ;;  %v3340_v54 = vld [vmem:[#allocation18 + $0x90] ss:$8 sps:$4 sm:$0xff]  }
 0x278   : > { %1429 = vmatprep.subr.bf16.mxu1 %v3282_v57  ;;  %v3344_v57 = vld [vmem:[#allocation18 + $0xa0] ss:$8 sps:$4 sm:$0xff]  }
 0x279   : > { %2944 = vmatpush3.bf16.msra.mxu0 %v3279_v58  ;;  %v3347_v58 = vld [vmem:[#allocation16 + $0x20] sm:$0xff]  }
 0x27a   : > { %2133 = vmatprep.subr.bf16.mxu0 %v3312_v34 }
 0x27b   : > { %1430 = vmatpush1.bf16.msra.mxu1 %v3280_v59  ;;  %v3350_v59 = vld [vmem:[#allocation18 + $0xb4] ss:$8 sps:$4 sm:$0xff]  }
 0x27c   : > { %1836 = vmatmul.mubr.bf16.vlgmr.msra.gmra.mrb[12].mxu0 %v1699_v2  ;;  %1431 = vmatprep.subr.bf16.mxu1 %v3285_v1  ;;  %v3354_v1 = vld [vmem:[#allocation18 + $0xc4] ss:$8 sps:$4 sm:$0xff]   ;;  %v3352_v2 = vld [vmem:[#allocation18 + $0xc0] ss:$8 sps:$4 sm:$0xff]  }
 0x27d   : > { %1843 = vmatprep.mubr.bf16.mxu0 %v4262_v18  ;;  %v3306_v18 = vld [vmem:[#allocation13 + $0x1e4] ss:$8 sps:$4 sm:$0xff]   ;;  %2134 = vmatpush1.bf16.msra.mxu0 %v3310_v37 }
 0x27e   : > { %2135 = vmatprep.subr.bf16.mxu0 %v3315_v39 }
 0x27f   : > { %1432 = vmatpush1.bf16.msra.mxu1 %v3283_v3  ;;  %v3355_v3 = vld [vmem:[#allocation16 + $0x30] sm:$0xff]  }
 0x280   : > { %1433 = vmatprep.subr.bf16.mxu1 %v3288_v60  ;;  %v3356_v60 = vld [vmem:[#allocation18 + $0xd0] ss:$8 sps:$4 sm:$0xff]  }
 0x281   : > { %2136 = vmatpush1.bf16.msra.mxu0 %v3313_v38 }
 0x282   : > { %2137 = vmatprep.subr.bf16.mxu0 %v3318_v12  ;;  %v2817_v12 = vld [vmem:[%s4454_s21] ss:$0 sm:$0xff] }
 0x283   : > { %1434 = vmatpush1.bf16.msra.mxu1 %v3286_v4  ;;  %v3358_v4 = vld [vmem:[#allocation18 + $0xd4] ss:$8 sps:$4 sm:$0xff]  }
 0x284   : > { %1844 = vmatmul.mubr.bf16.gmra.mrb[16].mxu0 %v1698_v63  ;;  %1435 = vmatprep.subr.bf16.mxu1 %v3291_v5  ;;  %v3351_v63 = vld [vmem:[#allocation16 + $0x28] sm:$0xff]   ;;  %v3359_v5 = vld [vmem:[#allocation16 + $0x38] sm:$0xff]  }
 0x285   : > { %2138 = vmatpush1.bf16.msra.mxu0 %v3316_v40 }
 0x286   : > { %2139 = vmatprep.subr.bf16.mxu0 %v3321_v36 }
 0x287   : > { %1436 = vmatpush1.bf16.msra.mxu1 %v3289_v6  ;;  %v3362_v6 = vld [vmem:[#allocation18 + $0xe4] ss:$8 sps:$4 sm:$0xff]  }
 0x288   : > { %1437 = vmatprep.subr.bf16.mxu1 %v3294_v7  ;;  %v3360_v7 = vld [vmem:[#allocation18 + $0xe0] ss:$8 sps:$4 sm:$0xff]  }
 0x289   : > { %2140 = vmatpush1.bf16.msra.mxu0 %v3319_v42 }
 0x28a   : > { %2141 = vmatprep.subr.bf16.mxu0 %v3324_v35 }
 0x28b   : > { %1438 = vmatpush1.bf16.msra.mxu1 %v3292_v8  ;;  %v3365_v8 = vld [vmem:[#allocation18 + $0xf4] ss:$8 sps:$4 sm:$0xff]  }
 0x28c   : > { %1439 = vmatprep.subr.bf16.mxu1 %v3297_v9  ;;  %v3363_v9 = vld [vmem:[#allocation18 + $0xf0] ss:$8 sps:$4 sm:$0xff]  }
 0x28d   : > { %2142 = vmatpush1.bf16.msra.mxu0 %v3322_v43 }
 0x28e   : > { %2143 = vmatprep.subr.bf16.mxu0 %v3327_v44 }
 0x28f   : > { %1440 = vmatpush1.bf16.msra.mxu1 %v3295_v10  ;;  %v4280_v10 = vld [vmem:[#allocation19] sm:$0xff]  }
 0x290   : > { %1441 = vmatprep.subr.bf16.mxu1 %v3300_v11 }
 0x291   : > { %2144 = vmatpush1.bf16.msra.mxu0 %v3325_v45 }
 0x292   : > { %2145 = vmatprep.subr.bf16.mxu0 %v3330_v46 }
 0x293   : > { %1442 = vmatpush1.bf16.msra.mxu1 %v3298_v13 }
 0x294   : > { %1443 = vmatprep.subr.bf16.mxu1 %v3303_v15 }
 0x295   : > { %2146 = vmatpush1.bf16.msra.mxu0 %v3328_v47 }
 0x296   : > { %2147 = vmatprep.subr.bf16.mxu0 %v3334_v48 }
 0x297   : > { %1444 = vmatpush1.bf16.msra.mxu1 %v3301_v17 }
 0x298   : > { %1445 = vmatprep.subr.bf16.mxu1 %v3306_v18 }
 0x299   : > { %2148 = vmatpush1.bf16.msra.mxu0 %v3332_v49 }
 0x29a   : > { %2149 = vmatprep.subr.bf16.mxu0 %v3338_v51 }
 0x29b   : > { %1446 = vmatpush1.bf16.msra.mxu1 %v3304_v20 }
 0x29c   : > { %1447 = vmatprep.subr.bf16.mxu1 %v3309_v23 }
 0x29d   : > { %2150 = vmatpush1.bf16.msra.mxu0 %v3336_v0 }
 0x29e   : > { %2151 = vmatprep.subr.bf16.mxu0 %v3342_v53 }
 0x29f   : > { %1448 = vmatpush1.bf16.msra.mxu1 %v3307_v26 }
 0x2a0   : > { %2977 = vmatprep.subr.bf16.mxu1 %v3331_v41 }
 0x2a1   : > { %2152 = vmatpush1.bf16.msra.mxu0 %v3340_v54 }
 0x2a2   : > { %1450 = vmatmul.mubr.bf16.vlgmr.msra.gmra.mrb[0].mxu1 %v1013_v31  ;;  %2153 = vmatprep.subr.bf16.mxu0 %v3346_v56 }
 0x2a3   : > { %1459 = vmatprep.mubr.bf16.mxu1 %v1037_v30  ;;  %2978 = vmatpush3.bf16.msra.mxu1 %v3331_v41 }
 0x2a4   : > { %2979 = vmatprep.subr.bf16.mxu1 %v3335_v50 }
 0x2a5   : > { %2154 = vmatpush1.bf16.msra.mxu0 %v3344_v57 }
 0x2a6   : > { %2155 = vmatprep.subr.bf16.mxu0 %v3350_v59 }
 0x2a7   : > { %2980 = vmatpush3.bf16.msra.mxu1 %v3335_v50 }
 0x2a8   : > { %2981 = vmatprep.subr.bf16.mxu1 %v3339_v52 }
 0x2a9   : > { %2156 = vmatpush1.bf16.msra.mxu0 %v3348_v61 }
 0x2aa   : > { %1460 = vmatmul.mubr.bf16.gmra.mrb[8].mxu1 %v1034_v33  ;;  %2157 = vmatprep.subr.bf16.mxu0 %v3354_v1 }
 0x2ab   : > { %2982 = vmatpush3.bf16.msra.mxu1 %v3339_v52 }
 0x2ac   : > { %2983 = vmatprep.subr.bf16.mxu1 %v3343_v55 }
 0x2ad   : > { %2158 = vmatpush1.bf16.msra.mxu0 %v3352_v2 }
 0x2ae   : > { %2159 = vmatprep.subr.bf16.mxu0 %v3358_v4 }
 0x2af   : > { %2984 = vmatpush3.bf16.msra.mxu1 %v3343_v55 }
 0x2b0   : > { %2985 = vmatprep.subr.bf16.mxu1 %v3347_v58 }
 0x2b1   : > { %2160 = vmatpush1.bf16.msra.mxu0 %v3356_v60 }
 0x2b2   : > { %2161 = vmatprep.subr.bf16.mxu0 %v3362_v6 }
 0x2b3   : > { %2986 = vmatpush3.bf16.msra.mxu1 %v3347_v58 }
 0x2b4   : > { %2987 = vmatprep.subr.bf16.mxu1 %v3351_v63 }
 0x2b5   : > { %2162 = vmatpush1.bf16.msra.mxu0 %v3360_v7 }
 0x2b6   : > { %2163 = vmatprep.subr.bf16.mxu0 %v3365_v8 }
 0x2b7   : > { %2988 = vmatpush3.bf16.msra.mxu1 %v3351_v63 }
 0x2b8   : > { %2989 = vmatprep.subr.bf16.mxu1 %v3355_v3 }
 0x2b9   : > { %2164 = vmatpush1.bf16.msra.mxu0 %v3363_v9 }
 0x2ba   : > { %2997 = vmatprep.subr.bf16.mxu0 %v4280_v10 }
 0x2bb   : > { %2990 = vmatpush3.bf16.msra.mxu1 %v3355_v3 }
 0x2bc   : > { %2991 = vmatprep.subr.bf16.mxu1 %v3359_v5 }
 0x2bf   : > { %2992 = vmatpush3.bf16.msra.mxu1 %v3359_v5 }
 0x32f   : > { %v2917_v11 = vpop.f32.mrb[4].mxu0 }
 0x330   : > { %v2918_v13 = vpop.f32.mrb[5].mxu0 }
 0x331   : > { %v2919_v14 = vadd.f32 %v2918_v13, %v2917_v11  ;;  %v2920_v15 = vpop.f32.mrb[6].mxu0 }
 0x332   : > { %v2921_v16 = vpop.f32.mrb[7].mxu0 }
 0x333   : > { %v2922_v17 = vadd.f32 %v2921_v16, %v2920_v15 }
 0x337   : > { %v2923_v18 = vpop.f32.mrb[8].mxu0 }
 0x338   : > { %v2924_v19 = vpop.f32.mrb[9].mxu0 }
 0x339   : > { %v2925_v21 = vadd.f32 %v2924_v19, %v2923_v18  ;;  %v2926_v20 = vpop.f32.mrb[10].mxu0 }
 0x33a   : > { %v2927_v22 = vpop.f32.mrb[11].mxu0 }
 0x33d   : > { %v1410_v23 = vpop.f32.mrb[4].mxu1 }
 0x33e   : > { %v1412_v24 = vpop.f32.mrb[5].mxu1 }
 0x33f   : > { %v1414_v25 = vpop.f32.mrb[6].mxu1 }
 0x340   : > { %v1415_v26 = vpop.f32.mrb[7].mxu1 }
 0x34f   : > { %v2945_v27 = vpop.f32.mrb[12].mxu0 }
 0x350   : > { %v2946_v28 = vpop.f32.mrb[13].mxu0 }
 0x351   : > { %v2947_v62 = vadd.f32 %v2946_v28, %v2945_v27  ;;  %v2948_v29 = vpop.f32.mrb[14].mxu0 }
 0x352   : > { %v2949_v30 = vpop.f32.mrb[15].mxu0 }
 0x353   : > { %v2950_v31 = vadd.f32 %v2949_v30, %v2948_v29 }
 0x357   : > { %v2951_v32 = vpop.f32.mrb[16].mxu0 }
 0x358   : > { %v2952_v33 = vpop.f32.mrb[17].mxu0 }
 0x359   : > { %v2953_v34 = vadd.f32 %v2952_v33, %v2951_v32  ;;  %v2954_v37 = vpop.f32.mrb[18].mxu0 }
 0x35a   : > { %v2955_v38 = vpop.f32.mrb[19].mxu0 }
 0x375   : > { %v1451_v39 = vpop.f32.mrb[0].mxu1 }
 0x376   : > { %v1644_v40 = vadd.f32 %v2919_v14, %v1451_v39  ;;  %v1453_v41 = vpop.f32.mrb[1].mxu1 }
 0x377   : > { %v1851_v36 = vadd.f32 %v2947_v62, %v1453_v41  ;;  %v1455_v42 = vpop.f32.mrb[2].mxu1 }
 0x378   : > { %v1654_v35 = vadd.f32 %v2817_v12, %v1644_v40  ;;  %v1645_v43 = vadd.f32 %v2922_v17, %v1455_v42  ;;  %v1457_v44 = vpop.f32.mrb[3].mxu1 }
 0x379   : > { %v1854_v45 = vadd.f32 %v2817_v12, %v1851_v36  ;;  %v1852_v46 = vadd.f32 %v2950_v31, %v1457_v44  ;;  %v3367_v36 = vld [vmem:[#allocation19 + $0x8] sm:$0xff]   ;;  %v3368_v44 = vld [vmem:[#allocation19 + $0x10] sm:$0xff]  }
 0x37a   : > { %v1657_v47 = vmax.f32 %v1654_v35, 0.0  ;;  %v1655_v48 = vadd.f32 %v2817_v12, %v1645_v43 }
 0x37b   : > { %v1857_v49 = vmax.f32 %v1854_v45, 0.0  ;;  %v1855_v50 = vadd.f32 %v2817_v12, %v1852_v46 }
 0x37c   : > { %v1861_v51 = vrot.slane %v1657_v47, 7  ;;  %v1658_v0 = vmax.f32 %v1655_v48, 0.0 }
 0x37d   : > { %v1866_v52 = vrot.slane %v1857_v49, 7  ;;  %v1858_v53 = vmax.f32 %v1855_v50, 0.0  ;;  %v1461_v54 = vpop.f32.mrb[8].mxu1  ;;  %v3369_v50 = vld [vmem:[#allocation19 + $0x18] sm:$0xff]  }
 0x37e   : > { %1863 = vst [vmem:[#allocation3] sm:$0xfe] %v1861_v51  ;;  %1864 = vst [vmem:[#allocation3 + $0x10] sm:$0x1] %v1861_v51  ;;  %v1873_v55 = vrot.slane %v1658_v0, 7  ;;  %v1462_v56 = vadd.f32 %v1461_v54, %v1410_v23  ;;  %v1463_v57 = vpop.f32.mrb[9].mxu1 }
 0x37f   : > { %1868 = vst [vmem:[#allocation3 + $0x8] sm:$0xfe] %v1866_v52  ;;  %1869 = vst [vmem:[#allocation3 + $0x18] sm:$0x1] %v1866_v52  ;;  %v1882_v58 = vrot.slane %v1858_v53, 7  ;;  %v1464_v59 = vadd.f32 %v1463_v57, %v1412_v24  ;;  %v1465_v61 = vpop.f32.mrb[10].mxu1 }
 0x380   : > { %1878 = vst [vmem:[#allocation3 + $0x10] sm:$0xf8] %v1873_v55  ;;  %v1646_v63 = vadd.f32 %v2925_v21, %v1462_v56  ;;  %v1466_v1 = vpop.f32.mrb[11].mxu1  ;;  %v3370_v0 = vld [vmem:[#allocation19 + $0x20] sm:$0xff]   ;;  %v3372_v52 = vld [vmem:[#allocation19 + $0x30] sm:$0xff]   ;;  %v3373_v53 = vld [vmem:[#allocation19 + $0x38] sm:$0xff]  }
 0x381   : > { %1887 = vst [vmem:[#allocation3 + $0x18] sm:$0xf8] %v1882_v58  ;;  %v1853_v2 = vadd.f32 %v2953_v34, %v1464_v59  ;;  %v2874_v59 = vld [vmem:[%s4455_s25] ss:$0 sm:$0xff] }
 0x382   : > { %v1656_v3 = vadd.f32 %v2817_v12, %v1646_v63 }
 0x383   : > { %v1856_v60 = vadd.f32 %v2817_v12, %v1853_v2 }
 0x384   : > { %v1659_v4 = vmax.f32 %v1656_v3, 0.0 }
 0x385   : > { %v1859_v5 = vmax.f32 %v1856_v60, 0.0  ;;  %v1889_v18 = vld [vmem:[#allocation3] sm:$0xfe] }
 0x386   : > { %v1874_v6 = vrot.slane %v1659_v4, 7  ;;  %v1899_v11 = vld [vmem:[#allocation3 + $0x8] sm:$0xff]  ;;  %v1903_v43 = vld [vmem:[#allocation3] sm:$0xfc] }
 0x387   : > { %v1883_v7 = vrot.slane %v1859_v5, 7  ;;  %v1891_v13 = vld [vmem:[#allocation3 + $0x10] sm:$0xff]  ;;  %v1890_v15 = vld [vmem:[#allocation3 + $0x8] sm:$0xfe]  ;;  %v2883_v4 = vld [vmem:[%s4220_s3] ss:$0 sm:$0xff] }
 0x388   : > { %v1875_v8 = vsel %vm1872_vm4, %v1873_v55, %v1874_v6  ;;  %v1892_v9 = vld [vmem:[#allocation3 + $0x18] sm:$0xff]  ;;  %v1895_v19 = vpack.c.bf16 %v1891_v13, %v1889_v18  ;;  %v1905_v45 = vpack.c.bf16 %v1891_v13, %v1903_v43 }
 0x389   : > { %1879 = vst [vmem:[#allocation3 + $0x20] sm:$0x7] %v1875_v8  ;;  %v1884_v14 = vsel %vm1872_vm4, %v1882_v58, %v1883_v7  ;;  %v1901_v16 = vpack.c.bf16 %v1892_v9, %v1899_v11  ;;  %v1896_v17 = vpack.c.bf16 %v1892_v9, %v1890_v15  ;;  %v2884_v7 = vld [vmem:[%s4220_s3 + $0x1] ss:$0 sm:$0xff]  ;;  %v2887_v11 = vld [vmem:[%s4220_s3 + $0x2] ss:$0 sm:$0xff] }
 0x38a   : > { %1888 = vst [vmem:[#allocation3 + $0x28] sm:$0x7] %v1884_v14  ;;  %v1942_v20 = vshll.u32 %v1895_v19, 16  ;;  %v1940_v32 = vshrl.u32 %v1895_v19, 16  ;;  %v2330_v49 = vrot.slane %v1905_v45, 1 }
 0x38b   : > { %2993 = vmatprep.mubr.bf16.mxu1 %v1901_v16  ;;  %v1954_v21 = vshll.u32 %v1896_v17, 16  ;;  %v1952_v30 = vshrl.u32 %v1896_v17, 16 }
 0x38c   : > { %v1944_v62 = vrot.slane %v1942_v20, 1  ;;  %v2888_v20 = vld [vmem:[%s4220_s3 + $0x3] ss:$0 sm:$0xff]  ;;  %s3666_s3 = scalar_lea.vmem %s3665_s13, 1024 }
 0x38d   : > { %v1956_v28 = vrot.slane %v1954_v21, 1  ;;  %p3668_p13 = scmp.lt.s32.totalorder %s3666_s3, %s3660_s17 }
 0x38e   : > { %v1945_v39 = vor.u32 %v1944_v62, %v1940_v32 }
 0x38f   : > { %v1957_v34 = vor.u32 %v1956_v28, %v1952_v30  ;;  %p3669_p5 = por %p3668_p13, %p3667_p6 }
 0x390   : > { %v1893_v22 = vld [vmem:[#allocation3 + $0x20] sm:$0x7] }
 0x391   : > { %v1900_v23 = vld [vmem:[#allocation3 + $0x28] sm:$0x3]  ;;  %v1897_v25 = vpack.c.bf16 %v1893_v22, %v1893_v22  ;;  %v1904_v12 = vld [vmem:[#allocation3 + $0x20] sm:$0xf]  ;;  %p3670_p1 = pnand %p3669_p5, %p3663_p4 }
 0x392   : > { %v1894_v24 = vld [vmem:[#allocation3 + $0x28] sm:$0x7]  ;;  %v1902_v26 = vpack.c.bf16 %v1900_v23, %v1900_v23  ;;  %v1906_v35 = vpack.c.bf16 %v1904_v12, %v1904_v12 }
 0x393   : > { %v1898_v27 = vpack.c.bf16 %v1894_v24, %v1894_v24  ;;  %v1947_v29 = vshll.u32 %v1897_v25, 16  ;;  %v1963_v46 = vshrl.u32 %v1897_v25, 16 }
 0x394   : > { %2994 = vmatmul.mubr.bf16.vlgmr.msra.gmra.mrb[12].mxu1 %v1902_v26  ;;  %v2331_v47 = vrot.slane %v1906_v35, 1 }
 0x395   : > { %v1959_v31 = vshll.u32 %v1898_v27, 16  ;;  %v1949_v33 = vrot.slane %v1947_v29, 1  ;;  %v1966_v38 = vshrl.u32 %v1898_v27, 16 }
 0x396   : > { %v2332_v51 = vsel %vm1696_vm3, %v2330_v49, %v2331_v47 }
 0x397   : > { %v1961_v37 = vrot.slane %v1959_v31, 1  ;;  %v1950_v42 = vsel %vm977_vm2, %v1945_v39, %v1949_v33  ;;  %v1965_v48 = vor.u32 %v1963_v46, %v1949_v33 }
 0x399   : > { %v1962_v40 = vsel %vm977_vm2, %v1957_v34, %v1961_v37  ;;  %v1968_v41 = vor.u32 %v1966_v38, %v1961_v37 }
 0x39a   : > { %2165 = vmatprep.mubr.bf16.mxu0 %v1962_v40 }
 0x39b   : > { %2166 = vmatmul.mubr.bf16.vlgmr.msra.gmra.mrb[20].mxu0 %v1950_v42 }
 0x39c   : > { %2998 = vmatpush3.bf16.msra.mxu0 %v4280_v10  ;;  %2175 = vmatprep.mubr.bf16.mxu0 %v1968_v41  ;;  %v3371_v10 = vld [vmem:[#allocation19 + $0x28] sm:$0xff]  }
 0x39d   : > { %2999 = vmatprep.subr.bf16.mxu0 %v3367_v36 }
 0x3a0   : > { %3000 = vmatpush3.bf16.msra.mxu0 %v3367_v36 }
 0x3a1   : > { %3001 = vmatprep.subr.bf16.mxu0 %v3368_v44 }
 0x3a3   : > { %2176 = vmatmul.mubr.bf16.gmra.mrb[24].mxu0 %v1965_v48 }
 0x3a4   : > { %3002 = vmatpush3.bf16.msra.mxu0 %v3368_v44  ;;  %3013 = vmatprep.mubr.bf16.mxu0 %v2332_v51 }
 0x3a5   : > { %3003 = vmatprep.subr.bf16.mxu0 %v3369_v50 }
 0x3a8   : > { %3004 = vmatpush3.bf16.msra.mxu0 %v3369_v50 }
 0x3a9   : > { %3005 = vmatprep.subr.bf16.mxu0 %v3370_v0 }
 0x3ac   : > { %3006 = vmatpush3.bf16.msra.mxu0 %v3370_v0 }
 0x3ad   : > { %3007 = vmatprep.subr.bf16.mxu0 %v3371_v10 }
 0x3b0   : > { %3008 = vmatpush3.bf16.msra.mxu0 %v3371_v10 }
 0x3b1   : > { %3009 = vmatprep.subr.bf16.mxu0 %v3372_v52 }
 0x3b4   : > { %3010 = vmatpush3.bf16.msra.mxu0 %v3372_v52 }
 0x3b5   : > { %3011 = vmatprep.subr.bf16.mxu0 %v3373_v53 }
 0x3b8   : > { %3012 = vmatpush3.bf16.msra.mxu0 %v3373_v53 }
 0x3bb   : > { %3014 = vmatmul.mubr.bf16.vlgmr.msra.gmra.mrb[28].mxu0 %v2331_v47 }
 0x467   : > { %v2995_v54 = vpop.f32.mrb[12].mxu1 }
 0x468   : > { %v2282_v55 = vpop.f32.mrb[13].mxu1 }
 0x469   : > { %v2996_v56 = vpop.f32.mrb[14].mxu1 }
 0x46a   : > { %v2285_v57 = vpop.f32.mrb[15].mxu1 }
 0x46e   : > { %v2167_v58 = vpop.f32.mrb[20].mxu0 }
 0x46f   : > { %v2296_v61 = vadd.f32 %v2282_v55, %v2167_v58  ;;  %v2169_v63 = vpop.f32.mrb[21].mxu0 }
 0x470   : > { %v2171_v1 = vpop.f32.mrb[22].mxu0 }
 0x471   : > { %v2306_v2 = vadd.f32 %v2874_v59, %v2296_v61  ;;  %v2297_v3 = vadd.f32 %v2285_v57, %v2171_v1  ;;  %v2173_v60 = vpop.f32.mrb[23].mxu0 }
 0x473   : > { %v2309_v5 = vmax.f32 %v2306_v2, 0.0  ;;  %v2307_v6 = vadd.f32 %v2874_v59, %v2297_v3 }
 0x475   : > { %v2446_v8 = vmul.f32 %v2883_v4, %v2309_v5  ;;  %v2310_v9 = vmax.f32 %v2307_v6, 0.0 }
 0x476   : > { %v2177_v13 = vpop.f32.mrb[24].mxu0 }
 0x477   : > { %v2451_v14 = vadd.f32 %v2884_v7, %v2446_v8  ;;  %v2298_v15 = vadd.f32 %v2995_v54, %v2177_v13  ;;  %v2179_v16 = vpop.f32.mrb[25].mxu0  ;;  %v2463_v18 = vmul.f32 %v2887_v11, %v2310_v9 }
 0x478   : > { %v2181_v17 = vpop.f32.mrb[26].mxu0 }
 0x479   : > { %2452 = vst [vmem:[%s4297_s9] sm:$0xff] %v2451_v14  ;;  %v2308_v19 = vadd.f32 %v2874_v59, %v2298_v15  ;;  %v2182_v21 = vpop.f32.mrb[27].mxu0  ;;  %v2469_v23 = vadd.f32 %v2888_v20, %v2463_v18 }
 0x47b   : > { %v2311_v22 = vmax.f32 %v2308_v19, 0.0  ;;  %v2474_v26 = vrot.slane %v2469_v23, 2 }
 0x47d   : > { %v2464_v24 = vmul.f32 %v2887_v11, %v2311_v22 }
 0x47f   : > { %v2470_v25 = vadd.f32 %v2888_v20, %v2464_v24 }
 0x481   : > { %v2475_v27 = vrot.slane %v2470_v25, 2 }
 0x483   : > { %v2476_v28 = vsel %vm2473_vm5, %v2474_v26, %v2475_v27 }
 0x484   : > { %2478 = vst [vmem:[%s4297_s9 + $0x10] sm:$0xff] %v2476_v28 }
 0x48e   : > { %v3015_v62 = vpop.f32.mrb[28].mxu0 }
 0x48f   : > { %v2433_v29 = vadd.f32 %v3015_v62, %v2179_v16  ;;  %v2417_v30 = vpop.f32.mrb[29].mxu0 }
 0x490   : > { %v2431_v31 = vadd.f32 %v2417_v30, %v2169_v63  ;;  %v3016_v32 = vpop.f32.mrb[30].mxu0 }
 0x491   : > { %v2436_v33 = vadd.f32 %v2874_v59, %v2433_v29  ;;  %v2420_v34 = vpop.f32.mrb[31].mxu0 }
 0x492   : > { %v2434_v37 = vadd.f32 %v2874_v59, %v2431_v31  ;;  %v2432_v38 = vadd.f32 %v2420_v34, %v2173_v60 }
 0x493   : > { %v2439_v39 = vmax.f32 %v2436_v33, 0.0 }
 0x494   : > { %v2437_v12 = vmax.f32 %v2434_v37, 0.0  ;;  %v2435_v40 = vadd.f32 %v2874_v59, %v2432_v38 }
 0x495   : > { %v2480_v41 = vmul.f32 %v2887_v11, %v2439_v39 }
 0x496   : > { %v2453_v36 = vmul.f32 %v2883_v4, %v2437_v12  ;;  %v2438_v42 = vmax.f32 %v2435_v40, 0.0 }
 0x497   : > { %v2482_v35 = vadd.f32 %v2888_v20, %v2480_v41 }
 0x498   : > { %v2454_v43 = vadd.f32 %v2884_v7, %v2453_v36  ;;  %v2479_v44 = vmul.f32 %v2887_v11, %v2438_v42 }
 0x499   : > { %v2486_v46 = vrot.slane %v2482_v35, 2 }
 0x49a   : > { %2455 = vst [vmem:[%s4297_s9 + $0x8] sm:$0xff] %v2454_v43  ;;  %v2481_v45 = vadd.f32 %v2888_v20, %v2479_v44 }
 0x49c   : > { %v2485_v47 = vrot.slane %v2481_v45, 2 }
 0x49e   : > { %v2487_v48 = vsel %vm2473_vm5, %v2485_v47, %v2486_v46 }
 0x49f   : > { %2489 = vst [vmem:[%s4297_s9 + $0x18] sm:$0xff] %v2487_v48 }
 0x4a0   : > { %3673 = shalt.err (!%p3670_p1)
}
 0x4a1   : > { %s3674_s20 = scalar_lea.hbm %s4311_s18, 512  ;;  %s3678_s8 = scalar_lea.hbm %s4457_s6, 1024 }
 0x4a2   : > { %p3675_p12 = scmp.ne.s32.totalorder %s4311_s18, %s3674_s20  ;;  %p3679_p8 = scmp.lt.u32.totalorder %s4311_s18, %s4457_s6 }
 0x4a3   : > { %p3680_p11 = scmp.lt.u32.totalorder %s3678_s8, %s3674_s20  ;;  %p3682_p7 = scmp.lt.u32.totalorder %s3674_s20, %s4311_s18 }
 0x4a4   : > { %p3676_p0 = pnand %p3675_p12, %p4458_p10 }
 0x4a5   : > { %p3681_p3 = por %p3680_p11, %p3679_p8 }
 0x4a6   : > { %p3677_p2 = pneg %p3676_p0 }
 0x4a7   : > { %p3683_p9 = por %p3682_p7, %p3681_p3 }
 0x4a9   : > { %p3684_p4 = pnand %p3683_p9, %p3677_p2 }
 0x4ab   : > { %3687 = shalt.err (!%p3684_p4)
}
 0x4ac   : > { %s3767_s15 = smov 256   ;;  %s3768_s22 = smov 16  }
 0x4ad   : > { %3055 = dma.vmem_to_hbm [thread:$0]  (%p4458_p10), %s4306_s4, 512, %s4311_s18, %s2491_s12, %s3767_s15, %s3767_s15, %s3768_s22  }
 0x4ae PF: > { %s4459_s25 = sld [smem:[#allocation29_spill]]  ;;  %s4460_s1 = sld [smem:[#allocation36_spill]] }
 0x4af   : > { %p4462_p13 = scmp.ge.s32.totalorder %s3746_s28, 2 }
 0x4b4   : > { %s2520_s9 = sand.u32 1, %s4459_s25   ;;  %p4461_p6 = scmp.ne.s32.totalorder %s4460_s1, 0 }
 0x4b5   : > { %s2521_s29 = scalar_lea.sflag [#allocation6], %s2520_s9 }
 0x4b6   : > { %p3090_p5 = pnand %p4462_p13, %p4461_p6 }
 0x4b8   : > { %3729 = dma.done.wait (!%p3090_p5), %s2521_s29, 512  }
 0x4b9   : > { %3731 = vsyncadd (!%p3090_p5), %s2521_s29, 4294966784  ;;  %s4463_s28 = sld [smem:[#allocation33_spill]]  ;;  %s4464_s27 = sld [smem:[#allocation30_spill]] }
 0x4ba   : > { %s4465_s5 = sld [smem:[#allocation34_spill]]  ;;  %s4466_s25 = smov %s3738_s26 }
 0x4bf   : > { %p33_p1 = scmp.ge.s32.totalorder %s4463_s28, 4   ;;  %s4467_s26 = smov %s4464_s27 }
 0x4c0   : > { %s4468_s27 = smov %s4465_s5 }
 0x4c1   :  { %35 = sbr.rel (!%p33_p1) target bundleno = 21 (0x15), region = 176 }
 0x4c8   :  { %2526 = vsyncpa [#allocation5], 1 }
 0x4c9   :  { %2528 = vsyncpa [#allocation5 + $0x1], 1 }
 0x4ca   :  { %2529 = vsyncpa [#allocation8], 1 }
 0x4cb   :  { %2531 = vsyncpa [#allocation8 + $0x1], 1 }
 0x4cc   :  { %2532 = vsyncpa [#allocation11], 1 }
 0x4cd   :  { %2533 = vsyncpa [#allocation14], 1 }
 0x4ce   :  { %2534 = vsyncpa [#allocation17], 1 }
 0x4cf   :  { %2535 = vsyncpa [#allocation20], 1 }
 0x4d0   :  { %2536 = vsyncpa [#allocation6], 1 }
 0x4d1   :  { %2538 = vsyncpa [#allocation6 + $0x1], 1 }

// kernel: tpu_custom_call.1
= control target key start
LH: loop header
LB: loop body
LE: loop exit
PB: predicated region body
PF: predicated region fallthrough
CT: control target
= control target key end

     0   :  { %s4357_s0 = inlined_call_operand.hbm [shape: bf16[32,128], index: 0, kind: input, shape index: {}]   ;;  %s4358_s1 = inlined_call_operand.hbm [shape: bf16[32,256], index: 1, kind: input, shape index: {}]   ;;  %s4359_s2 = inlined_call_operand.hbm [shape: f32[4,2,128], index: 2, kind: input, shape index: {}]   ;;  %s4360_s3 = inlined_call_operand.hbm [shape: bf16[128,256], index: 3, kind: input, shape index: {}]   ;;  %s4361_s4 = inlined_call_operand.vmem [shape: f32[1,256], index: 4, kind: input, shape index: {}]   ;;  %s4362_s5 = inlined_call_operand.hbm [shape: bf16[256,128], index: 5, kind: input, shape index: {}]   ;;  %s4363_s6 = inlined_call_operand.hbm [shape: bf16[512,256], index: 6, kind: input, shape index: {}]   ;;  %s4364_s7 = inlined_call_operand.hbm [shape: bf16[256,128], index: 7, kind: input, shape index: {}]   ;;  %s4365_s8 = inlined_call_operand.vmem [shape: f32[1,128], index: 8, kind: input, shape index: {}]   ;;  %s4366_s9 = inlined_call_operand.hbm [shape: bf16[128,128], index: 9, kind: input, shape index: {}]   ;;  %s4367_s10 = inlined_call_operand.hbm [shape: bf16[256,256], index: 10, kind: input, shape index: {}]   ;;  %s4368_s11 = inlined_call_operand.hbm [shape: bf16[128,128], index: 11, kind: input, shape index: {}]   ;;  %s4369_s12 = inlined_call_operand.vmem [shape: f32[1,128], index: 12, kind: input, shape index: {}]   ;;  %s4370_s13 = inlined_call_operand.hbm [shape: f32[32,256], index: 13, kind: output, shape index: {}]  }
   0x1   :  { %4402 = sst [smem:[#allocation37_spill]] %s4358_s1 }
   0x2   :  { %4403 = sst [smem:[#allocation38_spill]] %s4360_s3 }
   0x3   :  { %4404 = sst [smem:[#allocation39_spill]] %s4361_s4 }
   0x4   :  { %4405 = sst [smem:[#allocation40_spill]] %s4362_s5 }
   0x5   :  { %4406 = sst [smem:[#allocation41_spill]] %s4363_s6 }
   0x6   :  { %4407 = sst [smem:[#allocation42_spill]] %s4365_s8 }
   0x7   :  { %4408 = sst [smem:[#allocation43_spill]] %s4366_s9 }
   0x8   :  { %4409 = sst [smem:[#allocation44_spill]] %s4369_s12 }
   0x9   :  { %4410 = sst [smem:[#allocation45_spill]] %s4370_s13 }
   0xa   :  { %18 = vsyncpa [#allocation5], 0 }
   0xb   :  { %20 = vsyncpa [#allocation5 + $0x1], 0 }
   0xc   :  { %21 = vsyncpa [#allocation8], 0 }
   0xd   :  { %23 = vsyncpa [#allocation8 + $0x1], 0 }
   0xe   :  { %24 = vsyncpa [#allocation11], 0 }
   0xf   :  { %25 = vsyncpa [#allocation14], 0 }
  0x10   :  { %26 = vsyncpa [#allocation17], 0 }
  0x11   :  { %27 = vsyncpa [#allocation20], 0 }
  0x12   :  { %28 = vsyncpa [#allocation6], 0 }
  0x13   :  { %30 = vsyncpa [#allocation6 + $0x1], 0  ;;  %s3839_s25 = smov 0   ;;  %s3841_s26 = smov 0  }
  0x14   :  { %s3843_s27 = smov 0   ;;  %s3845_s28 = smov 0  }
  0x15 LB: > { %4411 = sst [smem:[#allocation29_spill]] %s3734_s25  ;;  %s3748_s29 = smov [#allocation10]   ;;  %s3746_s28 = sphi %s3845_s28, %s4463_s28   ;;  %s3742_s27 = sphi %s3843_s27, %s4468_s27   ;;  %s3738_s26 = sphi %s3841_s26, %s4467_s26   ;;  %s3734_s25 = sphi %s3839_s25, %s4466_s25  }
  0x16   : > { %4412 = sst [smem:[#allocation30_spill]] %s3742_s27  ;;  %s367_s30 = sshll.u32 %s3748_s29, 4  ;;  %s3865_s30 = int_to_ptr.vmem [resolvable:$true] %s367_s30 }
  0x17   : > { %s3860_s14 = sadd.s32 4294967295, %s3746_s28   ;;  %p2689_p0 = scmp.ge.s32.totalorder %s3746_s28, 1 }
  0x18   : > { %4413 = sst [smem:[#allocation31_spill]] %s3860_s14  ;;  %p4373_p1 = scmp.eq.s32.totalorder %s3860_s14, 0 }
  0x19   : > { %p355_p2 = scmp.lt.s32.totalorder %s3746_s28, 3  ;;  %s3749_s16 = smov [#allocation13]  }
  0x1a   : > { %s396_s17 = sshll.u32 %s3749_s16, 4  ;;  %s3750_s19 = smov [#allocation16]   ;;  %s3880_s17 = int_to_ptr.vmem [resolvable:$true] %s396_s17 }
  0x1b   : > { %p3867_p3 = pnand %p2689_p0, %p355_p2  ;;  %s3882_s20 = sshll.u32 %s3750_s19, 4  ;;  %s426_s20 = int_to_ptr.vmem [resolvable:$true] %s3882_s20 }
  0x1c   : > { %s4417_s3 = sld [smem:[#allocation38_spill]] }
  0x1d   : > { %s4414_s15 = scalar_select %p3867_p3, 1, 0 }
  0x1e   : > { %p3057_p5 = pneg %p3867_p3 }
  0x1f   : > { %4415 = sst [smem:[#allocation32_spill]] %s4414_s15 }
  0x20   : > { %p3876_p6 = pnand %p3057_p5, %p4373_p1 }
  0x22   : > { %s4416_s18 = scalar_select %p3876_p6, 1, 0 }
  0x23   : > { %s3374_s23 = scalar_lea.hbm %s4417_s3, 2048  ;;  %p3892_p8 = pneg %p3876_p6 }
  0x24   : > { %p3375_p7 = scmp.ne.s32.totalorder %s4417_s3, %s3374_s23  ;;  %p3381_p11 = scmp.lt.u32.totalorder %s3374_s23, %s4417_s3 }
  0x25   : > { %s4418_s16 = scalar_select %p3892_p8, 1, 0 }
  0x26   : > { %p3377_p9 = pnand %p3892_p8, %p3375_p7 }
  0x28   : > { %p3378_p10 = pneg %p3377_p9 }
  0x2a   : > { %p3383_p12 = pnand %p3381_p11, %p3378_p10 }
  0x2c   : > { %3386 = shalt.err (!%p3383_p12)
}
  0x2d   : > { %s3387_s21 = scalar_lea.vmem %s3865_s30, 2048  ;;  %p3395_p5 = scmp.lt.s32.totalorder %s3865_s30, %s3865_s30 }
  0x2e   : > { %p3388_p13 = scmp.ne.s32.totalorder %s3865_s30, %s3387_s21  ;;  %p3396_p4 = scmp.lt.s32.totalorder %s3387_s21, %s3387_s21 }
  0x30   : > { %p3390_p0 = pnand %p3388_p13, %p3892_p8  ;;  %p3397_p7 = por %p3396_p4, %p3395_p5 }
  0x32   : > { %p3391_p2 = pneg %p3390_p0 }
  0x34   : > { %p3398_p9 = pnand %p3397_p7, %p3391_p2 }
  0x36   : > { %3401 = shalt.err (!%p3398_p9)
}
  0x37   : > { %s4379_s22 = smov 128   ;;  %s4381_s13 = smov 8  }
  0x38   : > { %3060 = dma.hbm_to_vmem [thread:$0]  (!%p3876_p6), %s4417_s3, 2048, %s3865_s30, [#allocation11], %s4379_s22, %s4379_s22, %s4381_s13  }
  0x39   : > { %s4419_s6 = sld [smem:[#allocation41_spill]] }
  0x3f   : > { %s3402_s21 = scalar_lea.hbm %s4419_s6, 8192 }
  0x40   : > { %p3403_p4 = scmp.ne.s32.totalorder %s4419_s6, %s3402_s21  ;;  %p3409_p12 = scmp.lt.u32.totalorder %s3402_s21, %s4419_s6 }
  0x42   : > { %p3405_p10 = pnand %p3403_p4, %p3892_p8 }
  0x44   : > { %p3406_p11 = pneg %p3405_p10 }
  0x46   : > { %p3411_p13 = pnand %p3409_p12, %p3406_p11 }
  0x48   : > { %3414 = shalt.err (!%p3411_p13)
}
  0x49   : > { %s3415_s30 = scalar_lea.vmem %s3880_s17, 8192  ;;  %p3423_p7 = scmp.lt.s32.totalorder %s3880_s17, %s3880_s17 }
  0x4a   : > { %p3416_p0 = scmp.ne.s32.totalorder %s3880_s17, %s3415_s30  ;;  %p3424_p9 = scmp.lt.s32.totalorder %s3415_s30, %s3415_s30 }
  0x4c   : > { %p3418_p2 = pnand %p3416_p0, %p3892_p8  ;;  %p3425_p4 = por %p3424_p9, %p3423_p7 }
  0x4e   : > { %p3419_p5 = pneg %p3418_p2 }
  0x50   : > { %p3426_p10 = pnand %p3425_p4, %p3419_p5 }
  0x52   : > { %3429 = shalt.err (!%p3426_p10)
}
  0x53   : > { %3066 = dma.hbm_to_vmem [thread:$0]  (!%p3876_p6), %s4419_s6, 8192, %s3880_s17, [#allocation14], %s4379_s22, %s4379_s22, %s4381_s13  }
  0x54   : > { %s4420_s9 = sld [smem:[#allocation43_spill]] }
  0x5a   : > { %s3430_s23 = scalar_lea.hbm %s4420_s9, 1024 }
  0x5b   : > { %p3431_p11 = scmp.ne.s32.totalorder %s4420_s9, %s3430_s23  ;;  %p3437_p0 = scmp.lt.u32.totalorder %s3430_s23, %s4420_s9 }
  0x5d   : > { %p3433_p12 = pnand %p3431_p11, %p3892_p8 }
  0x5f   : > { %p3434_p13 = pneg %p3433_p12 }
  0x61   : > { %p3439_p2 = pnand %p3437_p0, %p3434_p13 }
  0x63   : > { %3442 = shalt.err (!%p3439_p2)
}
  0x64   : > { %s3443_s30 = scalar_lea.vmem %s426_s20, 1024  ;;  %p3451_p4 = scmp.lt.s32.totalorder %s426_s20, %s426_s20 }
  0x65   : > { %p3444_p5 = scmp.ne.s32.totalorder %s426_s20, %s3443_s30  ;;  %p3452_p10 = scmp.lt.s32.totalorder %s3443_s30, %s3443_s30 }
  0x67   : > { %p3446_p7 = pnand %p3444_p5, %p3892_p8  ;;  %p3453_p1 = por %p3452_p10, %p3451_p4 }
  0x69   : > { %p3447_p9 = pneg %p3446_p7 }
  0x6b   : > { %p3454_p3 = pnand %p3453_p1, %p3447_p9 }
  0x6d   : > { %3457 = shalt.err (!%p3454_p3)
}
  0x6e   : > { %s4375_s17 = smov 64   ;;  %s4377_s4 = smov 4  }
  0x6f   : > { %3072 = dma.hbm_to_vmem [thread:$0]  (!%p3876_p6), %s4420_s9, 1024, %s426_s20, [#allocation17], %s4375_s17, %s4375_s17, %s4377_s4  }
  0x70   : > { %s2688_s15 = sadd.s32 4294967294, %s3746_s28   ;;  %s3966_s23 = sadd.s32 1, %s3746_s28  }
  0x71   : > { %4421 = sst [smem:[#allocation33_spill]] %s3966_s23  ;;  %s43_s24 = sadd.s32 1, %s3742_s27 }
  0x72   : > { %s40_s29 = ssub.s32 %s3746_s28, %s3966_s23  ;;  %p50_p1 = scmp.ne.s32.totalorder %s3742_s27, %s3738_s26 }
  0x73   : > { %p41_p3 = scmp.eq.s32.totalorder %s40_s29, 0  ;;  %p51_p11 = scmp.eq.s32.totalorder %s3746_s28, 0 }
  0x74   : > { %p56_p12 = scmp.ne.s32.totalorder %s3738_s26, %s3734_s25  ;;  %p342_p13 = scmp.eq.s32.totalorder %s3860_s14, 1 }
  0x75   : > { %s3978_s19 = scalar_select %p41_p3, %s3742_s27, %s43_s24  }
  0x76   : > { %p52_p0 = por %p51_p11, %p50_p1  ;;  %p4423_p2 = scmp.eq.s32.totalorder %s3860_s14, 0 }
  0x77   : > { %4422 = sst [smem:[#allocation34_spill]] %s3978_s19  ;;  %p3986_p7 = por %p342_p13, %p50_p1 }
  0x78   : > { %p3982_p5 = por %p4423_p2, %p56_p12  ;;  %p348_p9 = scmp.eq.s32.totalorder %s2688_s15, 1 }
  0x79   : > { %s4425_s21 = scalar_select %p3986_p7, 1, 0 }
  0x7a   : > { %s4424_s20 = scalar_select %p3982_p5, 1, 0 }
  0x7b   : > { %4426 = sst [smem:[#allocation35_spill]] %s4425_s21  ;;  %p3100_p4 = scmp.lt.s32.totalorder %s3746_s28, 2 }
  0x7c   : > { %s3992_s30 = sand.u32 1, %s3742_s27   ;;  %p3994_p10 = por %p348_p9, %p56_p12 }
  0x7d   : > { %s489_s12 = sand.u32 1, %s3746_s28   ;;  %p3999_p3 = pnand %p3100_p4, %p52_p0 }
  0x7e   : > { %s4427_s8 = scalar_select %p3994_p10, 1, 0 }
  0x7f   : > { %s4429_s24 = scalar_select %p3999_p3, 1, 0 }
  0x80   : > { %4428 = sst [smem:[#allocation36_spill]] %s4427_s8  ;;  %s2701_s29 = sshll.u32 %s3992_s30, 4 }
  0x81   : > { %s2897_s17 = sshll.u32 %s3746_s28, 8  ;;  %s4430_s1 = sld [smem:[#allocation37_spill]] }
  0x82   : > { %s493_s13 = scalar_lea.vmem [#allocation7], %s2701_s29  ;;  %s4012_s6 = scalar_lea.sflag [#allocation8], %s489_s12 }
  0x83   : > { %s501_s3 = sshll.u32 %s493_s13, 4  ;;  %p4018_p11 = pneg %p3999_p3  ;;  %s4010_s3 = int_to_ptr.vmem [resolvable:$true] %s501_s3 }
  0x85   : > { %s4431_s19 = scalar_select %p4018_p11, 1, 0 }
  0x87   : > { %s4008_s15 = scalar_lea.hbm %s4430_s1, %s2897_s17  ;;  %s3463_s4 = scalar_lea.hbm %s4430_s1, 512 }
  0x88   : > { %s3458_s9 = scalar_lea.hbm %s4008_s15, 256  ;;  %p3464_p0 = scmp.lt.u32.totalorder %s4008_s15, %s4430_s1 }
  0x89   : > { %p3459_p1 = scmp.ne.s32.totalorder %s4008_s15, %s3458_s9  ;;  %p3465_p2 = scmp.lt.u32.totalorder %s3463_s4, %s3458_s9 }
  0x8a   : > { %p3467_p4 = scmp.lt.u32.totalorder %s3458_s9, %s4008_s15 }
  0x8b   : > { %p3461_p12 = pnand %p4018_p11, %p3459_p1  ;;  %p3466_p9 = por %p3465_p2, %p3464_p0 }
  0x8d   : > { %p3462_p13 = pneg %p3461_p12  ;;  %p3468_p10 = por %p3467_p4, %p3466_p9 }
  0x8f   : > { %p3469_p7 = pnand %p3468_p10, %p3462_p13 }
  0x91   : > { %3472 = shalt.err (!%p3469_p7)
}
  0x92   : > { %s3473_s12 = scalar_lea.vmem %s4010_s3, 256  ;;  %s3755_s22 = smov [#allocation7]  }
  0x93   : > { %p3474_p1 = scmp.ne.s32.totalorder %s4010_s3, %s3473_s12  ;;  %s3478_s17 = sshll.u32 %s3755_s22, 4  ;;  %s3479_s17 = int_to_ptr.vmem [resolvable:$false] %s3478_s17 }
  0x94   : > { %s3480_s13 = scalar_lea.vmem %s3479_s17, 512  ;;  %p3481_p6 = scmp.lt.s32.totalorder %s4010_s3, %s3479_s17 }
  0x95   : > { %p3476_p12 = pnand %p3474_p1, %p4018_p11  ;;  %p3482_p8 = scmp.lt.s32.totalorder %s3480_s13, %s3473_s12 }
  0x97   : > { %p3477_p5 = pneg %p3476_p12  ;;  %p3483_p0 = por %p3482_p8, %p3481_p6 }
  0x99   : > { %p3484_p2 = pnand %p3483_p0, %p3477_p5 }
  0x9b   : > { %3487 = shalt.err (!%p3484_p2)
}
  0x9c   : > { %s4432_s9 = smov 8   ;;  %s4433_s4 = smov 128  }
  0x9d   : > { %3085 = dma.hbm_to_vmem [thread:$0]  (!%p3999_p3), %s4008_s15, 256, %s4010_s3, %s4012_s6, %s4433_s4, %s4433_s4, %s4432_s9  }
  0x9e   : > { %s3756_s29 = smov [#allocation12]   ;;  %s3757_s22 = smov [#allocation15]  }
  0x9f   : > { %s383_s1 = sshll.u32 %s3756_s29, 4  ;;  %s409_s27 = sshll.u32 %s3757_s22, 4  ;;  %s384_s1 = int_to_ptr.vmem [resolvable:$true] %s383_s1  ;;  %s410_s27 = int_to_ptr.vmem [resolvable:$true] %s409_s27 }
  0xa0   : > { %s4434_s5 = sld [smem:[#allocation40_spill]]  ;;  %p4435_p8 = scmp.ne.s32.totalorder %s4418_s16, 0 }
  0xa6   : > { %s3488_s13 = scalar_lea.hbm %s4434_s5, 2048 }
  0xa7   : > { %p3489_p6 = scmp.ne.s32.totalorder %s4434_s5, %s3488_s13  ;;  %p3495_p10 = scmp.lt.u32.totalorder %s3488_s13, %s4434_s5 }
  0xa9   : > { %p3491_p5 = pnand %p3489_p6, %p4435_p8 }
  0xab   : > { %p3492_p7 = pneg %p3491_p5 }
  0xad   : > { %p3497_p13 = pnand %p3495_p10, %p3492_p7 }
  0xaf   : > { %3500 = shalt.err (!%p3497_p13)
}
  0xb0   : > { %s3501_s3 = scalar_lea.vmem %s384_s1, 2048  ;;  %p3509_p12 = scmp.lt.s32.totalorder %s384_s1, %s384_s1 }
  0xb1   : > { %p3502_p9 = scmp.ne.s32.totalorder %s384_s1, %s3501_s3  ;;  %p3510_p0 = scmp.lt.s32.totalorder %s3501_s3, %s3501_s3 }
  0xb3   : > { %p3504_p4 = pnand %p3502_p9, %p4435_p8  ;;  %p3511_p2 = por %p3510_p0, %p3509_p12 }
  0xb5   : > { %p3505_p1 = pneg %p3504_p4 }
  0xb7   : > { %p3512_p3 = pnand %p3511_p2, %p3505_p1 }
  0xb9   : > { %3515 = shalt.err (!%p3512_p3)
}
  0xba   : > { %p4436_p6 = scmp.ne.s32.totalorder %s4416_s18, 0  ;;  %s4437_s23 = smov 4  }
  0xbb   : > { %s4438_s8 = smov 64   ;;  %s3516_s22 = scalar_lea.hbm %s4364_s7, 2048 }
  0xbc   : > { %3063 = dma.hbm_to_vmem [thread:$0]  (!%p4436_p6), %s4434_s5, 2048, %s384_s1, [#allocation11], %s4438_s8, %s4438_s8, %s4437_s23  }
  0xbd   : > { %p3517_p5 = scmp.ne.s32.totalorder %s4364_s7, %s3516_s22  ;;  %p3523_p10 = scmp.lt.u32.totalorder %s3516_s22, %s4364_s7 }
  0xbf   : > { %p3519_p3 = pnand %p3517_p5, %p4435_p8 }
  0xc1   : > { %p3520_p7 = pneg %p3519_p3 }
  0xc3   : > { %p3525_p13 = pnand %p3523_p10, %p3520_p7 }
  0xc5   : > { %3528 = shalt.err (!%p3525_p13)
}
  0xc6   : > { %s3529_s25 = scalar_lea.vmem %s410_s27, 2048  ;;  %p3537_p12 = scmp.lt.s32.totalorder %s410_s27, %s410_s27 }
  0xc7   : > { %p3530_p9 = scmp.ne.s32.totalorder %s410_s27, %s3529_s25  ;;  %p3538_p0 = scmp.lt.s32.totalorder %s3529_s25, %s3529_s25 }
  0xc9   : > { %p3532_p4 = pnand %p3530_p9, %p4435_p8  ;;  %p3539_p2 = por %p3538_p0, %p3537_p12 }
  0xcb   : > { %p3533_p1 = pneg %p3532_p4 }
  0xcd   : > { %p3540_p11 = pnand %p3539_p2, %p3533_p1 }
  0xcf   : > { %3543 = shalt.err (!%p3540_p11)
}
  0xd0   : > { %3069 = dma.hbm_to_vmem [thread:$0]  (!%p4436_p6), %s4364_s7, 2048, %s410_s27, [#allocation14], %s4438_s8, %s4438_s8, %s4437_s23  }
  0xd1   : > { %s3758_s15 = smov [#allocation18]   ;;  %s3759_s22 = smov [#allocation19]  }
  0xd2   : > { %s438_s29 = sshll.u32 %s3758_s15, 4  ;;  %s451_s17 = sshll.u32 %s3759_s22, 4  ;;  %s439_s29 = int_to_ptr.vmem [resolvable:$true] %s438_s29  ;;  %s452_s17 = int_to_ptr.vmem [resolvable:$true] %s451_s17 }
  0xd3   : > { %s3544_s3 = scalar_lea.hbm %s4367_s10, 4096 }
  0xd4   : > { %p3545_p11 = scmp.ne.s32.totalorder %s4367_s10, %s3544_s3  ;;  %p3551_p7 = scmp.lt.u32.totalorder %s3544_s3, %s4367_s10 }
  0xd6   : > { %p3547_p5 = pnand %p3545_p11, %p4435_p8 }
  0xd8   : > { %p3548_p3 = pneg %p3547_p5 }
  0xda   : > { %p3553_p10 = pnand %p3551_p7, %p3548_p3 }
  0xdc   : > { %3556 = shalt.err (!%p3553_p10)
}
  0xdd   : > { %s3557_s27 = scalar_lea.vmem %s439_s29, 4096  ;;  %p3565_p1 = scmp.lt.s32.totalorder %s439_s29, %s439_s29 }
  0xde   : > { %p3558_p13 = scmp.ne.s32.totalorder %s439_s29, %s3557_s27  ;;  %p3566_p12 = scmp.lt.s32.totalorder %s3557_s27, %s3557_s27 }
  0xe0   : > { %p3560_p9 = pnand %p3558_p13, %p4435_p8  ;;  %p3567_p0 = por %p3566_p12, %p3565_p1 }
  0xe2   : > { %p3561_p4 = pneg %p3560_p9 }
  0xe4   : > { %p3568_p2 = pnand %p3567_p0, %p3561_p4 }
  0xe6   : > { %3571 = shalt.err (!%p3568_p2)
}
  0xe7   : > { %3075 = dma.hbm_to_vmem [thread:$0]  (!%p4436_p6), %s4367_s10, 4096, %s439_s29, [#allocation17], %s4433_s4, %s4433_s4, %s4432_s9  }
  0xe8   : > { %s3572_s22 = scalar_lea.hbm %s4368_s11, 1024 }
  0xe9   : > { %p3573_p11 = scmp.ne.s32.totalorder %s4368_s11, %s3572_s22  ;;  %p3579_p7 = scmp.lt.u32.totalorder %s3572_s22, %s4368_s11 }
  0xeb   : > { %p3575_p5 = pnand %p3573_p11, %p4435_p8 }
  0xed   : > { %p3576_p3 = pneg %p3575_p5 }
  0xef   : > { %p3581_p10 = pnand %p3579_p7, %p3576_p3 }
  0xf1   : > { %3584 = shalt.err (!%p3581_p10)
}
  0xf2   : > { %s3585_s1 = scalar_lea.vmem %s452_s17, 1024  ;;  %p3593_p1 = scmp.lt.s32.totalorder %s452_s17, %s452_s17 }
  0xf3   : > { %p3586_p13 = scmp.ne.s32.totalorder %s452_s17, %s3585_s1  ;;  %p3594_p12 = scmp.lt.s32.totalorder %s3585_s1, %s3585_s1 }
  0xf5   : > { %p3588_p9 = pnand %p3586_p13, %p4435_p8  ;;  %p3595_p0 = por %p3594_p12, %p3593_p1 }
  0xf7   : > { %p3589_p4 = pneg %p3588_p9 }
  0xf9   : > { %p3596_p2 = pnand %p3595_p0, %p3589_p4 }
  0xfb   : > { %3599 = shalt.err (!%p3596_p2)
}
  0xfc   : > { %3078 = dma.hbm_to_vmem [thread:$0]  (!%p4436_p6), %s4368_s11, 1024, %s452_s17, [#allocation20], %s4438_s8, %s4438_s8, %s4437_s23  }
  0xfd   : > { %s2698_s16 = sshll.u32 %s3992_s30, 3  ;;  %s2895_s29 = sshll.u32 %s3746_s28, 7 }
  0xfe   : > { %s4134_s14 = scalar_lea.hbm %s4357_s0, %s2895_s29  ;;  %s472_s18 = scalar_lea.vmem [#allocation4], %s2698_s16 }
  0xff   : > { %s479_s21 = sshll.u32 %s472_s18, 4  ;;  %s2705_s15 = sshll.u32 %s3992_s30, 2  ;;  %s4137_s21 = int_to_ptr.vmem [resolvable:$true] %s479_s21 }
 0x100   : > { %s469_s22 = scalar_lea.sflag [#allocation5], %s3992_s30  ;;  %s3600_s12 = scalar_lea.hbm %s4134_s14, 128 }
 0x101   : > { %p3601_p8 = scmp.ne.s32.totalorder %s4134_s14, %s3600_s12  ;;  %p4439_p6 = scmp.ne.s32.totalorder %s4431_s19, 0 }
 0x102   : > { %s3605_s3 = scalar_lea.hbm %s4357_s0, 256  ;;  %p3606_p3 = scmp.lt.u32.totalorder %s4134_s14, %s4357_s0 }
 0x103   : > { %p3603_p11 = pnand %p3601_p8, %p4439_p6  ;;  %p3607_p7 = scmp.lt.u32.totalorder %s3605_s3, %s3600_s12 }
 0x104   : > { %p3609_p13 = scmp.lt.u32.totalorder %s3600_s12, %s4134_s14 }
 0x105   : > { %p3604_p5 = pneg %p3603_p11  ;;  %p3608_p10 = por %p3607_p7, %p3606_p3 }
 0x107   : > { %p3610_p9 = por %p3609_p13, %p3608_p10 }
 0x109   : > { %p3611_p4 = pnand %p3610_p9, %p3604_p5 }
 0x10b   : > { %3614 = shalt.err (!%p3611_p4)
}
 0x10c   : > { %s3615_s9 = scalar_lea.vmem %s4137_s21, 128  ;;  %s3760_s4 = smov [#allocation4]  }
 0x10d   : > { %p3616_p1 = scmp.ne.s32.totalorder %s4137_s21, %s3615_s9  ;;  %s3620_s16 = sshll.u32 %s3760_s4, 4  ;;  %s3621_s16 = int_to_ptr.vmem [resolvable:$false] %s3620_s16 }
 0x10e   : > { %s3622_s29 = scalar_lea.vmem %s3621_s16, 256  ;;  %p3623_p2 = scmp.lt.s32.totalorder %s4137_s21, %s3621_s16 }
 0x10f   : > { %p3618_p12 = pnand %p3616_p1, %p4439_p6  ;;  %p3624_p8 = scmp.lt.s32.totalorder %s3622_s29, %s3615_s9 }
 0x111   : > { %p3619_p0 = pneg %p3618_p12  ;;  %p3625_p11 = por %p3624_p8, %p3623_p2 }
 0x113   : > { %p3626_p3 = pnand %p3625_p11, %p3619_p0 }
 0x115   : > { %3629 = shalt.err (!%p3626_p3)
}
 0x116   : > { %p4440_p5 = scmp.ne.s32.totalorder %s4429_s24, 0  ;;  %s2898_s27 = sshll.u32 %s3746_s28, 6 }
 0x117   : > { %s515_s5 = scalar_lea.vmem [#allocation9], %s2705_s15  ;;  %s4172_s13 = scalar_lea.hbm %s4359_s2, %s2898_s27 }
 0x118   : > { %3082 = dma.hbm_to_vmem [thread:$0]  (!%p4440_p5), %s4134_s14, 128, %s4137_s21, %s469_s22, %s4438_s8, %s4438_s8, %s4437_s23  }
 0x119   : > { %s522_s18 = sshll.u32 %s515_s5, 4  ;;  %s3630_s3 = scalar_lea.hbm %s4172_s13, 64  ;;  %s4174_s18 = int_to_ptr.vmem [resolvable:$true] %s522_s18 }
 0x11a   : > { %p3631_p7 = scmp.ne.s32.totalorder %s4172_s13, %s3630_s3  ;;  %s3635_s8 = scalar_lea.hbm %s4359_s2, 128 }
 0x11b   : > { %p3636_p9 = scmp.lt.u32.totalorder %s4172_s13, %s4359_s2  ;;  %p3637_p4 = scmp.lt.u32.totalorder %s3635_s8, %s3630_s3 }
 0x11c   : > { %p3633_p10 = pnand %p3631_p7, %p4439_p6  ;;  %p3639_p12 = scmp.lt.u32.totalorder %s3630_s3, %s4172_s13 }
 0x11d   : > { %p3638_p1 = por %p3637_p4, %p3636_p9 }
 0x11e   : > { %p3634_p13 = pneg %p3633_p10 }
 0x11f   : > { %p3640_p0 = por %p3639_p12, %p3638_p1 }
 0x121   : > { %p3641_p2 = pnand %p3640_p0, %p3634_p13 }
 0x123   : > { %3644 = shalt.err (!%p3641_p2)
}
 0x124   : > { %s3645_s15 = scalar_lea.vmem %s4174_s18, 64  ;;  %s3761_s22 = smov [#allocation9]  }
 0x125   : > { %p3646_p8 = scmp.ne.s32.totalorder %s4174_s18, %s3645_s15  ;;  %s3650_s25 = sshll.u32 %s3761_s22, 4  ;;  %s3651_s25 = int_to_ptr.vmem [resolvable:$false] %s3650_s25 }
 0x126   : > { %s3652_s1 = scalar_lea.vmem %s3651_s25, 128  ;;  %p3653_p7 = scmp.lt.s32.totalorder %s4174_s18, %s3651_s25 }
 0x127   : > { %p3648_p11 = pnand %p3646_p8, %p4439_p6  ;;  %p3654_p10 = scmp.lt.s32.totalorder %s3652_s1, %s3645_s15 }
 0x129   : > { %p3649_p3 = pneg %p3648_p11  ;;  %p3655_p9 = por %p3654_p10, %p3653_p7 }
 0x12b   : > { %p3656_p4 = pnand %p3655_p9, %p3649_p3 }
 0x12d   : > { %3659 = shalt.err (!%p3656_p4)
}
 0x12e   : > { %s3762_s9 = smov 32   ;;  %s3763_s4 = smov 2  }
 0x12f   : > { %3088 = dma.hbm_to_vmem [thread:$0]  (!%p4440_p5), %s4172_s13, 64, %s4174_s18, %s4012_s6, %s3762_s9, %s3762_s9, %s3763_s4  }
 0x130   : > { %s4441_s19 = sld [smem:[#allocation32_spill]] }
 0x136   : > { %p4442_p6 = scmp.ne.s32.totalorder %s4441_s19, 0 }
 0x137   : > { %s4201_s16 = sand.u32 (!%p4442_p6), 1, %s3738_s26   ;;  %p4443_p13 = scmp.ne.s32.totalorder (!%p4442_p6), %s4424_s20, 0 }
 0x138   : > { %534 = sbr.rel (%p4442_p6) target bundleno = 1198 (0x4ae), region = 72  ;;  %s2709_s29 = sshll.u32 (!%p4442_p6), %s4201_s16, 3 }
 0x139   : > { %s537_s27 = scalar_lea.sflag (!%p4442_p6), [#allocation5], %s4201_s16  ;;  %s4205_s5 = scalar_lea.vmem (!%p4442_p6), [#allocation4], %s2709_s29 }
 0x13f   : > { %3705 = dma.done.wait (%p4443_p13), %s537_s27, 128  }
 0x140   : > { %3707 = vsyncadd (%p4443_p13), %s537_s27, 4294967168  ;;  %s4444_s24 = sld [smem:[#allocation31_spill]]  ;;  %s2710_s18 = sshll.u32 %s4201_s16, 4 }
 0x141   : > { %s4213_s17 = scalar_lea.vmem [#allocation7], %s2710_s18 }
 0x146   : > { %s545_s6 = sand.u32 1, %s4444_s24  }
 0x147   : > { %s546_s12 = scalar_lea.sflag [#allocation8], %s545_s6 }
 0x148   : > { %3709 = dma.done.wait (%p4443_p13), %s546_s12, 320  }
 0x149   : > { %3711 = vsyncadd (%p4443_p13), %s546_s12, 4294966976  ;;  %s2711_s13 = sshll.u32 %s4201_s16, 2  ;;  %p4445_p5 = scmp.eq.s32.totalorder %s4444_s24, 0 }
 0x14a   : > { %s4220_s3 = scalar_lea.vmem [#allocation9], %s2711_s13 }
 0x14b   : > { %3713 = dma.done.wait (%p4445_p5), [#allocation11], 4096   ;;  %p4446_p1 = pmov %p4445_p5 }
 0x14d   : > { %3715 = vsyncadd (%p4446_p1), [#allocation11], 4294963200  ;;  %p4447_p12 = pmov %p4446_p1 }
 0x14e   : > { %p4448_p0 = pmov %p4446_p1 }
 0x14f   : > { %3717 = dma.done.wait (%p4447_p12), [#allocation14], 10240  }
 0x150   : > { %3719 = vsyncadd (%p4448_p0), [#allocation14], 4294957056  ;;  %p4449_p2 = pmov %p4448_p0 }
 0x151   : > { %p4450_p8 = pmov %p4448_p0 }
 0x152   : > { %3721 = dma.done.wait (%p4449_p2), [#allocation17], 5120  }
 0x153   : > { %3723 = vsyncadd (%p4450_p8), [#allocation17], 4294962176  ;;  %p4451_p11 = pmov %p4448_p0 }
 0x154   : > { %p4452_p3 = pmov %p4448_p0 }
 0x155   : > { %3725 = dma.done.wait (%p4451_p11), [#allocation20], 1024  }
 0x156   : > { %3727 = vsyncadd (%p4452_p3), [#allocation20], 4294966272  ;;  %v644_v0 = vlaneseq  ;;  %v3764_v1 = vmov 0   ;;  %v3765_v2 = vmov 0.0   ;;  %v3158_v3 = vld [vmem:[#allocation10 + $0x4] ss:$8 sps:$4 sm:$0xff]  }
 0x157   : > { %820 = vmatprep.mubr.bf16.mxu0 %v3764_v1  ;;  %v3160_v4 = vld [vmem:[#allocation10] ss:$8 sps:$4 sm:$0xff]   ;;  %788 = vmatprep.subr.bf16.mxu0 %v3158_v3  ;;  %v3161_v5 = vld [vmem:[#allocation10 + $0x14] ss:$8 sps:$4 sm:$0xff]   ;;  %v3163_v6 = vld [vmem:[#allocation10 + $0x10] ss:$8 sps:$4 sm:$0xff]  }
 0x158   : > { %vm646_vm0 = vcmp.lt.s32.totalorder %v644_v0, 512  ;;  %vm653_vm1 = vcmp.lt.s32.totalorder %v644_v0, 256  ;;  %789 = vmatpush1.bf16.msra.mxu0 %v3160_v4  ;;  %v3164_v7 = vld [vmem:[#allocation10 + $0x24] ss:$8 sps:$4 sm:$0xff]   ;;  %v3166_v8 = vld [vmem:[#allocation10 + $0x20] ss:$8 sps:$4 sm:$0xff]  }
 0x159   : > { %648 = vst.msk [vmem:[#allocation2] ss:$8 sm:$0xf] %vm646_vm0, %v3765_v2  ;;  %651 = vst.msk [vmem:[#allocation2 + $0x21] ss:$8 sm:$0xf] %vm646_vm0, %v3765_v2  ;;  %790 = vmatprep.subr.bf16.mxu0 %v3161_v5 }
 0x15a   : > { %655 = vst.msk [vmem:[#allocation3] ss:$8 sm:$0x3] %vm653_vm1, %v3765_v2  ;;  %658 = vst.msk [vmem:[#allocation3 + $0x11] ss:$8 sm:$0x3] %vm653_vm1, %v3765_v2 }
 0x15b   : > { %661 = vst.msk [vmem:[#allocation2 + $0x22] ss:$8 sm:$0xf] %vm646_vm0, %v3765_v2  ;;  %664 = vst.msk [vmem:[#allocation2 + $0x43] ss:$8 sm:$0xf] %vm646_vm0, %v3765_v2 }
 0x15c   : > { %667 = vst.msk [vmem:[#allocation3 + $0x12] ss:$8 sm:$0x3] %vm653_vm1, %v3765_v2  ;;  %670 = vst.msk [vmem:[#allocation3 + $0x23] ss:$8 sm:$0x3] %vm653_vm1, %v3765_v2  ;;  %791 = vmatpush1.bf16.msra.mxu0 %v3163_v6 }
 0x15d   : > { %792 = vmatprep.subr.bf16.mxu0 %v3164_v7  ;;  %v3167_v9 = vld [vmem:[#allocation10 + $0x34] ss:$8 sps:$4 sm:$0xff]   ;;  %v3169_v10 = vld [vmem:[#allocation10 + $0x30] ss:$8 sps:$4 sm:$0xff]   ;;  %v3170_v11 = vld [vmem:[#allocation10 + $0x44] ss:$8 sps:$4 sm:$0xff]  }
 0x15e   : > { %v3183_v12 = vld [vmem:[#allocation13 + $0x4] ss:$8 sps:$4 sm:$0xff]   ;;  %v3185_v13 = vld [vmem:[#allocation13] ss:$8 sps:$4 sm:$0xff]   ;;  %v3186_v14 = vld [vmem:[#allocation13 + $0x14] ss:$8 sps:$4 sm:$0xff]  }
 0x15f   : > { %1366 = vmatprep.subr.bf16.mxu1 %v3183_v12  ;;  %v3172_v15 = vld [vmem:[#allocation10 + $0x40] ss:$8 sps:$4 sm:$0xff]   ;;  %v3188_v16 = vld [vmem:[#allocation13 + $0x10] ss:$8 sps:$4 sm:$0xff]   ;;  %v3173_v17 = vld [vmem:[#allocation10 + $0x54] ss:$8 sps:$4 sm:$0xff]  }
 0x160   : > { %793 = vmatpush1.bf16.msra.mxu0 %v3166_v8  ;;  %1367 = vmatpush1.bf16.msra.mxu1 %v3185_v13  ;;  %v3189_v18 = vld [vmem:[#allocation13 + $0x24] ss:$8 sps:$4 sm:$0xff]   ;;  %v3175_v19 = vld [vmem:[#allocation10 + $0x50] ss:$8 sps:$4 sm:$0xff]   ;;  %v3191_v20 = vld [vmem:[#allocation13 + $0x20] ss:$8 sps:$4 sm:$0xff]  }
 0x161   : > { %794 = vmatprep.subr.bf16.mxu0 %v3167_v9  ;;  %1368 = vmatprep.subr.bf16.mxu1 %v3186_v14  ;;  %v3176_v21 = vld [vmem:[#allocation10 + $0x64] ss:$8 sps:$4 sm:$0xff]   ;;  %v3192_v22 = vld [vmem:[#allocation13 + $0x34] ss:$8 sps:$4 sm:$0xff]   ;;  %v3178_v23 = vld [vmem:[#allocation10 + $0x60] ss:$8 sps:$4 sm:$0xff]  }
 0x162   : > { %v3179_v24 = vld [vmem:[#allocation10 + $0x74] ss:$8 sps:$4 sm:$0xff]   ;;  %v3194_v25 = vld [vmem:[#allocation13 + $0x30] ss:$8 sps:$4 sm:$0xff]   ;;  %v3195_v26 = vld [vmem:[#allocation13 + $0x44] ss:$8 sps:$4 sm:$0xff]  }
 0x163   : > { %v3181_v27 = vld [vmem:[#allocation10 + $0x70] ss:$8 sps:$4 sm:$0xff]   ;;  %v3197_v28 = vld [vmem:[#allocation13 + $0x40] ss:$8 sps:$4 sm:$0xff]   ;;  %v3198_v29 = vld [vmem:[#allocation13 + $0x54] ss:$8 sps:$4 sm:$0xff]  }
 0x164   : > { %795 = vmatpush1.bf16.msra.mxu0 %v3169_v10  ;;  %1369 = vmatpush1.bf16.msra.mxu1 %v3188_v16  ;;  %v3204_v30 = vld [vmem:[#allocation12 + $0x40] sm:$0xff]   ;;  %v3182_v31 = vld [vmem:[%s4205_s5] sm:$0xff]   ;;  %v3219_v43 = vld [vmem:[#allocation12 + $0x58] sm:$0xff]   ;;  %vm977_vm2 = vsmask.f32 7424  ;;  %s4453_s30 = sld [smem:[#allocation39_spill]] }
 0x165   : > { %796 = vmatprep.subr.bf16.mxu0 %v3170_v11  ;;  %1370 = vmatprep.subr.bf16.mxu1 %v3189_v18  ;;  %v3200_v32 = vld [vmem:[#allocation13 + $0x50] ss:$8 sps:$4 sm:$0xff]   ;;  %v3201_v33 = vld [vmem:[#allocation13 + $0x64] ss:$8 sps:$4 sm:$0xff]   ;;  %v3203_v36 = vld [vmem:[#allocation13 + $0x60] ss:$8 sps:$4 sm:$0xff]  }
 0x166   : > { %v3205_v34 = vld [vmem:[#allocation12] sm:$0xff]   ;;  %v3209_v35 = vld [vmem:[#allocation12 + $0x48] sm:$0xff]   ;;  %v3206_v38 = vld [vmem:[#allocation13 + $0x74] ss:$8 sps:$4 sm:$0xff]   ;;  %vm1696_vm3 = vcmask 1046528   ;;  %s4454_s21 = sld [smem:[#allocation42_spill]] }
 0x167   : > { %v3210_v37 = vld [vmem:[#allocation12 + $0x8] sm:$0xff]   ;;  %v3214_v39 = vld [vmem:[#allocation12 + $0x50] sm:$0xff]   ;;  %v3220_v45 = vld [vmem:[#allocation12 + $0x18] sm:$0xff]   ;;  %vm1872_vm4 = vcmask 1040384   ;;  %s4455_s25 = sld [smem:[#allocation44_spill]]  ;;  %s2719_s1 = sshll.u32 %s4201_s16, 5 }
 0x168   : > { %797 = vmatpush1.bf16.msra.mxu0 %v3172_v15  ;;  %1371 = vmatpush1.bf16.msra.mxu1 %v3191_v20  ;;  %v3208_v40 = vld [vmem:[#allocation13 + $0x70] ss:$8 sps:$4 sm:$0xff]   ;;  %v3211_v42 = vld [vmem:[#allocation13 + $0x84] ss:$8 sps:$4 sm:$0xff]   ;;  %v3213_v44 = vld [vmem:[#allocation13 + $0x80] ss:$8 sps:$4 sm:$0xff]  }
 0x169   : > { %798 = vmatprep.subr.bf16.mxu0 %v3173_v17  ;;  %1372 = vmatprep.subr.bf16.mxu1 %v3192_v22  ;;  %v3215_v41 = vld [vmem:[#allocation12 + $0x10] sm:$0xff]   ;;  %v3221_v48 = vld [vmem:[#allocation13 + $0xa4] ss:$8 sps:$4 sm:$0xff]   ;;  %v3232_v6 = vld [vmem:[#allocation13 + $0xc0] ss:$8 sps:$4 sm:$0xff]   ;;  %s4297_s9 = scalar_lea.vmem [#allocation21], %s2719_s1 }
 0x16a   : > { %v3216_v46 = vld [vmem:[#allocation13 + $0x94] ss:$8 sps:$4 sm:$0xff]   ;;  %v3218_v47 = vld [vmem:[#allocation13 + $0x90] ss:$8 sps:$4 sm:$0xff]   ;;  %v933_v49 = vld [vmem:[#allocation13 + $0xa0] sm:$0xff]  ;;  %vm2473_vm5 = vcmask 1045504  }
 0x16b   : > { %v934_v50 = vld [vmem:[#allocation13 + $0xa8] sm:$0xff]  ;;  %v3223_v52 = vld [vmem:[#allocation12 + $0x60] sm:$0xff]   ;;  %v3225_v54 = vld [vmem:[#allocation13 + $0xb4] ss:$8 sps:$4 sm:$0xff]   ;;  %s2505_s4 = sshll.u32 %s4297_s9, 4  ;;  %s4456_s19 = sld [smem:[#allocation35_spill]]  ;;  %s4306_s4 = int_to_ptr.vmem [resolvable:$true] %s2505_s4 }
 0x16c   : > { %799 = vmatpush1.bf16.msra.mxu0 %v3175_v19  ;;  %1373 = vmatpush1.bf16.msra.mxu1 %v3194_v25  ;;  %v2757_v51 = vcombine.low %v933_v49, %v934_v50  ;;  %v3224_v53 = vld [vmem:[#allocation12 + $0x20] sm:$0xff]   ;;  %v831_v55 = vld [vmem:[%s4213_s17] sm:$0xff]  ;;  %v3233_v7 = vld [vmem:[#allocation12 + $0x70] sm:$0xff]   ;;  %s2900_s29 = sshll.u32 %s4444_s24, 9  ;;  %s4457_s6 = sld [smem:[#allocation45_spill]] }
 0x16d   : > { %800 = vmatprep.subr.bf16.mxu0 %v3176_v21  ;;  %1374 = vmatprep.subr.bf16.mxu1 %v3195_v26  ;;  %v832_v56 = vld [vmem:[%s4213_s17 + $0x8] sm:$0xff]  ;;  %v833_v58 = vunpack.c.l.bf16 %v831_v55  ;;  %v3228_v59 = vld [vmem:[#allocation12 + $0x68] sm:$0xff]   ;;  %v834_v60 = vunpack.c.h.bf16 %v831_v55  ;;  %v3238_v11 = vld [vmem:[#allocation12 + $0x78] sm:$0xff]   ;;  %s2491_s12 = scalar_lea.sflag [#allocation6], %s4201_s16  ;;  %s3660_s17 = scalar_lea.vmem %s4306_s4, 512 }
 0x16e   : > { %v3227_v57 = vld [vmem:[#allocation13 + $0xb0] ss:$8 sps:$4 sm:$0xff]   ;;  %v836_v61 = vunpack.c.h.bf16 %v832_v56  ;;  %v835_v62 = vunpack.c.l.bf16 %v832_v56  ;;  %v3229_v63 = vld [vmem:[#allocation12 + $0x28] sm:$0xff]   ;;  %v3235_v9 = vld [vmem:[#allocation13 + $0xd4] ss:$8 sps:$4 sm:$0xff]   ;;  %p3661_p7 = scmp.ne.s32.totalorder %s4306_s4, %s3660_s17  ;;  %s3766_s24 = smov [#allocation21]  }
 0x16f   : > { %v843_v1 = vrot.slane %v833_v58, 7  ;;  %v3230_v2 = vld [vmem:[#allocation13 + $0xc4] ss:$8 sps:$4 sm:$0xff]   ;;  %v853_v3 = vrot.slane %v834_v60, 7  ;;  %v3234_v8 = vld [vmem:[#allocation12 + $0x30] sm:$0xff]   ;;  %v3239_v13 = vld [vmem:[#allocation12 + $0x38] sm:$0xff]  }
 0x170   : > { %801 = vmatpush1.bf16.msra.mxu0 %v3178_v23  ;;  %1375 = vmatpush1.bf16.msra.mxu1 %v3197_v28  ;;  %v873_v4 = vrot.slane %v836_v61, 5  ;;  %v863_v5 = vrot.slane %v835_v62, 5  ;;  %v3237_v10 = vld [vmem:[#allocation13 + $0xd0] ss:$8 sps:$4 sm:$0xff]   ;;  %v3240_v12 = vld [vmem:[#allocation13 + $0xe4] ss:$8 sps:$4 sm:$0xff]  }
 0x171   : > { %802 = vmatprep.subr.bf16.mxu0 %v3179_v24  ;;  %1376 = vmatprep.subr.bf16.mxu1 %v3198_v29  ;;  %845 = vst [vmem:[#allocation2 + $0x8] sm:$0xfe] %v843_v1  ;;  %846 = vst [vmem:[#allocation2 + $0x28] sm:$0x1] %v843_v1  ;;  %v3243_v14 = vld [vmem:[#allocation15 + $0x40] sm:$0xff]   ;;  %p4458_p10 = scmp.ne.s32.totalorder %s4456_s19, 0 }
 0x172   : > { %855 = vst [vmem:[#allocation2 + $0x18] sm:$0xfe] %v853_v3  ;;  %856 = vst [vmem:[#allocation2 + $0x38] sm:$0x1] %v853_v3  ;;  %v3242_v15 = vld [vmem:[#allocation13 + $0xe0] ss:$8 sps:$4 sm:$0xff]   ;;  %s4311_s18 = scalar_lea.hbm %s4457_s6, %s2900_s29 }
 0x173   : > { %875 = vst [vmem:[#allocation2 + $0x38] sm:$0xf8] %v873_v4  ;;  %876 = vst [vmem:[#allocation2 + $0x58] sm:$0x7] %v873_v4  ;;  %v3245_v24 = vld [vmem:[#allocation13 + $0xf4] ss:$8 sps:$4 sm:$0xff]   ;;  %p3662_p9 = pnand %p3661_p7, %p4458_p10 }
 0x174   : > { %803 = vmatpush1.bf16.msra.mxu0 %v3181_v27  ;;  %1377 = vmatpush1.bf16.msra.mxu1 %v3200_v32  ;;  %865 = vst [vmem:[#allocation2 + $0x28] sm:$0xf8] %v863_v5  ;;  %866 = vst [vmem:[#allocation2 + $0x48] sm:$0x7] %v863_v5  ;;  %v3247_v26 = vld [vmem:[#allocation13 + $0xf0] ss:$8 sps:$4 sm:$0xff]  }
 0x175   : > { %2901 = vmatprep.subr.bf16.mxu0 %v3204_v30  ;;  %1378 = vmatprep.subr.bf16.mxu1 %v3201_v33  ;;  %v3252_v32 = vld [vmem:[#allocation13 + $0x104] ss:$8 sps:$4 sm:$0xff]   ;;  %p3663_p4 = pneg %p3662_p9  ;;  %s3664_s13 = sshll.u32 %s3766_s24, 4  ;;  %s3665_s13 = int_to_ptr.vmem [resolvable:$false] %s3664_s13 }
 0x176   : > { %v3244_v55 = vld [vmem:[#allocation15] sm:$0xff]   ;;  %p3667_p6 = scmp.lt.s32.totalorder %s4306_s4, %s3665_s13 }
 0x177   : > { %821 = vmatmul.mubr.bf16.vlgmr.msra.gmra.mrb[0].mxu0 %v3182_v31 }
 0x178   : > { %2902 = vmatpush3.bf16.msra.mxu0 %v3205_v34  ;;  %1379 = vmatpush1.bf16.msra.mxu1 %v3203_v36  ;;  %v878_v19 = vld [vmem:[#allocation2 + $0x8] sm:$0xfe]  ;;  %v693_v36 = vshrl.u32 %v644_v0, 7 }
 0x179   : > { %2903 = vmatprep.subr.bf16.mxu0 %v3209_v35  ;;  %1380 = vmatprep.subr.bf16.mxu1 %v3206_v38  ;;  %v898_v17 = vld [vmem:[#allocation2 + $0x18] sm:$0xff]  ;;  %v690_v38 = vld [vmem:[%s4453_s30] sm:$0x3]  ;;  %v906_v56 = vld [vmem:[#allocation2 + $0x8] sm:$0xfc] }
 0x17a   : > { %v884_v16 = vld [vmem:[#allocation2 + $0x38] sm:$0xff] }
 0x17b   : > { %v902_v18 = vpack.c.bf16 %v884_v16, %v898_v17  ;;  %v4243_v20 = vld [vmem:[#allocation2 + $0x28] sm:$0xff]  ;;  %v888_v4 = vld [vmem:[#allocation2 + $0x58] sm:$0x7] }
 0x17c   : > { %2904 = vmatpush3.bf16.msra.mxu0 %v3210_v37  ;;  %1381 = vmatpush1.bf16.msra.mxu1 %v3208_v40  ;;  %v886_v21 = vld [vmem:[#allocation2 + $0x48] sm:$0x7]  ;;  %v890_v22 = vpack.c.bf16 %v4243_v20, %v878_v19  ;;  %v694_v37 = vsub.s32 0, %v693_v36 }
 0x17d   : > { %2905 = vmatprep.subr.bf16.mxu0 %v3214_v39  ;;  %1382 = vmatprep.subr.bf16.mxu1 %v3211_v42  ;;  %v894_v23 = vpack.c.bf16 %v886_v21, %v886_v21  ;;  %v698_v39 = vsub.s32 1, %v693_v36  ;;  %v3250_v19 = vld [vmem:[#allocation13 + $0x100] ss:$8 sps:$4 sm:$0xff]  }
 0x17e   : > { %1628 = vmatprep.mubr.bf16.mxu0 %v902_v18  ;;  %v993_v25 = vshll.u32 %v890_v22, 16  ;;  %v991_v27 = vshrl.u32 %v890_v22, 16  ;;  %v695_v40 = vrot.slane %v690_v38, %v694_v37  ;;  %v3259_v37 = vld [vmem:[#allocation15 + $0x18] sm:$0xff]  }
 0x17f   : > { %v998_v28 = vshll.u32 %v894_v23, 16  ;;  %v1029_v34 = vshrl.u32 %v894_v23, 16 }
 0x180   : > { %2906 = vmatpush3.bf16.msra.mxu0 %v3215_v41  ;;  %1383 = vmatpush1.bf16.msra.mxu1 %v3213_v44  ;;  %v995_v29 = vrot.slane %v993_v25, 1  ;;  %v699_v41 = vrot.slane %v690_v38, %v698_v39  ;;  %v3263_v39 = vld [vmem:[#allocation15 + $0x60] sm:$0xff]  }
 0x181   : > { %2907 = vmatprep.subr.bf16.mxu0 %v3219_v43  ;;  %1384 = vmatprep.subr.bf16.mxu1 %v3216_v46  ;;  %v1000_v30 = vrot.slane %v998_v28, 1  ;;  %v3254_v28 = vld [vmem:[#allocation15 + $0x10] sm:$0xff]  }
 0x182   : > { %v996_v31 = vor.u32 %v995_v29, %v991_v27 }
 0x183   : > { %v4247_v35 = vor.u32 %v1029_v34, %v1000_v30 }
 0x184   : > { %2908 = vmatpush3.bf16.msra.mxu0 %v3220_v45  ;;  %1385 = vmatpush1.bf16.msra.mxu1 %v3218_v47  ;;  %v1001_v33 = vsel %vm977_vm2, %v996_v31, %v1000_v30  ;;  %v3258_v30 = vld [vmem:[#allocation15 + $0x58] sm:$0xff]  }
 0x185   : > { %1386 = vmatprep.subr.bf16.mxu1 %v3221_v48  ;;  %2909 = vmatprep.subr.bf16.mxu0 %v3223_v52 }
 0x186   : > { %1398 = vmatprep.mubr.bf16.mxu1 %v1001_v33  ;;  %v3262_v33 = vld [vmem:[#allocation13 + $0x124] ss:$8 sps:$4 sm:$0xff]  }
 0x188   : > { %1387 = vmatpush1.bf16.msra.mxu1 %v2757_v51  ;;  %2910 = vmatpush3.bf16.msra.mxu0 %v3224_v53  ;;  %v880_v53 = vld [vmem:[#allocation2 + $0x18] sm:$0xfe] }
 0x189   : > { %1388 = vmatprep.subr.bf16.mxu1 %v3225_v54  ;;  %2911 = vmatprep.subr.bf16.mxu0 %v3228_v59  ;;  %v900_v54 = vld [vmem:[#allocation2 + $0x58] sm:$0x3]  ;;  %v892_v58 = vpack.c.bf16 %v884_v16, %v880_v53 }
 0x18a   : > { %v904_v3 = vpack.c.bf16 %v900_v54, %v900_v54  ;;  %v3253_v16 = vld [vmem:[#allocation15 + $0x50] sm:$0xff]  }
 0x18b   : > { %v1015_v23 = vshrl.u32 %v892_v58, 16  ;;  %v3275_v54 = vld [vmem:[#allocation13 + $0x150] ss:$8 sps:$4 sm:$0xff]  }
 0x18c   : > { %1389 = vmatpush1.bf16.msra.mxu1 %v3227_v57  ;;  %2912 = vmatpush3.bf16.msra.mxu0 %v3229_v63  ;;  %v908_v57 = vld [vmem:[#allocation2 + $0x48] sm:$0xf] }
 0x18d   : > { %1390 = vmatprep.subr.bf16.mxu1 %v3230_v2  ;;  %2913 = vmatprep.subr.bf16.mxu0 %v3233_v7  ;;  %v910_v7 = vpack.c.bf16 %v4243_v20, %v906_v56 }
 0x18f   : > { %v1700_v17 = vrot.slane %v910_v7, 1  ;;  %v3294_v7 = vld [vmem:[#allocation13 + $0x1a4] ss:$8 sps:$4 sm:$0xff]  }
 0x190   : > { %1391 = vmatpush1.bf16.msra.mxu1 %v3232_v6  ;;  %2914 = vmatpush3.bf16.msra.mxu0 %v3234_v8  ;;  %v3248_v6 = vld [vmem:[#allocation15 + $0x48] sm:$0xff]   ;;  %v912_v8 = vpack.c.bf16 %v908_v57, %v908_v57 }
 0x191   : > { %1392 = vmatprep.subr.bf16.mxu1 %v3235_v9  ;;  %2915 = vmatprep.subr.bf16.mxu0 %v3238_v11  ;;  %v1017_v11 = vshll.u32 %v892_v58, 16  ;;  %v3282_v57 = vld [vmem:[#allocation13 + $0x164] ss:$8 sps:$4 sm:$0xff]   ;;  %v3279_v58 = vld [vmem:[#allocation15 + $0x38] sm:$0xff]  }
 0x192   : > { %v4262_v18 = vrot.slane %v912_v8, 1  ;;  %v3292_v8 = vld [vmem:[#allocation13 + $0x1a0] ss:$8 sps:$4 sm:$0xff]  }
 0x193   : > { %v1019_v25 = vrot.slane %v1017_v11, 1  ;;  %v3300_v11 = vld [vmem:[#allocation13 + $0x1c4] ss:$8 sps:$4 sm:$0xff]  }
 0x194   : > { %1393 = vmatpush1.bf16.msra.mxu1 %v3237_v10  ;;  %2916 = vmatpush3.bf16.msra.mxu0 %v3239_v13  ;;  %v3249_v13 = vld [vmem:[#allocation15 + $0x8] sm:$0xff]   ;;  %v1702_v31 = vsel %vm1696_vm3, %v1700_v17, %v4262_v18  ;;  %v3301_v17 = vld [vmem:[#allocation13 + $0x1d0] ss:$8 sps:$4 sm:$0xff]  }
 0x195   : > { %1394 = vmatprep.subr.bf16.mxu1 %v3240_v12  ;;  %2929 = vmatprep.subr.bf16.mxu0 %v3243_v14  ;;  %v4260_v12 = vpack.c.bf16 %v888_v4, %v888_v4  ;;  %v1020_v34 = vor.u32 %v1019_v25, %v1015_v23  ;;  %v3286_v4 = vld [vmem:[#allocation13 + $0x180] ss:$8 sps:$4 sm:$0xff]   ;;  %v3309_v23 = vld [vmem:[#allocation13 + $0x1f4] ss:$8 sps:$4 sm:$0xff]  }
 0x198   : > { %1395 = vmatpush1.bf16.msra.mxu1 %v3242_v15 }
 0x199   : > { %1396 = vmatprep.subr.bf16.mxu1 %v3245_v24  ;;  %v3257_v24 = vld [vmem:[#allocation13 + $0x114] ss:$8 sps:$4 sm:$0xff]  }
 0x19c   : > { %1397 = vmatpush1.bf16.msra.mxu1 %v3247_v26  ;;  %v1022_v26 = vshll.u32 %v4260_v12, 16 }
 0x19d   : > { %1417 = vmatprep.subr.bf16.mxu1 %v3252_v32  ;;  %v3255_v32 = vld [vmem:[#allocation13 + $0x110] ss:$8 sps:$4 sm:$0xff]  }
 0x19e   : > { %v4269_v36 = vrot.slane %v1022_v26, 1  ;;  %v3307_v26 = vld [vmem:[#allocation13 + $0x1f0] ss:$8 sps:$4 sm:$0xff]  }
 0x24a   : > { %v822_v42 = vpop.f32.mrb[0].mxu0 }
 0x24b   : > { %v823_v43 = vadd.f32 %v822_v42, %v695_v40  ;;  %v824_v44 = vpop.f32.mrb[1].mxu0  ;;  %v3267_v42 = vld [vmem:[#allocation13 + $0x134] ss:$8 sps:$4 sm:$0xff]  }
 0x24c   : > { %v825_v45 = vadd.f32 %v824_v44, %v699_v41  ;;  %v826_v46 = vpop.f32.mrb[2].mxu0  ;;  %v3268_v44 = vld [vmem:[#allocation15 + $0x68] sm:$0xff]  }
 0x24d   : > { %v838_v47 = vrot.slane %v823_v43, 7  ;;  %v827_v48 = vadd.f32 %v826_v46, %v695_v40  ;;  %v828_v49 = vpop.f32.mrb[3].mxu0  ;;  %v3260_v40 = vld [vmem:[#allocation13 + $0x120] ss:$8 sps:$4 sm:$0xff]   ;;  %v3272_v46 = vld [vmem:[#allocation13 + $0x144] ss:$8 sps:$4 sm:$0xff]  }
 0x24e   : > { %v848_v50 = vrot.slane %v825_v45, 7  ;;  %v829_v51 = vadd.f32 %v828_v49, %v699_v41  ;;  %v3264_v43 = vld [vmem:[#allocation15 + $0x20] sm:$0xff]   ;;  %v3265_v45 = vld [vmem:[#allocation13 + $0x130] ss:$8 sps:$4 sm:$0xff]  }
 0x24f   : > { %840 = vst [vmem:[#allocation2] sm:$0xfe] %v838_v47  ;;  %841 = vst [vmem:[#allocation2 + $0x20] sm:$0x1] %v838_v47  ;;  %v858_v0 = vrot.slane %v827_v48, 5  ;;  %v3269_v47 = vld [vmem:[#allocation15 + $0x28] sm:$0xff]  }
 0x250   : > { %850 = vst [vmem:[#allocation2 + $0x10] sm:$0xfe] %v848_v50  ;;  %851 = vst [vmem:[#allocation2 + $0x30] sm:$0x1] %v848_v50  ;;  %v868_v52 = vrot.slane %v829_v51, 5  ;;  %v3273_v48 = vld [vmem:[#allocation15 + $0x70] sm:$0xff]  }
 0x251   : > { %860 = vst [vmem:[#allocation2 + $0x20] sm:$0xf8] %v858_v0  ;;  %861 = vst [vmem:[#allocation2 + $0x40] sm:$0x7] %v858_v0  ;;  %v3270_v49 = vld [vmem:[#allocation13 + $0x140] ss:$8 sps:$4 sm:$0xff]  }
 0x252   : > { %870 = vst [vmem:[#allocation2 + $0x30] sm:$0xf8] %v868_v52  ;;  %871 = vst [vmem:[#allocation2 + $0x50] sm:$0x7] %v868_v52  ;;  %v3277_v50 = vld [vmem:[#allocation13 + $0x154] ss:$8 sps:$4 sm:$0xff]  }
 0x253   : > { %v3274_v0 = vld [vmem:[#allocation15 + $0x30] sm:$0xff]   ;;  %v3278_v52 = vld [vmem:[#allocation15 + $0x78] sm:$0xff]  }
 0x256   : > { %v877_v59 = vld [vmem:[#allocation2] sm:$0xfe] }
 0x257   : > { %v897_v63 = vld [vmem:[#allocation2 + $0x10] sm:$0xff]  ;;  %v905_v53 = vld [vmem:[#allocation2] sm:$0xfc] }
 0x258   : > { %v4253_v60 = vld [vmem:[#allocation2 + $0x20] sm:$0xff] }
 0x259   : > { %v885_v61 = vld [vmem:[#allocation2 + $0x40] sm:$0x7]  ;;  %v4255_v62 = vld [vmem:[#allocation2 + $0x30] sm:$0xff]  ;;  %v889_v1 = vpack.c.bf16 %v4253_v60, %v877_v59 }
 0x25a   : > { %v893_v2 = vpack.c.bf16 %v885_v61, %v885_v61  ;;  %v901_v5 = vpack.c.bf16 %v4255_v62, %v897_v63  ;;  %v899_v22 = vld [vmem:[#allocation2 + $0x50] sm:$0x3]  ;;  %v907_v51 = vld [vmem:[#allocation2 + $0x40] sm:$0xf] }
 0x25b   : > { %v981_v9 = vshll.u32 %v889_v1, 16  ;;  %v979_v14 = vshrl.u32 %v889_v1, 16  ;;  %v903_v29 = vpack.c.bf16 %v899_v22, %v899_v22  ;;  %v911_v56 = vpack.c.bf16 %v907_v51, %v907_v51  ;;  %v3280_v59 = vld [vmem:[#allocation13 + $0x160] ss:$8 sps:$4 sm:$0xff]   ;;  %v3285_v1 = vld [vmem:[#allocation13 + $0x174] ss:$8 sps:$4 sm:$0xff]  }
 0x25c   : > { %v986_v10 = vshll.u32 %v893_v2, 16  ;;  %1629 = vmatmul.mubr.bf16.vlgmr.msra.gmra.mrb[4].mxu0 %v901_v5  ;;  %v1026_v38 = vshrl.u32 %v893_v2, 16  ;;  %v3291_v5 = vld [vmem:[#allocation13 + $0x194] ss:$8 sps:$4 sm:$0xff]   ;;  %v3338_v51 = vld [vmem:[#allocation18 + $0x84] ss:$8 sps:$4 sm:$0xff]  }
 0x25d   : > { %2930 = vmatpush3.bf16.msra.mxu0 %v3244_v55  ;;  %v983_v15 = vrot.slane %v981_v9, 1  ;;  %1636 = vmatprep.mubr.bf16.mxu0 %v904_v3  ;;  %v909_v55 = vpack.c.bf16 %v4253_v60, %v905_v53  ;;  %v1698_v63 = vrot.slane %v911_v56, 1  ;;  %v3283_v3 = vld [vmem:[#allocation13 + $0x170] ss:$8 sps:$4 sm:$0xff]   ;;  %v3288_v60 = vld [vmem:[#allocation13 + $0x184] ss:$8 sps:$4 sm:$0xff]  }
 0x25e   : > { %2931 = vmatprep.subr.bf16.mxu0 %v3248_v6  ;;  %v988_v20 = vrot.slane %v986_v10, 1  ;;  %v3289_v6 = vld [vmem:[#allocation13 + $0x190] ss:$8 sps:$4 sm:$0xff]   ;;  %v3297_v9 = vld [vmem:[#allocation13 + $0x1b4] ss:$8 sps:$4 sm:$0xff]  }
 0x25f   : > { %v984_v21 = vor.u32 %v983_v15, %v979_v14  ;;  %v1697_v61 = vrot.slane %v909_v55, 1  ;;  %v3295_v10 = vld [vmem:[#allocation13 + $0x1b0] ss:$8 sps:$4 sm:$0xff]   ;;  %v879_v14 = vld [vmem:[#allocation2 + $0x10] sm:$0xfe] }
 0x260   : > { %v1028_v41 = vor.u32 %v1026_v38, %v988_v20  ;;  %v3303_v15 = vld [vmem:[#allocation13 + $0x1d4] ss:$8 sps:$4 sm:$0xff]   ;;  %v3313_v38 = vld [vmem:[#allocation18 + $0x10] ss:$8 sps:$4 sm:$0xff]   ;;  %v3346_v56 = vld [vmem:[#allocation18 + $0xa4] ss:$8 sps:$4 sm:$0xff]  }
 0x261   : > { %2932 = vmatpush3.bf16.msra.mxu0 %v3249_v13  ;;  %v989_v27 = vsel %vm977_vm2, %v984_v21, %v988_v20  ;;  %v1699_v2 = vsel %vm1696_vm3, %v1697_v61, %v1698_v63  ;;  %v3298_v13 = vld [vmem:[#allocation13 + $0x1c0] ss:$8 sps:$4 sm:$0xff]   ;;  %v3342_v53 = vld [vmem:[#allocation18 + $0x94] ss:$8 sps:$4 sm:$0xff]   ;;  %v3348_v61 = vld [vmem:[#allocation18 + $0xb0] ss:$8 sps:$4 sm:$0xff]  }
 0x262   : > { %1399 = vmatmul.mubr.bf16.vlgmr.msra.gmra.mrb[0].mxu1 %v989_v27  ;;  %2933 = vmatprep.subr.bf16.mxu0 %v3253_v16  ;;  %v891_v16 = vpack.c.bf16 %v4255_v62, %v879_v14  ;;  %v3304_v20 = vld [vmem:[#allocation13 + $0x1e0] ss:$8 sps:$4 sm:$0xff]   ;;  %v3343_v55 = vld [vmem:[#allocation16 + $0x18] sm:$0xff]  }
 0x263   : > { %1418 = vmatpush1.bf16.msra.mxu1 %v3250_v19  ;;  %1408 = vmatprep.mubr.bf16.mxu1 %v4247_v35  ;;  %v1025_v35 = vsel %vm977_vm2, %v1020_v34, %v4269_v36  ;;  %v887_v19 = vld [vmem:[#allocation2 + $0x50] sm:$0x7]  ;;  %v3312_v34 = vld [vmem:[#allocation18 + $0x4] ss:$8 sps:$4 sm:$0xff]  }
 0x264   : > { %1637 = vmatmul.mubr.bf16.gmra.mrb[8].mxu0 %v903_v29  ;;  %1419 = vmatprep.subr.bf16.mxu1 %v3257_v24  ;;  %v1005_v21 = vshll.u32 %v891_v16, 16  ;;  %v895_v22 = vpack.c.bf16 %v887_v19, %v887_v19  ;;  %v1003_v25 = vshrl.u32 %v891_v16, 16 }
 0x265   : > { %2934 = vmatpush3.bf16.msra.mxu0 %v3254_v28  ;;  %1835 = vmatprep.mubr.bf16.mxu0 %v1702_v31  ;;  %v1035_v28 = vshrl.u32 %v4260_v12, 16  ;;  %v3318_v12 = vld [vmem:[#allocation18 + $0x24] ss:$8 sps:$4 sm:$0xff]  }
 0x266   : > { %2935 = vmatprep.subr.bf16.mxu0 %v3258_v30  ;;  %v1007_v24 = vrot.slane %v1005_v21, 1  ;;  %v1010_v27 = vshll.u32 %v895_v22, 16 }
 0x267   : > { %1420 = vmatpush1.bf16.msra.mxu1 %v3255_v32  ;;  %v1037_v30 = vor.u32 %v1035_v28, %v4269_v36  ;;  %v1032_v32 = vshrl.u32 %v895_v22, 16  ;;  %v3321_v36 = vld [vmem:[#allocation18 + $0x34] ss:$8 sps:$4 sm:$0xff]  }
 0x268   : > { %1421 = vmatprep.subr.bf16.mxu1 %v3262_v33  ;;  %v1008_v62 = vor.u32 %v1007_v24, %v1003_v25  ;;  %v1012_v29 = vrot.slane %v1010_v27, 1 }
 0x269   : > { %2936 = vmatpush3.bf16.msra.mxu0 %v3259_v37  ;;  %v3310_v37 = vld [vmem:[#allocation18] ss:$8 sps:$4 sm:$0xff]  }
 0x26a   : > { %1409 = vmatmul.mubr.bf16.gmra.mrb[4].mxu1 %v1028_v41  ;;  %2937 = vmatprep.subr.bf16.mxu0 %v3263_v39  ;;  %v1013_v31 = vsel %vm977_vm2, %v1008_v62, %v1012_v29  ;;  %v1034_v33 = vor.u32 %v1032_v32, %v1012_v29  ;;  %v3315_v39 = vld [vmem:[#allocation18 + $0x14] ss:$8 sps:$4 sm:$0xff]   ;;  %v3331_v41 = vld [vmem:[#allocation16] sm:$0xff]  }
 0x26b   : > { %1422 = vmatpush1.bf16.msra.mxu1 %v3260_v40  ;;  %1449 = vmatprep.mubr.bf16.mxu1 %v1025_v35  ;;  %v3316_v40 = vld [vmem:[#allocation18 + $0x20] ss:$8 sps:$4 sm:$0xff]   ;;  %v3324_v35 = vld [vmem:[#allocation18 + $0x44] ss:$8 sps:$4 sm:$0xff]  }
 0x26c   : > { %1423 = vmatprep.subr.bf16.mxu1 %v3267_v42  ;;  %v3319_v42 = vld [vmem:[#allocation18 + $0x30] ss:$8 sps:$4 sm:$0xff]  }
 0x26d   : > { %2938 = vmatpush3.bf16.msra.mxu0 %v3264_v43  ;;  %v3322_v43 = vld [vmem:[#allocation18 + $0x40] ss:$8 sps:$4 sm:$0xff]  }
 0x26e   : > { %2939 = vmatprep.subr.bf16.mxu0 %v3268_v44  ;;  %v3327_v44 = vld [vmem:[#allocation18 + $0x54] ss:$8 sps:$4 sm:$0xff]  }
 0x26f   : > { %1424 = vmatpush1.bf16.msra.mxu1 %v3265_v45  ;;  %v3325_v45 = vld [vmem:[#allocation18 + $0x50] ss:$8 sps:$4 sm:$0xff]  }
 0x270   : > { %1425 = vmatprep.subr.bf16.mxu1 %v3272_v46  ;;  %v3330_v46 = vld [vmem:[#allocation18 + $0x64] ss:$8 sps:$4 sm:$0xff]  }
 0x271   : > { %2940 = vmatpush3.bf16.msra.mxu0 %v3269_v47  ;;  %v3328_v47 = vld [vmem:[#allocation18 + $0x60] ss:$8 sps:$4 sm:$0xff]  }
 0x272   : > { %2941 = vmatprep.subr.bf16.mxu0 %v3273_v48  ;;  %v3334_v48 = vld [vmem:[#allocation18 + $0x74] ss:$8 sps:$4 sm:$0xff]  }
 0x273   : > { %1426 = vmatpush1.bf16.msra.mxu1 %v3270_v49  ;;  %v3332_v49 = vld [vmem:[#allocation18 + $0x70] ss:$8 sps:$4 sm:$0xff]  }
 0x274   : > { %1427 = vmatprep.subr.bf16.mxu1 %v3277_v50  ;;  %v3335_v50 = vld [vmem:[#allocation16 + $0x8] sm:$0xff]  }
 0x275   : > { %2942 = vmatpush3.bf16.msra.mxu0 %v3274_v0  ;;  %v3336_v0 = vld [vmem:[#allocation18 + $0x80] ss:$8 sps:$4 sm:$0xff]  }
 0x276   : > { %2943 = vmatprep.subr.bf16.mxu0 %v3278_v52  ;;  %v3339_v52 = vld [vmem:[#allocation16 + $0x10] sm:$0xff]  }
 0x277   : > { %1428 = vmatpush1.bf16.msra.mxu1 %v3275_v54  ;;  %v3340_v54 = vld [vmem:[#allocation18 + $0x90] ss:$8 sps:$4 sm:$0xff]  }
 0x278   : > { %1429 = vmatprep.subr.bf16.mxu1 %v3282_v57  ;;  %v3344_v57 = vld [vmem:[#allocation18 + $0xa0] ss:$8 sps:$4 sm:$0xff]  }
 0x279   : > { %2944 = vmatpush3.bf16.msra.mxu0 %v3279_v58  ;;  %v3347_v58 = vld [vmem:[#allocation16 + $0x20] sm:$0xff]  }
 0x27a   : > { %2133 = vmatprep.subr.bf16.mxu0 %v3312_v34 }
 0x27b   : > { %1430 = vmatpush1.bf16.msra.mxu1 %v3280_v59  ;;  %v3350_v59 = vld [vmem:[#allocation18 + $0xb4] ss:$8 sps:$4 sm:$0xff]  }
 0x27c   : > { %1836 = vmatmul.mubr.bf16.vlgmr.msra.gmra.mrb[12].mxu0 %v1699_v2  ;;  %1431 = vmatprep.subr.bf16.mxu1 %v3285_v1  ;;  %v3354_v1 = vld [vmem:[#allocation18 + $0xc4] ss:$8 sps:$4 sm:$0xff]   ;;  %v3352_v2 = vld [vmem:[#allocation18 + $0xc0] ss:$8 sps:$4 sm:$0xff]  }
 0x27d   : > { %1843 = vmatprep.mubr.bf16.mxu0 %v4262_v18  ;;  %v3306_v18 = vld [vmem:[#allocation13 + $0x1e4] ss:$8 sps:$4 sm:$0xff]   ;;  %2134 = vmatpush1.bf16.msra.mxu0 %v3310_v37 }
 0x27e   : > { %2135 = vmatprep.subr.bf16.mxu0 %v3315_v39 }
 0x27f   : > { %1432 = vmatpush1.bf16.msra.mxu1 %v3283_v3  ;;  %v3355_v3 = vld [vmem:[#allocation16 + $0x30] sm:$0xff]  }
 0x280   : > { %1433 = vmatprep.subr.bf16.mxu1 %v3288_v60  ;;  %v3356_v60 = vld [vmem:[#allocation18 + $0xd0] ss:$8 sps:$4 sm:$0xff]  }
 0x281   : > { %2136 = vmatpush1.bf16.msra.mxu0 %v3313_v38 }
 0x282   : > { %2137 = vmatprep.subr.bf16.mxu0 %v3318_v12  ;;  %v2817_v12 = vld [vmem:[%s4454_s21] ss:$0 sm:$0xff] }
 0x283   : > { %1434 = vmatpush1.bf16.msra.mxu1 %v3286_v4  ;;  %v3358_v4 = vld [vmem:[#allocation18 + $0xd4] ss:$8 sps:$4 sm:$0xff]  }
 0x284   : > { %1844 = vmatmul.mubr.bf16.gmra.mrb[16].mxu0 %v1698_v63  ;;  %1435 = vmatprep.subr.bf16.mxu1 %v3291_v5  ;;  %v3351_v63 = vld [vmem:[#allocation16 + $0x28] sm:$0xff]   ;;  %v3359_v5 = vld [vmem:[#allocation16 + $0x38] sm:$0xff]  }
 0x285   : > { %2138 = vmatpush1.bf16.msra.mxu0 %v3316_v40 }
 0x286   : > { %2139 = vmatprep.subr.bf16.mxu0 %v3321_v36 }
 0x287   : > { %1436 = vmatpush1.bf16.msra.mxu1 %v3289_v6  ;;  %v3362_v6 = vld [vmem:[#allocation18 + $0xe4] ss:$8 sps:$4 sm:$0xff]  }
 0x288   : > { %1437 = vmatprep.subr.bf16.mxu1 %v3294_v7  ;;  %v3360_v7 = vld [vmem:[#allocation18 + $0xe0] ss:$8 sps:$4 sm:$0xff]  }
 0x289   : > { %2140 = vmatpush1.bf16.msra.mxu0 %v3319_v42 }
 0x28a   : > { %2141 = vmatprep.subr.bf16.mxu0 %v3324_v35 }
 0x28b   : > { %1438 = vmatpush1.bf16.msra.mxu1 %v3292_v8  ;;  %v3365_v8 = vld [vmem:[#allocation18 + $0xf4] ss:$8 sps:$4 sm:$0xff]  }
 0x28c   : > { %1439 = vmatprep.subr.bf16.mxu1 %v3297_v9  ;;  %v3363_v9 = vld [vmem:[#allocation18 + $0xf0] ss:$8 sps:$4 sm:$0xff]  }
 0x28d   : > { %2142 = vmatpush1.bf16.msra.mxu0 %v3322_v43 }
 0x28e   : > { %2143 = vmatprep.subr.bf16.mxu0 %v3327_v44 }
 0x28f   : > { %1440 = vmatpush1.bf16.msra.mxu1 %v3295_v10  ;;  %v4280_v10 = vld [vmem:[#allocation19] sm:$0xff]  }
 0x290   : > { %1441 = vmatprep.subr.bf16.mxu1 %v3300_v11 }
 0x291   : > { %2144 = vmatpush1.bf16.msra.mxu0 %v3325_v45 }
 0x292   : > { %2145 = vmatprep.subr.bf16.mxu0 %v3330_v46 }
 0x293   : > { %1442 = vmatpush1.bf16.msra.mxu1 %v3298_v13 }
 0x294   : > { %1443 = vmatprep.subr.bf16.mxu1 %v3303_v15 }
 0x295   : > { %2146 = vmatpush1.bf16.msra.mxu0 %v3328_v47 }
 0x296   : > { %2147 = vmatprep.subr.bf16.mxu0 %v3334_v48 }
 0x297   : > { %1444 = vmatpush1.bf16.msra.mxu1 %v3301_v17 }
 0x298   : > { %1445 = vmatprep.subr.bf16.mxu1 %v3306_v18 }
 0x299   : > { %2148 = vmatpush1.bf16.msra.mxu0 %v3332_v49 }
 0x29a   : > { %2149 = vmatprep.subr.bf16.mxu0 %v3338_v51 }
 0x29b   : > { %1446 = vmatpush1.bf16.msra.mxu1 %v3304_v20 }
 0x29c   : > { %1447 = vmatprep.subr.bf16.mxu1 %v3309_v23 }
 0x29d   : > { %2150 = vmatpush1.bf16.msra.mxu0 %v3336_v0 }
 0x29e   : > { %2151 = vmatprep.subr.bf16.mxu0 %v3342_v53 }
 0x29f   : > { %1448 = vmatpush1.bf16.msra.mxu1 %v3307_v26 }
 0x2a0   : > { %2977 = vmatprep.subr.bf16.mxu1 %v3331_v41 }
 0x2a1   : > { %2152 = vmatpush1.bf16.msra.mxu0 %v3340_v54 }
 0x2a2   : > { %1450 = vmatmul.mubr.bf16.vlgmr.msra.gmra.mrb[0].mxu1 %v1013_v31  ;;  %2153 = vmatprep.subr.bf16.mxu0 %v3346_v56 }
 0x2a3   : > { %1459 = vmatprep.mubr.bf16.mxu1 %v1037_v30  ;;  %2978 = vmatpush3.bf16.msra.mxu1 %v3331_v41 }
 0x2a4   : > { %2979 = vmatprep.subr.bf16.mxu1 %v3335_v50 }
 0x2a5   : > { %2154 = vmatpush1.bf16.msra.mxu0 %v3344_v57 }
 0x2a6   : > { %2155 = vmatprep.subr.bf16.mxu0 %v3350_v59 }
 0x2a7   : > { %2980 = vmatpush3.bf16.msra.mxu1 %v3335_v50 }
 0x2a8   : > { %2981 = vmatprep.subr.bf16.mxu1 %v3339_v52 }
 0x2a9   : > { %2156 = vmatpush1.bf16.msra.mxu0 %v3348_v61 }
 0x2aa   : > { %1460 = vmatmul.mubr.bf16.gmra.mrb[8].mxu1 %v1034_v33  ;;  %2157 = vmatprep.subr.bf16.mxu0 %v3354_v1 }
 0x2ab   : > { %2982 = vmatpush3.bf16.msra.mxu1 %v3339_v52 }
 0x2ac   : > { %2983 = vmatprep.subr.bf16.mxu1 %v3343_v55 }
 0x2ad   : > { %2158 = vmatpush1.bf16.msra.mxu0 %v3352_v2 }
 0x2ae   : > { %2159 = vmatprep.subr.bf16.mxu0 %v3358_v4 }
 0x2af   : > { %2984 = vmatpush3.bf16.msra.mxu1 %v3343_v55 }
 0x2b0   : > { %2985 = vmatprep.subr.bf16.mxu1 %v3347_v58 }
 0x2b1   : > { %2160 = vmatpush1.bf16.msra.mxu0 %v3356_v60 }
 0x2b2   : > { %2161 = vmatprep.subr.bf16.mxu0 %v3362_v6 }
 0x2b3   : > { %2986 = vmatpush3.bf16.msra.mxu1 %v3347_v58 }
 0x2b4   : > { %2987 = vmatprep.subr.bf16.mxu1 %v3351_v63 }
 0x2b5   : > { %2162 = vmatpush1.bf16.msra.mxu0 %v3360_v7 }
 0x2b6   : > { %2163 = vmatprep.subr.bf16.mxu0 %v3365_v8 }
 0x2b7   : > { %2988 = vmatpush3.bf16.msra.mxu1 %v3351_v63 }
 0x2b8   : > { %2989 = vmatprep.subr.bf16.mxu1 %v3355_v3 }
 0x2b9   : > { %2164 = vmatpush1.bf16.msra.mxu0 %v3363_v9 }
 0x2ba   : > { %2997 = vmatprep.subr.bf16.mxu0 %v4280_v10 }
 0x2bb   : > { %2990 = vmatpush3.bf16.msra.mxu1 %v3355_v3 }
 0x2bc   : > { %2991 = vmatprep.subr.bf16.mxu1 %v3359_v5 }
 0x2bf   : > { %2992 = vmatpush3.bf16.msra.mxu1 %v3359_v5 }
 0x32f   : > { %v2917_v11 = vpop.f32.mrb[4].mxu0 }
 0x330   : > { %v2918_v13 = vpop.f32.mrb[5].mxu0 }
 0x331   : > { %v2919_v14 = vadd.f32 %v2918_v13, %v2917_v11  ;;  %v2920_v15 = vpop.f32.mrb[6].mxu0 }
 0x332   : > { %v2921_v16 = vpop.f32.mrb[7].mxu0 }
 0x333   : > { %v2922_v17 = vadd.f32 %v2921_v16, %v2920_v15 }
 0x337   : > { %v2923_v18 = vpop.f32.mrb[8].mxu0 }
 0x338   : > { %v2924_v19 = vpop.f32.mrb[9].mxu0 }
 0x339   : > { %v2925_v21 = vadd.f32 %v2924_v19, %v2923_v18  ;;  %v2926_v20 = vpop.f32.mrb[10].mxu0 }
 0x33a   : > { %v2927_v22 = vpop.f32.mrb[11].mxu0 }
 0x33d   : > { %v1410_v23 = vpop.f32.mrb[4].mxu1 }
 0x33e   : > { %v1412_v24 = vpop.f32.mrb[5].mxu1 }
 0x33f   : > { %v1414_v25 = vpop.f32.mrb[6].mxu1 }
 0x340   : > { %v1415_v26 = vpop.f32.mrb[7].mxu1 }
 0x34f   : > { %v2945_v27 = vpop.f32.mrb[12].mxu0 }
 0x350   : > { %v2946_v28 = vpop.f32.mrb[13].mxu0 }
 0x351   : > { %v2947_v62 = vadd.f32 %v2946_v28, %v2945_v27  ;;  %v2948_v29 = vpop.f32.mrb[14].mxu0 }
 0x352   : > { %v2949_v30 = vpop.f32.mrb[15].mxu0 }
 0x353   : > { %v2950_v31 = vadd.f32 %v2949_v30, %v2948_v29 }
 0x357   : > { %v2951_v32 = vpop.f32.mrb[16].mxu0 }
 0x358   : > { %v2952_v33 = vpop.f32.mrb[17].mxu0 }
 0x359   : > { %v2953_v34 = vadd.f32 %v2952_v33, %v2951_v32  ;;  %v2954_v37 = vpop.f32.mrb[18].mxu0 }
 0x35a   : > { %v2955_v38 = vpop.f32.mrb[19].mxu0 }
 0x375   : > { %v1451_v39 = vpop.f32.mrb[0].mxu1 }
 0x376   : > { %v1644_v40 = vadd.f32 %v2919_v14, %v1451_v39  ;;  %v1453_v41 = vpop.f32.mrb[1].mxu1 }
 0x377   : > { %v1851_v36 = vadd.f32 %v2947_v62, %v1453_v41  ;;  %v1455_v42 = vpop.f32.mrb[2].mxu1 }
 0x378   : > { %v1654_v35 = vadd.f32 %v2817_v12, %v1644_v40  ;;  %v1645_v43 = vadd.f32 %v2922_v17, %v1455_v42  ;;  %v1457_v44 = vpop.f32.mrb[3].mxu1 }
 0x379   : > { %v1854_v45 = vadd.f32 %v2817_v12, %v1851_v36  ;;  %v1852_v46 = vadd.f32 %v2950_v31, %v1457_v44  ;;  %v3367_v36 = vld [vmem:[#allocation19 + $0x8] sm:$0xff]   ;;  %v3368_v44 = vld [vmem:[#allocation19 + $0x10] sm:$0xff]  }
 0x37a   : > { %v1657_v47 = vmax.f32 %v1654_v35, 0.0  ;;  %v1655_v48 = vadd.f32 %v2817_v12, %v1645_v43 }
 0x37b   : > { %v1857_v49 = vmax.f32 %v1854_v45, 0.0  ;;  %v1855_v50 = vadd.f32 %v2817_v12, %v1852_v46 }
 0x37c   : > { %v1861_v51 = vrot.slane %v1657_v47, 7  ;;  %v1658_v0 = vmax.f32 %v1655_v48, 0.0 }
 0x37d   : > { %v1866_v52 = vrot.slane %v1857_v49, 7  ;;  %v1858_v53 = vmax.f32 %v1855_v50, 0.0  ;;  %v1461_v54 = vpop.f32.mrb[8].mxu1  ;;  %v3369_v50 = vld [vmem:[#allocation19 + $0x18] sm:$0xff]  }
 0x37e   : > { %1863 = vst [vmem:[#allocation3] sm:$0xfe] %v1861_v51  ;;  %1864 = vst [vmem:[#allocation3 + $0x10] sm:$0x1] %v1861_v51  ;;  %v1873_v55 = vrot.slane %v1658_v0, 7  ;;  %v1462_v56 = vadd.f32 %v1461_v54, %v1410_v23  ;;  %v1463_v57 = vpop.f32.mrb[9].mxu1 }
 0x37f   : > { %1868 = vst [vmem:[#allocation3 + $0x8] sm:$0xfe] %v1866_v52  ;;  %1869 = vst [vmem:[#allocation3 + $0x18] sm:$0x1] %v1866_v52  ;;  %v1882_v58 = vrot.slane %v1858_v53, 7  ;;  %v1464_v59 = vadd.f32 %v1463_v57, %v1412_v24  ;;  %v1465_v61 = vpop.f32.mrb[10].mxu1 }
 0x380   : > { %1878 = vst [vmem:[#allocation3 + $0x10] sm:$0xf8] %v1873_v55  ;;  %v1646_v63 = vadd.f32 %v2925_v21, %v1462_v56  ;;  %v1466_v1 = vpop.f32.mrb[11].mxu1  ;;  %v3370_v0 = vld [vmem:[#allocation19 + $0x20] sm:$0xff]   ;;  %v3372_v52 = vld [vmem:[#allocation19 + $0x30] sm:$0xff]   ;;  %v3373_v53 = vld [vmem:[#allocation19 + $0x38] sm:$0xff]  }
 0x381   : > { %1887 = vst [vmem:[#allocation3 + $0x18] sm:$0xf8] %v1882_v58  ;;  %v1853_v2 = vadd.f32 %v2953_v34, %v1464_v59  ;;  %v2874_v59 = vld [vmem:[%s4455_s25] ss:$0 sm:$0xff] }
 0x382   : > { %v1656_v3 = vadd.f32 %v2817_v12, %v1646_v63 }
 0x383   : > { %v1856_v60 = vadd.f32 %v2817_v12, %v1853_v2 }
 0x384   : > { %v1659_v4 = vmax.f32 %v1656_v3, 0.0 }
 0x385   : > { %v1859_v5 = vmax.f32 %v1856_v60, 0.0  ;;  %v1889_v18 = vld [vmem:[#allocation3] sm:$0xfe] }
 0x386   : > { %v1874_v6 = vrot.slane %v1659_v4, 7  ;;  %v1899_v11 = vld [vmem:[#allocation3 + $0x8] sm:$0xff]  ;;  %v1903_v43 = vld [vmem:[#allocation3] sm:$0xfc] }
 0x387   : > { %v1883_v7 = vrot.slane %v1859_v5, 7  ;;  %v1891_v13 = vld [vmem:[#allocation3 + $0x10] sm:$0xff]  ;;  %v1890_v15 = vld [vmem:[#allocation3 + $0x8] sm:$0xfe]  ;;  %v2883_v4 = vld [vmem:[%s4220_s3] ss:$0 sm:$0xff] }
 0x388   : > { %v1875_v8 = vsel %vm1872_vm4, %v1873_v55, %v1874_v6  ;;  %v1892_v9 = vld [vmem:[#allocation3 + $0x18] sm:$0xff]  ;;  %v1895_v19 = vpack.c.bf16 %v1891_v13, %v1889_v18  ;;  %v1905_v45 = vpack.c.bf16 %v1891_v13, %v1903_v43 }
 0x389   : > { %1879 = vst [vmem:[#allocation3 + $0x20] sm:$0x7] %v1875_v8  ;;  %v1884_v14 = vsel %vm1872_vm4, %v1882_v58, %v1883_v7  ;;  %v1901_v16 = vpack.c.bf16 %v1892_v9, %v1899_v11  ;;  %v1896_v17 = vpack.c.bf16 %v1892_v9, %v1890_v15  ;;  %v2884_v7 = vld [vmem:[%s4220_s3 + $0x1] ss:$0 sm:$0xff]  ;;  %v2887_v11 = vld [vmem:[%s4220_s3 + $0x2] ss:$0 sm:$0xff] }
 0x38a   : > { %1888 = vst [vmem:[#allocation3 + $0x28] sm:$0x7] %v1884_v14  ;;  %v1942_v20 = vshll.u32 %v1895_v19, 16  ;;  %v1940_v32 = vshrl.u32 %v1895_v19, 16  ;;  %v2330_v49 = vrot.slane %v1905_v45, 1 }
 0x38b   : > { %2993 = vmatprep.mubr.bf16.mxu1 %v1901_v16  ;;  %v1954_v21 = vshll.u32 %v1896_v17, 16  ;;  %v1952_v30 = vshrl.u32 %v1896_v17, 16 }
 0x38c   : > { %v1944_v62 = vrot.slane %v1942_v20, 1  ;;  %v2888_v20 = vld [vmem:[%s4220_s3 + $0x3] ss:$0 sm:$0xff]  ;;  %s3666_s3 = scalar_lea.vmem %s3665_s13, 1024 }
 0x38d   : > { %v1956_v28 = vrot.slane %v1954_v21, 1  ;;  %p3668_p13 = scmp.lt.s32.totalorder %s3666_s3, %s3660_s17 }
 0x38e   : > { %v1945_v39 = vor.u32 %v1944_v62, %v1940_v32 }
 0x38f   : > { %v1957_v34 = vor.u32 %v1956_v28, %v1952_v30  ;;  %p3669_p5 = por %p3668_p13, %p3667_p6 }
 0x390   : > { %v1893_v22 = vld [vmem:[#allocation3 + $0x20] sm:$0x7] }
 0x391   : > { %v1900_v23 = vld [vmem:[#allocation3 + $0x28] sm:$0x3]  ;;  %v1897_v25 = vpack.c.bf16 %v1893_v22, %v1893_v22  ;;  %v1904_v12 = vld [vmem:[#allocation3 + $0x20] sm:$0xf]  ;;  %p3670_p1 = pnand %p3669_p5, %p3663_p4 }
 0x392   : > { %v1894_v24 = vld [vmem:[#allocation3 + $0x28] sm:$0x7]  ;;  %v1902_v26 = vpack.c.bf16 %v1900_v23, %v1900_v23  ;;  %v1906_v35 = vpack.c.bf16 %v1904_v12, %v1904_v12 }
 0x393   : > { %v1898_v27 = vpack.c.bf16 %v1894_v24, %v1894_v24  ;;  %v1947_v29 = vshll.u32 %v1897_v25, 16  ;;  %v1963_v46 = vshrl.u32 %v1897_v25, 16 }
 0x394   : > { %2994 = vmatmul.mubr.bf16.vlgmr.msra.gmra.mrb[12].mxu1 %v1902_v26  ;;  %v2331_v47 = vrot.slane %v1906_v35, 1 }
 0x395   : > { %v1959_v31 = vshll.u32 %v1898_v27, 16  ;;  %v1949_v33 = vrot.slane %v1947_v29, 1  ;;  %v1966_v38 = vshrl.u32 %v1898_v27, 16 }
 0x396   : > { %v2332_v51 = vsel %vm1696_vm3, %v2330_v49, %v2331_v47 }
 0x397   : > { %v1961_v37 = vrot.slane %v1959_v31, 1  ;;  %v1950_v42 = vsel %vm977_vm2, %v1945_v39, %v1949_v33  ;;  %v1965_v48 = vor.u32 %v1963_v46, %v1949_v33 }
 0x399   : > { %v1962_v40 = vsel %vm977_vm2, %v1957_v34, %v1961_v37  ;;  %v1968_v41 = vor.u32 %v1966_v38, %v1961_v37 }
 0x39a   : > { %2165 = vmatprep.mubr.bf16.mxu0 %v1962_v40 }
 0x39b   : > { %2166 = vmatmul.mubr.bf16.vlgmr.msra.gmra.mrb[20].mxu0 %v1950_v42 }
 0x39c   : > { %2998 = vmatpush3.bf16.msra.mxu0 %v4280_v10  ;;  %2175 = vmatprep.mubr.bf16.mxu0 %v1968_v41  ;;  %v3371_v10 = vld [vmem:[#allocation19 + $0x28] sm:$0xff]  }
 0x39d   : > { %2999 = vmatprep.subr.bf16.mxu0 %v3367_v36 }
 0x3a0   : > { %3000 = vmatpush3.bf16.msra.mxu0 %v3367_v36 }
 0x3a1   : > { %3001 = vmatprep.subr.bf16.mxu0 %v3368_v44 }
 0x3a3   : > { %2176 = vmatmul.mubr.bf16.gmra.mrb[24].mxu0 %v1965_v48 }
 0x3a4   : > { %3002 = vmatpush3.bf16.msra.mxu0 %v3368_v44  ;;  %3013 = vmatprep.mubr.bf16.mxu0 %v2332_v51 }
 0x3a5   : > { %3003 = vmatprep.subr.bf16.mxu0 %v3369_v50 }
 0x3a8   : > { %3004 = vmatpush3.bf16.msra.mxu0 %v3369_v50 }
 0x3a9   : > { %3005 = vmatprep.subr.bf16.mxu0 %v3370_v0 }
 0x3ac   : > { %3006 = vmatpush3.bf16.msra.mxu0 %v3370_v0 }
 0x3ad   : > { %3007 = vmatprep.subr.bf16.mxu0 %v3371_v10 }
 0x3b0   : > { %3008 = vmatpush3.bf16.msra.mxu0 %v3371_v10 }
 0x3b1   : > { %3009 = vmatprep.subr.bf16.mxu0 %v3372_v52 }
 0x3b4   : > { %3010 = vmatpush3.bf16.msra.mxu0 %v3372_v52 }
 0x3b5   : > { %3011 = vmatprep.subr.bf16.mxu0 %v3373_v53 }
 0x3b8   : > { %3012 = vmatpush3.bf16.msra.mxu0 %v3373_v53 }
 0x3bb   : > { %3014 = vmatmul.mubr.bf16.vlgmr.msra.gmra.mrb[28].mxu0 %v2331_v47 }
 0x467   : > { %v2995_v54 = vpop.f32.mrb[12].mxu1 }
 0x468   : > { %v2282_v55 = vpop.f32.mrb[13].mxu1 }
 0x469   : > { %v2996_v56 = vpop.f32.mrb[14].mxu1 }
 0x46a   : > { %v2285_v57 = vpop.f32.mrb[15].mxu1 }
 0x46e   : > { %v2167_v58 = vpop.f32.mrb[20].mxu0 }
 0x46f   : > { %v2296_v61 = vadd.f32 %v2282_v55, %v2167_v58  ;;  %v2169_v63 = vpop.f32.mrb[21].mxu0 }
 0x470   : > { %v2171_v1 = vpop.f32.mrb[22].mxu0 }
 0x471   : > { %v2306_v2 = vadd.f32 %v2874_v59, %v2296_v61  ;;  %v2297_v3 = vadd.f32 %v2285_v57, %v2171_v1  ;;  %v2173_v60 = vpop.f32.mrb[23].mxu0 }
 0x473   : > { %v2309_v5 = vmax.f32 %v2306_v2, 0.0  ;;  %v2307_v6 = vadd.f32 %v2874_v59, %v2297_v3 }
 0x475   : > { %v2446_v8 = vmul.f32 %v2883_v4, %v2309_v5  ;;  %v2310_v9 = vmax.f32 %v2307_v6, 0.0 }
 0x476   : > { %v2177_v13 = vpop.f32.mrb[24].mxu0 }
 0x477   : > { %v2451_v14 = vadd.f32 %v2884_v7, %v2446_v8  ;;  %v2298_v15 = vadd.f32 %v2995_v54, %v2177_v13  ;;  %v2179_v16 = vpop.f32.mrb[25].mxu0  ;;  %v2463_v18 = vmul.f32 %v2887_v11, %v2310_v9 }
 0x478   : > { %v2181_v17 = vpop.f32.mrb[26].mxu0 }
 0x479   : > { %2452 = vst [vmem:[%s4297_s9] sm:$0xff] %v2451_v14  ;;  %v2308_v19 = vadd.f32 %v2874_v59, %v2298_v15  ;;  %v2182_v21 = vpop.f32.mrb[27].mxu0  ;;  %v2469_v23 = vadd.f32 %v2888_v20, %v2463_v18 }
 0x47b   : > { %v2311_v22 = vmax.f32 %v2308_v19, 0.0  ;;  %v2474_v26 = vrot.slane %v2469_v23, 2 }
 0x47d   : > { %v2464_v24 = vmul.f32 %v2887_v11, %v2311_v22 }
 0x47f   : > { %v2470_v25 = vadd.f32 %v2888_v20, %v2464_v24 }
 0x481   : > { %v2475_v27 = vrot.slane %v2470_v25, 2 }
 0x483   : > { %v2476_v28 = vsel %vm2473_vm5, %v2474_v26, %v2475_v27 }
 0x484   : > { %2478 = vst [vmem:[%s4297_s9 + $0x10] sm:$0xff] %v2476_v28 }
 0x48e   : > { %v3015_v62 = vpop.f32.mrb[28].mxu0 }
 0x48f   : > { %v2433_v29 = vadd.f32 %v3015_v62, %v2179_v16  ;;  %v2417_v30 = vpop.f32.mrb[29].mxu0 }
 0x490   : > { %v2431_v31 = vadd.f32 %v2417_v30, %v2169_v63  ;;  %v3016_v32 = vpop.f32.mrb[30].mxu0 }
 0x491   : > { %v2436_v33 = vadd.f32 %v2874_v59, %v2433_v29  ;;  %v2420_v34 = vpop.f32.mrb[31].mxu0 }
 0x492   : > { %v2434_v37 = vadd.f32 %v2874_v59, %v2431_v31  ;;  %v2432_v38 = vadd.f32 %v2420_v34, %v2173_v60 }
 0x493   : > { %v2439_v39 = vmax.f32 %v2436_v33, 0.0 }
 0x494   : > { %v2437_v12 = vmax.f32 %v2434_v37, 0.0  ;;  %v2435_v40 = vadd.f32 %v2874_v59, %v2432_v38 }
 0x495   : > { %v2480_v41 = vmul.f32 %v2887_v11, %v2439_v39 }
 0x496   : > { %v2453_v36 = vmul.f32 %v2883_v4, %v2437_v12  ;;  %v2438_v42 = vmax.f32 %v2435_v40, 0.0 }
 0x497   : > { %v2482_v35 = vadd.f32 %v2888_v20, %v2480_v41 }
 0x498   : > { %v2454_v43 = vadd.f32 %v2884_v7, %v2453_v36  ;;  %v2479_v44 = vmul.f32 %v2887_v11, %v2438_v42 }
 0x499   : > { %v2486_v46 = vrot.slane %v2482_v35, 2 }
 0x49a   : > { %2455 = vst [vmem:[%s4297_s9 + $0x8] sm:$0xff] %v2454_v43  ;;  %v2481_v45 = vadd.f32 %v2888_v20, %v2479_v44 }
 0x49c   : > { %v2485_v47 = vrot.slane %v2481_v45, 2 }
 0x49e   : > { %v2487_v48 = vsel %vm2473_vm5, %v2485_v47, %v2486_v46 }
 0x49f   : > { %2489 = vst [vmem:[%s4297_s9 + $0x18] sm:$0xff] %v2487_v48 }
 0x4a0   : > { %3673 = shalt.err (!%p3670_p1)
}
 0x4a1   : > { %s3674_s20 = scalar_lea.hbm %s4311_s18, 512  ;;  %s3678_s8 = scalar_lea.hbm %s4457_s6, 1024 }
 0x4a2   : > { %p3675_p12 = scmp.ne.s32.totalorder %s4311_s18, %s3674_s20  ;;  %p3679_p8 = scmp.lt.u32.totalorder %s4311_s18, %s4457_s6 }
 0x4a3   : > { %p3680_p11 = scmp.lt.u32.totalorder %s3678_s8, %s3674_s20  ;;  %p3682_p7 = scmp.lt.u32.totalorder %s3674_s20, %s4311_s18 }
 0x4a4   : > { %p3676_p0 = pnand %p3675_p12, %p4458_p10 }
 0x4a5   : > { %p3681_p3 = por %p3680_p11, %p3679_p8 }
 0x4a6   : > { %p3677_p2 = pneg %p3676_p0 }
 0x4a7   : > { %p3683_p9 = por %p3682_p7, %p3681_p3 }
 0x4a9   : > { %p3684_p4 = pnand %p3683_p9, %p3677_p2 }
 0x4ab   : > { %3687 = shalt.err (!%p3684_p4)
}
 0x4ac   : > { %s3767_s15 = smov 256   ;;  %s3768_s22 = smov 16  }
 0x4ad   : > { %3055 = dma.vmem_to_hbm [thread:$0]  (%p4458_p10), %s4306_s4, 512, %s4311_s18, %s2491_s12, %s3767_s15, %s3767_s15, %s3768_s22  }
 0x4ae PF: > { %s4459_s25 = sld [smem:[#allocation29_spill]]  ;;  %s4460_s1 = sld [smem:[#allocation36_spill]] }
 0x4af   : > { %p4462_p13 = scmp.ge.s32.totalorder %s3746_s28, 2 }
 0x4b4   : > { %s2520_s9 = sand.u32 1, %s4459_s25   ;;  %p4461_p6 = scmp.ne.s32.totalorder %s4460_s1, 0 }
 0x4b5   : > { %s2521_s29 = scalar_lea.sflag [#allocation6], %s2520_s9 }
 0x4b6   : > { %p3090_p5 = pnand %p4462_p13, %p4461_p6 }
 0x4b8   : > { %3729 = dma.done.wait (!%p3090_p5), %s2521_s29, 512  }
 0x4b9   : > { %3731 = vsyncadd (!%p3090_p5), %s2521_s29, 4294966784  ;;  %s4463_s28 = sld [smem:[#allocation33_spill]]  ;;  %s4464_s27 = sld [smem:[#allocation30_spill]] }
 0x4ba   : > { %s4465_s5 = sld [smem:[#allocation34_spill]]  ;;  %s4466_s25 = smov %s3738_s26 }
 0x4bf   : > { %p33_p1 = scmp.ge.s32.totalorder %s4463_s28, 4   ;;  %s4467_s26 = smov %s4464_s27 }
 0x4c0   : > { %s4468_s27 = smov %s4465_s5 }
 0x4c1   :  { %35 = sbr.rel (!%p33_p1) target bundleno = 21 (0x15), region = 176 }
 0x4c8   :  { %2526 = vsyncpa [#allocation5], 1 }
 0x4c9   :  { %2528 = vsyncpa [#allocation5 + $0x1], 1 }
 0x4ca   :  { %2529 = vsyncpa [#allocation8], 1 }
 0x4cb   :  { %2531 = vsyncpa [#allocation8 + $0x1], 1 }
 0x4cc   :  { %2532 = vsyncpa [#allocation11], 1 }
 0x4cd   :  { %2533 = vsyncpa [#allocation14], 1 }
 0x4ce   :  { %2534 = vsyncpa [#allocation17], 1 }
 0x4cf   :  { %2535 = vsyncpa [#allocation20], 1 }
 0x4d0   :  { %2536 = vsyncpa [#allocation6], 1 }
 0x4d1   :  { %2538 = vsyncpa [#allocation6 + $0x1], 1 }

</bundles_post_ra>
